<compile_context>
chip_gen: v6e
topology: v6e:2x2x1
jax: 0.10.0
libtpu: 0.0.40
codegen_flags: <defaults>
</compile_context>

<pallas_src>
import functools
import math

import jax
import jax.numpy as jnp
from jax import lax
from jax.experimental import pallas as pl
from jax.experimental.pallas import tpu as pltpu

LANE = 128  # lane width used to pad the narrow head outputs (lane-dense stores)


# --------------------------------------------------------------------------
# helpers
# --------------------------------------------------------------------------
def _bf16(w):
    return w.astype(jnp.bfloat16)


def _rb(b):
    return b.reshape(1, -1)


def _round_lanes(n):
    """Round n up to a multiple of 128 (minimum 128) for lane-dense tiles."""
    return max(LANE, ((n + LANE - 1) // LANE) * LANE)


def _pad_cols(w, b, width):
    return (jnp.pad(w, ((0, 0), (0, width - w.shape[1]))),
            jnp.pad(b, ((0, width - b.shape[0]),)))


# --------------------------------------------------------------------------
# The fused per-batch DETR kernel
#   backbone 1x1 conv + ReLU  -> input_proj            (VPU, tiny K)
#   q/k/v proj (K path fused with memory+pos add), softmax, PV, out proj (MXU)
#   class head + 3-layer bbox MLP + sigmoid            (MXU, lane-dense out)
# --------------------------------------------------------------------------
def _detr_kernel(x_ref, pos_ref, qp_ref,
                 wb_ref, bb_ref, wp_ref, bp_ref,
                 wk_ref, bk_ref, wv_ref, bv_ref, wo_ref, bo_ref,
                 cw1_ref, cb1_ref, w2_ref, b2_ref, w3_ref, b3_ref,
                 logits_ref, coord_ref, *, scale, cls_lanes):
    x = x_ref[0]                                                   # (S, Cin) f32

    def vpu_matmul(lhs, w_ref, b_ref):
        # lhs (S, K) f32 with tiny static K: unrolled VPU broadcast-FMAs
        # instead of a <3%-filled MXU pass (K=3 conv, K=8 input_proj).
        acc = b_ref[...]                                           # (1, N) f32
        for k in range(w_ref.shape[0]):
            acc = acc + lhs[:, k:k + 1] * w_ref[k:k + 1, :]
        return acc                                                 # (S, N) f32

    # ---- backbone 1x1 conv + ReLU, then input_proj; memory stays in VMEM ----
    feat = jnp.maximum(vpu_matmul(x, wb_ref, bb_ref), 0.0)         # (S, bb_ch)
    mem = vpu_matmul(feat, wp_ref, bp_ref)                         # (S, D)

    # ---- single-layer cross-attention decoder (synthetic transformer) ----
    # TODO(synk): for real DETR sizes (S ~ 1e3+, D=256, 8 heads, 6 layers)
    # block the K/V/softmax path over S flash-style instead of holding full
    # (S, D) K, V and (Q, S) scores per batch element.
    kin = (mem + pos_ref[...]).astype(jnp.bfloat16)                # (S, D)
    kp = (jnp.dot(kin, wk_ref[...], preferred_element_type=jnp.float32)
          + bk_ref[...]).astype(jnp.bfloat16)                      # (S, D)
    vp = (jnp.dot(mem.astype(jnp.bfloat16), wv_ref[...],
                  preferred_element_type=jnp.float32)
          + bv_ref[...]).astype(jnp.bfloat16)                      # (S, D)
    qp = qp_ref[...].astype(jnp.bfloat16)       # pre-projected query (Q, D)

    # scores: contract on D directly (no materialized K transpose)
    sc = lax.dot_general(qp, kp, (((1,), (1,)), ((), ())),
                         preferred_element_type=jnp.float32) * scale   # (Q, S)
    # TODO(synk): key_padding_mask not applied (synthetic backbone emits an
    # all-valid mask); add -inf masking here before softmax for padded inputs.
    sc = sc - jnp.max(sc, axis=-1, keepdims=True)
    e = jnp.exp(sc)
    prob = e * pl.reciprocal(jnp.sum(e, axis=-1, keepdims=True), approx=True)

    attn = jnp.dot(prob.astype(jnp.bfloat16), vp,
                   preferred_element_type=jnp.float32)             # (Q, D)
    hs = (jnp.dot(attn.astype(jnp.bfloat16), wo_ref[...],
                  preferred_element_type=jnp.float32) + bo_ref[...])   # (Q, D)
    hs_b = hs.astype(jnp.bfloat16)

    # ---- prediction heads: class head + bbox-MLP layer 1 share one MXU pass
    r = jnp.dot(hs_b, cw1_ref[...],
                preferred_element_type=jnp.float32) + cb1_ref[...]     # (Q, 2*128)
    logits = r[:, :cls_lanes]                                          # (Q, 128)
    h1 = jnp.maximum(r[:, cls_lanes:], 0.0)                            # (Q, 128)
    h2 = jnp.maximum(jnp.dot(h1.astype(jnp.bfloat16), w2_ref[...],
                             preferred_element_type=jnp.float32)
                     + b2_ref[...], 0.0)                               # (Q, D)
    coord = jax.nn.sigmoid(jnp.dot(h2.astype(jnp.bfloat16), w3_ref[...],
                                   preferred_element_type=jnp.float32)
                           + b3_ref[...])                              # (Q, 128)

    logits_ref[0] = logits.astype(logits_ref.dtype)                    # lane-dense
    coord_ref[0] = coord.astype(coord_ref.dtype)                       # lane-dense


def _fused_detr_call(x, pos, qp, wb, bb, wp, bp, wk, bk, wv, bv, wo, bo,
                     cw1, cb1, w2p, b2, w3p, b3p, cls_lanes):
    bsz, s, cin = x.shape
    d = pos.shape[1]
    nq = qp.shape[0]
    bb_ch = wb.shape[1]
    nh = cw1.shape[1]            # cls_lanes + hid_lanes
    h1_in = w2p.shape[0]         # hid_lanes
    box_lanes = w3p.shape[1]
    scale = 1.0 / (d ** 0.5)

    def const(shape):
        n = len(shape)
        return pl.BlockSpec(shape, lambda b, _n=n: (0,) * _n)

    kernel = functools.partial(_detr_kernel, scale=scale, cls_lanes=cls_lanes)
    return pl.pallas_call(
        kernel,
        grid=(bsz,),
        in_specs=[
            pl.BlockSpec((1, s, cin), lambda b: (b, 0, 0)),   # per-batch pixels
            const((s, d)),                                    # pos (batch-invariant)
            const((nq, d)),                                   # pre-projected queries
            const((cin, bb_ch)), const((1, bb_ch)),           # backbone conv
            const((bb_ch, d)), const((1, d)),                 # input_proj
            const((d, d)), const((1, d)),                     # Wk, bk
            const((d, d)), const((1, d)),                     # Wv, bv
            const((d, d)), const((1, d)),                     # Wo, bo
            const((d, nh)), const((1, nh)),                   # [class | bbox1]
            const((h1_in, d)), const((1, d)),                 # bbox2
            const((d, box_lanes)), const((1, box_lanes)),     # bbox3 (padded)
        ],
        out_specs=(pl.BlockSpec((1, nq, cls_lanes), lambda b: (b, 0, 0)),
                   pl.BlockSpec((1, nq, box_lanes), lambda b: (b, 0, 0))),
        out_shape=(jax.ShapeDtypeStruct((bsz, nq, cls_lanes), jnp.float32),
                   jax.ShapeDtypeStruct((bsz, nq, box_lanes), jnp.float32)),
        compiler_params=pltpu.CompilerParams(dimension_semantics=("parallel",)),
    )(x, pos, qp,
      wb, _rb(bb), wp, _rb(bp),
      _bf16(wk), _rb(bk), _bf16(wv), _rb(bv), _bf16(wo), _rb(bo),
      _bf16(cw1), _rb(cb1), _bf16(w2p), _rb(b2), _bf16(w3p), _rb(b3p))


# --------------------------------------------------------------------------
# Glue: positional encoding, parameter init, model wiring
# --------------------------------------------------------------------------
def sine_pos_embed(h, w, d):
    """DETR-style sine positional embedding (normalize=True, scale=2*pi),
    computed once as (H*W, D) -- no batch broadcast."""
    npf = d // 2
    eps = 1e-6
    two_pi = 2.0 * math.pi
    ys = jnp.arange(1, h + 1, dtype=jnp.float32) / (h + eps) * two_pi
    xs = jnp.arange(1, w + 1, dtype=jnp.float32) / (w + eps) * two_pi
    dim_t = 10000.0 ** (2.0 * (jnp.arange(npf) // 2).astype(jnp.float32) / npf)
    pos_x = jnp.broadcast_to(xs[None, :, None] / dim_t, (h, w, npf))
    pos_y = jnp.broadcast_to(ys[:, None, None] / dim_t, (h, w, npf))

    def interleave(p):
        return jnp.stack([jnp.sin(p[..., 0::2]), jnp.cos(p[..., 1::2])],
                         axis=-1).reshape(h, w, npf)

    pos = jnp.concatenate([interleave(pos_y), interleave(pos_x)], axis=-1)  # (H,W,D)
    return pos.reshape(h * w, d).astype(jnp.float32)                        # (S, D)


def init_params(key, in_ch, bb_ch, hidden, num_queries, num_classes):
    keys = jax.random.split(key, 16)

    def lin(k, din, dout, scale=0.05):
        kw, kb = jax.random.split(k)
        return (scale * jax.random.normal(kw, (din, dout), jnp.float32),
                scale * jax.random.normal(kb, (dout,), jnp.float32))

    p = {}
    p["backbone_w"], p["backbone_b"] = lin(keys[0], in_ch, bb_ch)
    p["input_proj_w"], p["input_proj_b"] = lin(keys[1], bb_ch, hidden)
    p["query_embed"] = 0.05 * jax.random.normal(keys[2], (num_queries, hidden),
                                                jnp.float32)
    p["wq"], p["bq"] = lin(keys[3], hidden, hidden)
    p["wk"], p["bk"] = lin(keys[4], hidden, hidden)
    p["wv"], p["bv"] = lin(keys[5], hidden, hidden)
    p["wo"], p["bo"] = lin(keys[6], hidden, hidden)
    p["class_w"], p["class_b"] = lin(keys[7], hidden, num_classes + 1)
    p["bbox_w1"], p["bbox_b1"] = lin(keys[8], hidden, hidden)
    p["bbox_w2"], p["bbox_b2"] = lin(keys[9], hidden, hidden)
    p["bbox_w3"], p["bbox_b3"] = lin(keys[10], hidden, 4)
    return p


def detr_forward(params, samples):
    bsz, cin, h, w = samples.shape
    d = params["input_proj_w"].shape[1]
    s = h * w
    nclass1 = params["class_w"].shape[1]

    # features, pos = backbone(samples); src, mask = features[-1].decompose()
    x = jnp.transpose(samples, (0, 2, 3, 1)).reshape(bsz, s, cin)     # (B, S, Cin)
    mask = jnp.zeros((bsz, h, w), dtype=jnp.bool_)                    # all valid
    assert mask is not None
    pos = sine_pos_embed(h, w, d)                                     # (S, D)

    # batch-invariant query projection hoisted out of the per-batch grid loop
    qp = params["query_embed"] @ params["wq"] + params["bq"]          # (Q, D)

    # head weight prep: pad class head / bbox layers to 128-lane multiples so
    # all head stores and in-kernel splits are lane-dense / tile-aligned, and
    # fuse class head with bbox-MLP layer 1 into a single wide MXU pass.
    cls_lanes = _round_lanes(nclass1)
    hid_lanes = _round_lanes(d)
    cw, cb = _pad_cols(params["class_w"], params["class_b"], cls_lanes)
    w1, b1 = _pad_cols(params["bbox_w1"], params["bbox_b1"], hid_lanes)
    w3p, b3p = _pad_cols(params["bbox_w3"], params["bbox_b3"], LANE)
    cw1 = jnp.concatenate([cw, w1], axis=1)                           # (D, 2*128)
    cb1 = jnp.concatenate([cb, b1])                                   # (2*128,)
    w2p = jnp.pad(params["bbox_w2"],
                  ((0, hid_lanes - d), (0, 0)))                       # (128, D)

    logits_p, coord_p = _fused_detr_call(
        x, pos, qp,
        params["backbone_w"], params["backbone_b"],
        params["input_proj_w"], params["input_proj_b"],
        params["wk"], params["bk"], params["wv"], params["bv"],
        params["wo"], params["bo"],
        cw1, cb1, w2p, params["bbox_b2"], w3p, b3p, cls_lanes)

    # single decoder layer: hs[-1] is the decoder output itself (aux_loss=False)
    return {"pred_logits": logits_p[:, :, :nclass1],
            "pred_boxes": coord_p[:, :, :4]}


# --------------------------------------------------------------------------
if __name__ == "__main__":
    B, CIN, H, W = 2, 3, 16, 16
    BB_CH = 8          # backbone.num_channels
    HIDDEN = 32        # transformer.dim
    NUM_QUERIES = 8
    NUM_CLASSES = 4

    key = jax.random.PRNGKey(0)
    pkey, xkey = jax.random.split(key)
    params = init_params(pkey, CIN, BB_CH, HIDDEN, NUM_QUERIES, NUM_CLASSES)
    samples = jax.random.normal(xkey, (B, CIN, H, W), dtype=jnp.float32)  # NCHW

    out = jax.jit(detr_forward)(params, samples)
    jax.block_until_ready(out)

    assert out["pred_logits"].shape == (B, NUM_QUERIES, NUM_CLASSES + 1)
    assert out["pred_boxes"].shape == (B, NUM_QUERIES, 4)
    assert bool(jnp.all(jnp.isfinite(out["pred_logits"])))
    assert bool(jnp.all(out["pred_boxes"] >= 0.0)) and bool(jnp.all(out["pred_boxes"] <= 1.0))
    print("KERNEL_OK")
</pallas_src>

<mosaic_0001>
module attributes {stable_mosaic.version = 11 : i64} {
  func.func @_detr_kernel(%arg0: i32, %arg1: memref<1x256x3xf32, #tpu.memory_space<vmem>>, %arg2: memref<256x32xf32, #tpu.memory_space<vmem>>, %arg3: memref<8x32xf32, #tpu.memory_space<vmem>>, %arg4: memref<3x8xf32, #tpu.memory_space<vmem>>, %arg5: memref<1x8xf32, #tpu.memory_space<vmem>>, %arg6: memref<8x32xf32, #tpu.memory_space<vmem>>, %arg7: memref<1x32xf32, #tpu.memory_space<vmem>>, %arg8: memref<32x32xbf16, #tpu.memory_space<vmem>>, %arg9: memref<1x32xf32, #tpu.memory_space<vmem>>, %arg10: memref<32x32xbf16, #tpu.memory_space<vmem>>, %arg11: memref<1x32xf32, #tpu.memory_space<vmem>>, %arg12: memref<32x32xbf16, #tpu.memory_space<vmem>>, %arg13: memref<1x32xf32, #tpu.memory_space<vmem>>, %arg14: memref<32x256xbf16, #tpu.memory_space<vmem>>, %arg15: memref<1x256xf32, #tpu.memory_space<vmem>>, %arg16: memref<128x32xbf16, #tpu.memory_space<vmem>>, %arg17: memref<1x32xf32, #tpu.memory_space<vmem>>, %arg18: memref<32x128xbf16, #tpu.memory_space<vmem>>, %arg19: memref<1x128xf32, #tpu.memory_space<vmem>>, %arg20: memref<1x8x128xf32, #tpu.memory_space<vmem>>, %arg21: memref<1x8x128xf32, #tpu.memory_space<vmem>>) attributes {dimension_semantics = [#tpu.dimension_semantics<parallel>], iteration_bounds = array<i64: 2>, scalar_prefetch = 0 : i64, scratch_operands = 0 : i64, tpu.core_type = #tpu.core_type<tc>, window_params = [{transform_indices = @transform_0, window_bounds = array<i64: 1, 256, 3>}, {pipeline_mode = #tpu.pipeline_mode<synchronous>, transform_indices = @transform_1, window_bounds = array<i64: 256, 32>}, {pipeline_mode = #tpu.pipeline_mode<synchronous>, transform_indices = @transform_2, window_bounds = array<i64: 8, 32>}, {pipeline_mode = #tpu.pipeline_mode<synchronous>, transform_indices = @transform_3, window_bounds = array<i64: 3, 8>}, {pipeline_mode = #tpu.pipeline_mode<synchronous>, transform_indices = @transform_4, window_bounds = array<i64: 1, 8>}, {pipeline_mode = #tpu.pipeline_mode<synchronous>, transform_indices = @transform_5, window_bounds = array<i64: 8, 32>}, {pipeline_mode = #tpu.pipeline_mode<synchronous>, transform_indices = @transform_6, window_bounds = array<i64: 1, 32>}, {pipeline_mode = #tpu.pipeline_mode<synchronous>, transform_indices = @transform_7, window_bounds = array<i64: 32, 32>}, {pipeline_mode = #tpu.pipeline_mode<synchronous>, transform_indices = @transform_8, window_bounds = array<i64: 1, 32>}, {pipeline_mode = #tpu.pipeline_mode<synchronous>, transform_indices = @transform_9, window_bounds = array<i64: 32, 32>}, {pipeline_mode = #tpu.pipeline_mode<synchronous>, transform_indices = @transform_10, window_bounds = array<i64: 1, 32>}, {pipeline_mode = #tpu.pipeline_mode<synchronous>, transform_indices = @transform_11, window_bounds = array<i64: 32, 32>}, {pipeline_mode = #tpu.pipeline_mode<synchronous>, transform_indices = @transform_12, window_bounds = array<i64: 1, 32>}, {pipeline_mode = #tpu.pipeline_mode<synchronous>, transform_indices = @transform_13, window_bounds = array<i64: 32, 256>}, {pipeline_mode = #tpu.pipeline_mode<synchronous>, transform_indices = @transform_14, window_bounds = array<i64: 1, 256>}, {pipeline_mode = #tpu.pipeline_mode<synchronous>, transform_indices = @transform_15, window_bounds = array<i64: 128, 32>}, {pipeline_mode = #tpu.pipeline_mode<synchronous>, transform_indices = @transform_16, window_bounds = array<i64: 1, 32>}, {pipeline_mode = #tpu.pipeline_mode<synchronous>, transform_indices = @transform_17, window_bounds = array<i64: 32, 128>}, {pipeline_mode = #tpu.pipeline_mode<synchronous>, transform_indices = @transform_18, window_bounds = array<i64: 1, 128>}, {transform_indices = @transform_19, window_bounds = array<i64: 1, 8, 128>}, {transform_indices = @transform_20, window_bounds = array<i64: 1, 8, 128>}]} {
    %c0 = arith.constant 0 : index
    %c0_0 = arith.constant 0 : index
    %c0_1 = arith.constant 0 : index
    %0 = vector.load %arg1[%c0, %c0_0, %c0_1] : memref<1x256x3xf32, #tpu.memory_space<vmem>>, vector<1x256x3xf32>
    %1 = vector.shape_cast %0 : vector<1x256x3xf32> to vector<256x3xf32>
    %c0_2 = arith.constant 0 : index
    %c0_3 = arith.constant 0 : index
    %2 = vector.load %arg5[%c0_2, %c0_3] : memref<1x8xf32, #tpu.memory_space<vmem>>, vector<1x8xf32>
    %3 = vector.extract_strided_slice %1 {offsets = [0, 0], sizes = [256, 1], strides = [1, 1]} : vector<256x3xf32> to vector<256x1xf32>
    %c0_4 = arith.constant 0 : index
    %c0_5 = arith.constant 0 : index
    %4 = vector.load %arg4[%c0_4, %c0_5] : memref<3x8xf32, #tpu.memory_space<vmem>>, vector<1x8xf32>
    %5 = vector.broadcast %3 : vector<256x1xf32> to vector<256x8xf32>
    %6 = vector.broadcast %4 : vector<1x8xf32> to vector<256x8xf32>
    %7 = arith.mulf %5, %6 : vector<256x8xf32>
    %8 = vector.broadcast %2 : vector<1x8xf32> to vector<256x8xf32>
    %9 = arith.addf %8, %7 : vector<256x8xf32>
    %10 = vector.extract_strided_slice %1 {offsets = [0, 1], sizes = [256, 1], strides = [1, 1]} : vector<256x3xf32> to vector<256x1xf32>
    %c1 = arith.constant 1 : index
    %c0_6 = arith.constant 0 : index
    %11 = vector.load %arg4[%c1, %c0_6] : memref<3x8xf32, #tpu.memory_space<vmem>>, vector<1x8xf32>
    %12 = vector.broadcast %10 : vector<256x1xf32> to vector<256x8xf32>
    %13 = vector.broadcast %11 : vector<1x8xf32> to vector<256x8xf32>
    %14 = arith.mulf %12, %13 : vector<256x8xf32>
    %15 = arith.addf %9, %14 : vector<256x8xf32>
    %16 = vector.extract_strided_slice %1 {offsets = [0, 2], sizes = [256, 1], strides = [1, 1]} : vector<256x3xf32> to vector<256x1xf32>
    %c2 = arith.constant 2 : index
    %c0_7 = arith.constant 0 : index
    %17 = vector.load %arg4[%c2, %c0_7] : memref<3x8xf32, #tpu.memory_space<vmem>>, vector<1x8xf32>
    %18 = vector.broadcast %16 : vector<256x1xf32> to vector<256x8xf32>
    %19 = vector.broadcast %17 : vector<1x8xf32> to vector<256x8xf32>
    %20 = arith.mulf %18, %19 : vector<256x8xf32>
    %21 = arith.addf %15, %20 : vector<256x8xf32>
    %cst = arith.constant 0.000000e+00 : f32
    %22 = vector.broadcast %cst : f32 to vector<256x8xf32>
    %23 = arith.maximumf %21, %22 : vector<256x8xf32>
    %c0_8 = arith.constant 0 : index
    %c0_9 = arith.constant 0 : index
    %24 = vector.load %arg7[%c0_8, %c0_9] : memref<1x32xf32, #tpu.memory_space<vmem>>, vector<1x32xf32>
    %25 = vector.extract_strided_slice %23 {offsets = [0, 0], sizes = [256, 1], strides = [1, 1]} : vector<256x8xf32> to vector<256x1xf32>
    %c0_10 = arith.constant 0 : index
    %c0_11 = arith.constant 0 : index
    %26 = vector.load %arg6[%c0_10, %c0_11] : memref<8x32xf32, #tpu.memory_space<vmem>>, vector<1x32xf32>
    %27 = vector.broadcast %25 : vector<256x1xf32> to vector<256x32xf32>
    %28 = vector.broadcast %26 : vector<1x32xf32> to vector<256x32xf32>
    %29 = arith.mulf %27, %28 : vector<256x32xf32>
    %30 = vector.broadcast %24 : vector<1x32xf32> to vector<256x32xf32>
    %31 = arith.addf %30, %29 : vector<256x32xf32>
    %32 = vector.extract_strided_slice %23 {offsets = [0, 1], sizes = [256, 1], strides = [1, 1]} : vector<256x8xf32> to vector<256x1xf32>
    %c1_12 = arith.constant 1 : index
    %c0_13 = arith.constant 0 : index
    %33 = vector.load %arg6[%c1_12, %c0_13] : memref<8x32xf32, #tpu.memory_space<vmem>>, vector<1x32xf32>
    %34 = vector.broadcast %32 : vector<256x1xf32> to vector<256x32xf32>
    %35 = vector.broadcast %33 : vector<1x32xf32> to vector<256x32xf32>
    %36 = arith.mulf %34, %35 : vector<256x32xf32>
    %37 = arith.addf %31, %36 : vector<256x32xf32>
    %38 = vector.extract_strided_slice %23 {offsets = [0, 2], sizes = [256, 1], strides = [1, 1]} : vector<256x8xf32> to vector<256x1xf32>
    %c2_14 = arith.constant 2 : index
    %c0_15 = arith.constant 0 : index
    %39 = vector.load %arg6[%c2_14, %c0_15] : memref<8x32xf32, #tpu.memory_space<vmem>>, vector<1x32xf32>
    %40 = vector.broadcast %38 : vector<256x1xf32> to vector<256x32xf32>
    %41 = vector.broadcast %39 : vector<1x32xf32> to vector<256x32xf32>
    %42 = arith.mulf %40, %41 : vector<256x32xf32>
    %43 = arith.addf %37, %42 : vector<256x32xf32>
    %44 = vector.extract_strided_slice %23 {offsets = [0, 3], sizes = [256, 1], strides = [1, 1]} : vector<256x8xf32> to vector<256x1xf32>
    %c3 = arith.constant 3 : index
    %c0_16 = arith.constant 0 : index
    %45 = vector.load %arg6[%c3, %c0_16] : memref<8x32xf32, #tpu.memory_space<vmem>>, vector<1x32xf32>
    %46 = vector.broadcast %44 : vector<256x1xf32> to vector<256x32xf32>
    %47 = vector.broadcast %45 : vector<1x32xf32> to vector<256x32xf32>
    %48 = arith.mulf %46, %47 : vector<256x32xf32>
    %49 = arith.addf %43, %48 : vector<256x32xf32>
    %50 = vector.extract_strided_slice %23 {offsets = [0, 4], sizes = [256, 1], strides = [1, 1]} : vector<256x8xf32> to vector<256x1xf32>
    %c4 = arith.constant 4 : index
    %c0_17 = arith.constant 0 : index
    %51 = vector.load %arg6[%c4, %c0_17] : memref<8x32xf32, #tpu.memory_space<vmem>>, vector<1x32xf32>
    %52 = vector.broadcast %50 : vector<256x1xf32> to vector<256x32xf32>
    %53 = vector.broadcast %51 : vector<1x32xf32> to vector<256x32xf32>
    %54 = arith.mulf %52, %53 : vector<256x32xf32>
    %55 = arith.addf %49, %54 : vector<256x32xf32>
    %56 = vector.extract_strided_slice %23 {offsets = [0, 5], sizes = [256, 1], strides = [1, 1]} : vector<256x8xf32> to vector<256x1xf32>
    %c5 = arith.constant 5 : index
    %c0_18 = arith.constant 0 : index
    %57 = vector.load %arg6[%c5, %c0_18] : memref<8x32xf32, #tpu.memory_space<vmem>>, vector<1x32xf32>
    %58 = vector.broadcast %56 : vector<256x1xf32> to vector<256x32xf32>
    %59 = vector.broadcast %57 : vector<1x32xf32> to vector<256x32xf32>
    %60 = arith.mulf %58, %59 : vector<256x32xf32>
    %61 = arith.addf %55, %60 : vector<256x32xf32>
    %62 = vector.extract_strided_slice %23 {offsets = [0, 6], sizes = [256, 1], strides = [1, 1]} : vector<256x8xf32> to vector<256x1xf32>
    %c6 = arith.constant 6 : index
    %c0_19 = arith.constant 0 : index
    %63 = vector.load %arg6[%c6, %c0_19] : memref<8x32xf32, #tpu.memory_space<vmem>>, vector<1x32xf32>
    %64 = vector.broadcast %62 : vector<256x1xf32> to vector<256x32xf32>
    %65 = vector.broadcast %63 : vector<1x32xf32> to vector<256x32xf32>
    %66 = arith.mulf %64, %65 : vector<256x32xf32>
    %67 = arith.addf %61, %66 : vector<256x32xf32>
    %68 = vector.extract_strided_slice %23 {offsets = [0, 7], sizes = [256, 1], strides = [1, 1]} : vector<256x8xf32> to vector<256x1xf32>
    %c7 = arith.constant 7 : index
    %c0_20 = arith.constant 0 : index
    %69 = vector.load %arg6[%c7, %c0_20] : memref<8x32xf32, #tpu.memory_space<vmem>>, vector<1x32xf32>
    %70 = vector.broadcast %68 : vector<256x1xf32> to vector<256x32xf32>
    %71 = vector.broadcast %69 : vector<1x32xf32> to vector<256x32xf32>
    %72 = arith.mulf %70, %71 : vector<256x32xf32>
    %73 = arith.addf %67, %72 : vector<256x32xf32>
    %c0_21 = arith.constant 0 : index
    %c0_22 = arith.constant 0 : index
    %74 = vector.load %arg2[%c0_21, %c0_22] : memref<256x32xf32, #tpu.memory_space<vmem>>, vector<256x32xf32>
    %75 = arith.addf %73, %74 : vector<256x32xf32>
    %76 = arith.truncf %75 : vector<256x32xf32> to vector<256x32xbf16>
    %c0_23 = arith.constant 0 : index
    %c0_24 = arith.constant 0 : index
    %77 = vector.load %arg8[%c0_23, %c0_24] : memref<32x32xbf16, #tpu.memory_space<vmem>>, vector<32x32xbf16>
    %cst_25 = arith.constant dense<0.000000e+00> : vector<256x32xf32>
    %78 = tpu.matmul %76, %77, %cst_25 {dimension_numbers = #tpu.dot_dimension_numbers<[1], [0], [0], [1], [0, 0, 1, 1], [], []>} : vector<256x32xbf16>, vector<32x32xbf16>, vector<256x32xf32> -> vector<256x32xf32>
    %c0_26 = arith.constant 0 : index
    %c0_27 = arith.constant 0 : index
    %79 = vector.load %arg9[%c0_26, %c0_27] : memref<1x32xf32, #tpu.memory_space<vmem>>, vector<1x32xf32>
    %80 = vector.broadcast %79 : vector<1x32xf32> to vector<256x32xf32>
    %81 = arith.addf %78, %80 : vector<256x32xf32>
    %82 = arith.truncf %81 : vector<256x32xf32> to vector<256x32xbf16>
    %83 = arith.truncf %73 : vector<256x32xf32> to vector<256x32xbf16>
    %c0_28 = arith.constant 0 : index
    %c0_29 = arith.constant 0 : index
    %84 = vector.load %arg10[%c0_28, %c0_29] : memref<32x32xbf16, #tpu.memory_space<vmem>>, vector<32x32xbf16>
    %cst_30 = arith.constant dense<0.000000e+00> : vector<256x32xf32>
    %85 = tpu.matmul %83, %84, %cst_30 {dimension_numbers = #tpu.dot_dimension_numbers<[1], [0], [0], [1], [0, 0, 1, 1], [], []>} : vector<256x32xbf16>, vector<32x32xbf16>, vector<256x32xf32> -> vector<256x32xf32>
    %c0_31 = arith.constant 0 : index
    %c0_32 = arith.constant 0 : index
    %86 = vector.load %arg11[%c0_31, %c0_32] : memref<1x32xf32, #tpu.memory_space<vmem>>, vector<1x32xf32>
    %87 = vector.broadcast %86 : vector<1x32xf32> to vector<256x32xf32>
    %88 = arith.addf %85, %87 : vector<256x32xf32>
    %89 = arith.truncf %88 : vector<256x32xf32> to vector<256x32xbf16>
    %c0_33 = arith.constant 0 : index
    %c0_34 = arith.constant 0 : index
    %90 = vector.load %arg3[%c0_33, %c0_34] : memref<8x32xf32, #tpu.memory_space<vmem>>, vector<8x32xf32>
    %91 = arith.truncf %90 : vector<8x32xf32> to vector<8x32xbf16>
    %cst_35 = arith.constant dense<0.000000e+00> : vector<8x256xf32>
    %92 = tpu.matmul %91, %82, %cst_35 {dimension_numbers = #tpu.dot_dimension_numbers<[1], [1], [0], [0], [0, 0, 1, 0], [], []>} : vector<8x32xbf16>, vector<256x32xbf16>, vector<8x256xf32> -> vector<8x256xf32>
    %cst_36 = arith.constant 0.176776692 : f32
    %93 = vector.broadcast %cst_36 : f32 to vector<8x256xf32>
    %94 = arith.mulf %92, %93 : vector<8x256xf32>
    %cst_37 = arith.constant dense<0xFF800000> : vector<8xf32>
    %95 = vector.multi_reduction <maximumf>, %94, %cst_37 [1] : vector<8x256xf32> to vector<8xf32>
    %96 = vector.shape_cast %95 : vector<8xf32> to vector<8x1xf32>
    %97 = vector.broadcast %96 : vector<8x1xf32> to vector<8x256xf32>
    %98 = arith.subf %94, %97 : vector<8x256xf32>
    %99 = math.exp %98 : vector<8x256xf32>
    %cst_38 = arith.constant dense<0.000000e+00> : vector<8xf32>
    %100 = vector.multi_reduction <add>, %99, %cst_38 [1] : vector<8x256xf32> to vector<8xf32>
    %101 = vector.shape_cast %100 : vector<8xf32> to vector<8x1xf32>
    %102 = tpu.reciprocal %101 {approx = true} : vector<8x1xf32> -> vector<8x1xf32>
    %103 = vector.broadcast %102 : vector<8x1xf32> to vector<8x256xf32>
    %104 = arith.mulf %99, %103 : vector<8x256xf32>
    %105 = arith.truncf %104 : vector<8x256xf32> to vector<8x256xbf16>
    %cst_39 = arith.constant dense<0.000000e+00> : vector<8x32xf32>
    %106 = tpu.matmul %105, %89, %cst_39 {dimension_numbers = #tpu.dot_dimension_numbers<[1], [0], [0], [1], [0, 0, 1, 1], [], []>} : vector<8x256xbf16>, vector<256x32xbf16>, vector<8x32xf32> -> vector<8x32xf32>
    %107 = arith.truncf %106 : vector<8x32xf32> to vector<8x32xbf16>
    %c0_40 = arith.constant 0 : index
    %c0_41 = arith.constant 0 : index
    %108 = vector.load %arg12[%c0_40, %c0_41] : memref<32x32xbf16, #tpu.memory_space<vmem>>, vector<32x32xbf16>
    %cst_42 = arith.constant dense<0.000000e+00> : vector<8x32xf32>
    %109 = tpu.matmul %107, %108, %cst_42 {dimension_numbers = #tpu.dot_dimension_numbers<[1], [0], [0], [1], [0, 0, 1, 1], [], []>} : vector<8x32xbf16>, vector<32x32xbf16>, vector<8x32xf32> -> vector<8x32xf32>
    %c0_43 = arith.constant 0 : index
    %c0_44 = arith.constant 0 : index
    %110 = vector.load %arg13[%c0_43, %c0_44] : memref<1x32xf32, #tpu.memory_space<vmem>>, vector<1x32xf32>
    %111 = vector.broadcast %110 : vector<1x32xf32> to vector<8x32xf32>
    %112 = arith.addf %109, %111 : vector<8x32xf32>
    %113 = arith.truncf %112 : vector<8x32xf32> to vector<8x32xbf16>
    %c0_45 = arith.constant 0 : index
    %c0_46 = arith.constant 0 : index
    %114 = vector.load %arg14[%c0_45, %c0_46] : memref<32x256xbf16, #tpu.memory_space<vmem>>, vector<32x256xbf16>
    %cst_47 = arith.constant dense<0.000000e+00> : vector<8x256xf32>
    %115 = tpu.matmul %113, %114, %cst_47 {dimension_numbers = #tpu.dot_dimension_numbers<[1], [0], [0], [1], [0, 0, 1, 1], [], []>} : vector<8x32xbf16>, vector<32x256xbf16>, vector<8x256xf32> -> vector<8x256xf32>
    %c0_48 = arith.constant 0 : index
    %c0_49 = arith.constant 0 : index
    %116 = vector.load %arg15[%c0_48, %c0_49] : memref<1x256xf32, #tpu.memory_space<vmem>>, vector<1x256xf32>
    %117 = vector.broadcast %116 : vector<1x256xf32> to vector<8x256xf32>
    %118 = arith.addf %115, %117 : vector<8x256xf32>
    %119 = vector.extract_strided_slice %118 {offsets = [0, 0], sizes = [8, 128], strides = [1, 1]} : vector<8x256xf32> to vector<8x128xf32>
    %120 = vector.extract_strided_slice %118 {offsets = [0, 128], sizes = [8, 128], strides = [1, 1]} : vector<8x256xf32> to vector<8x128xf32>
    %cst_50 = arith.constant 0.000000e+00 : f32
    %121 = vector.broadcast %cst_50 : f32 to vector<8x128xf32>
    %122 = arith.maximumf %120, %121 : vector<8x128xf32>
    %123 = arith.truncf %122 : vector<8x128xf32> to vector<8x128xbf16>
    %c0_51 = arith.constant 0 : index
    %c0_52 = arith.constant 0 : index
    %124 = vector.load %arg16[%c0_51, %c0_52] : memref<128x32xbf16, #tpu.memory_space<vmem>>, vector<128x32xbf16>
    %cst_53 = arith.constant dense<0.000000e+00> : vector<8x32xf32>
    %125 = tpu.matmul %123, %124, %cst_53 {dimension_numbers = #tpu.dot_dimension_numbers<[1], [0], [0], [1], [0, 0, 1, 1], [], []>} : vector<8x128xbf16>, vector<128x32xbf16>, vector<8x32xf32> -> vector<8x32xf32>
    %c0_54 = arith.constant 0 : index
    %c0_55 = arith.constant 0 : index
    %126 = vector.load %arg17[%c0_54, %c0_55] : memref<1x32xf32, #tpu.memory_space<vmem>>, vector<1x32xf32>
    %127 = vector.broadcast %126 : vector<1x32xf32> to vector<8x32xf32>
    %128 = arith.addf %125, %127 : vector<8x32xf32>
    %cst_56 = arith.constant 0.000000e+00 : f32
    %129 = vector.broadcast %cst_56 : f32 to vector<8x32xf32>
    %130 = arith.maximumf %128, %129 : vector<8x32xf32>
    %131 = arith.truncf %130 : vector<8x32xf32> to vector<8x32xbf16>
    %c0_57 = arith.constant 0 : index
    %c0_58 = arith.constant 0 : index
    %132 = vector.load %arg18[%c0_57, %c0_58] : memref<32x128xbf16, #tpu.memory_space<vmem>>, vector<32x128xbf16>
    %cst_59 = arith.constant dense<0.000000e+00> : vector<8x128xf32>
    %133 = tpu.matmul %131, %132, %cst_59 {dimension_numbers = #tpu.dot_dimension_numbers<[1], [0], [0], [1], [0, 0, 1, 1], [], []>} : vector<8x32xbf16>, vector<32x128xbf16>, vector<8x128xf32> -> vector<8x128xf32>
    %c0_60 = arith.constant 0 : index
    %c0_61 = arith.constant 0 : index
    %134 = vector.load %arg19[%c0_60, %c0_61] : memref<1x128xf32, #tpu.memory_space<vmem>>, vector<1x128xf32>
    %135 = vector.broadcast %134 : vector<1x128xf32> to vector<8x128xf32>
    %136 = arith.addf %133, %135 : vector<8x128xf32>
    %137 = arith.negf %136 : vector<8x128xf32>
    %138 = math.exp %137 : vector<8x128xf32>
    %cst_62 = arith.constant 1.000000e+00 : f32
    %139 = vector.broadcast %cst_62 : f32 to vector<8x128xf32>
    %140 = arith.addf %139, %138 : vector<8x128xf32>
    %141 = arith.divf %139, %140 : vector<8x128xf32>
    %c0_63 = arith.constant 0 : index
    %c0_64 = arith.constant 0 : index
    %c0_65 = arith.constant 0 : index
    %142 = vector.load %arg20[%c0_63, %c0_64, %c0_65] : memref<1x8x128xf32, #tpu.memory_space<vmem>>, vector<1x8x128xf32>
    %143 = vector.shape_cast %142 : vector<1x8x128xf32> to vector<8x128xf32>
    %144 = vector.shape_cast %119 : vector<8x128xf32> to vector<1x8x128xf32>
    tpu.vector_store %arg20[%c0_63, %c0_64, %c0_65], %144 {strides = array<i32>} : memref<1x8x128xf32, #tpu.memory_space<vmem>>, vector<1x8x128xf32>,
    %c0_66 = arith.constant 0 : index
    %c0_67 = arith.constant 0 : index
    %c0_68 = arith.constant 0 : index
    %145 = vector.load %arg21[%c0_66, %c0_67, %c0_68] : memref<1x8x128xf32, #tpu.memory_space<vmem>>, vector<1x8x128xf32>
    %146 = vector.shape_cast %145 : vector<1x8x128xf32> to vector<8x128xf32>
    %147 = vector.shape_cast %141 : vector<8x128xf32> to vector<1x8x128xf32>
    tpu.vector_store %arg21[%c0_66, %c0_67, %c0_68], %147 {strides = array<i32>} : memref<1x8x128xf32, #tpu.memory_space<vmem>>, vector<1x8x128xf32>,
    return
  }
  func.func @transform_0(%arg0: i32) -> (i32, i32, i32) {
    %c0_i32 = arith.constant 0 : i32
    %c0_i32_0 = arith.constant 0 : i32
    %c0_i32_1 = arith.constant 0 : i32
    return %arg0, %c0_i32, %c0_i32_0 : i32, i32, i32
  }
  func.func @transform_1(%arg0: i32) -> (i32, i32) {
    %c0_i32 = arith.constant 0 : i32
    %c0_i32_0 = arith.constant 0 : i32
    %c0_i32_1 = arith.constant 0 : i32
    return %c0_i32, %c0_i32_0 : i32, i32
  }
  func.func @transform_2(%arg0: i32) -> (i32, i32) {
    %c0_i32 = arith.constant 0 : i32
    %c0_i32_0 = arith.constant 0 : i32
    %c0_i32_1 = arith.constant 0 : i32
    return %c0_i32, %c0_i32_0 : i32, i32
  }
  func.func @transform_3(%arg0: i32) -> (i32, i32) {
    %c0_i32 = arith.constant 0 : i32
    %c0_i32_0 = arith.constant 0 : i32
    %c0_i32_1 = arith.constant 0 : i32
    return %c0_i32, %c0_i32_0 : i32, i32
  }
  func.func @transform_4(%arg0: i32) -> (i32, i32) {
    %c0_i32 = arith.constant 0 : i32
    %c0_i32_0 = arith.constant 0 : i32
    %c0_i32_1 = arith.constant 0 : i32
    return %c0_i32, %c0_i32_0 : i32, i32
  }
  func.func @transform_5(%arg0: i32) -> (i32, i32) {
    %c0_i32 = arith.constant 0 : i32
    %c0_i32_0 = arith.constant 0 : i32
    %c0_i32_1 = arith.constant 0 : i32
    return %c0_i32, %c0_i32_0 : i32, i32
  }
  func.func @transform_6(%arg0: i32) -> (i32, i32) {
    %c0_i32 = arith.constant 0 : i32
    %c0_i32_0 = arith.constant 0 : i32
    %c0_i32_1 = arith.constant 0 : i32
    return %c0_i32, %c0_i32_0 : i32, i32
  }
  func.func @transform_7(%arg0: i32) -> (i32, i32) {
    %c0_i32 = arith.constant 0 : i32
    %c0_i32_0 = arith.constant 0 : i32
    %c0_i32_1 = arith.constant 0 : i32
    return %c0_i32, %c0_i32_0 : i32, i32
  }
  func.func @transform_8(%arg0: i32) -> (i32, i32) {
    %c0_i32 = arith.constant 0 : i32
    %c0_i32_0 = arith.constant 0 : i32
    %c0_i32_1 = arith.constant 0 : i32
    return %c0_i32, %c0_i32_0 : i32, i32
  }
  func.func @transform_9(%arg0: i32) -> (i32, i32) {
    %c0_i32 = arith.constant 0 : i32
    %c0_i32_0 = arith.constant 0 : i32
    %c0_i32_1 = arith.constant 0 : i32
    return %c0_i32, %c0_i32_0 : i32, i32
  }
  func.func @transform_10(%arg0: i32) -> (i32, i32) {
    %c0_i32 = arith.constant 0 : i32
    %c0_i32_0 = arith.constant 0 : i32
    %c0_i32_1 = arith.constant 0 : i32
    return %c0_i32, %c0_i32_0 : i32, i32
  }
  func.func @transform_11(%arg0: i32) -> (i32, i32) {
    %c0_i32 = arith.constant 0 : i32
    %c0_i32_0 = arith.constant 0 : i32
    %c0_i32_1 = arith.constant 0 : i32
    return %c0_i32, %c0_i32_0 : i32, i32
  }
  func.func @transform_12(%arg0: i32) -> (i32, i32) {
    %c0_i32 = arith.constant 0 : i32
    %c0_i32_0 = arith.constant 0 : i32
    %c0_i32_1 = arith.constant 0 : i32
    return %c0_i32, %c0_i32_0 : i32, i32
  }
  func.func @transform_13(%arg0: i32) -> (i32, i32) {
    %c0_i32 = arith.constant 0 : i32
    %c0_i32_0 = arith.constant 0 : i32
    %c0_i32_1 = arith.constant 0 : i32
    return %c0_i32, %c0_i32_0 : i32, i32
  }
  func.func @transform_14(%arg0: i32) -> (i32, i32) {
    %c0_i32 = arith.constant 0 : i32
    %c0_i32_0 = arith.constant 0 : i32
    %c0_i32_1 = arith.constant 0 : i32
    return %c0_i32, %c0_i32_0 : i32, i32
  }
  func.func @transform_15(%arg0: i32) -> (i32, i32) {
    %c0_i32 = arith.constant 0 : i32
    %c0_i32_0 = arith.constant 0 : i32
    %c0_i32_1 = arith.constant 0 : i32
    return %c0_i32, %c0_i32_0 : i32, i32
  }
  func.func @transform_16(%arg0: i32) -> (i32, i32) {
    %c0_i32 = arith.constant 0 : i32
    %c0_i32_0 = arith.constant 0 : i32
    %c0_i32_1 = arith.constant 0 : i32
    return %c0_i32, %c0_i32_0 : i32, i32
  }
  func.func @transform_17(%arg0: i32) -> (i32, i32) {
    %c0_i32 = arith.constant 0 : i32
    %c0_i32_0 = arith.constant 0 : i32
    %c0_i32_1 = arith.constant 0 : i32
    return %c0_i32, %c0_i32_0 : i32, i32
  }
  func.func @transform_18(%arg0: i32) -> (i32, i32) {
    %c0_i32 = arith.constant 0 : i32
    %c0_i32_0 = arith.constant 0 : i32
    %c0_i32_1 = arith.constant 0 : i32
    return %c0_i32, %c0_i32_0 : i32, i32
  }
  func.func @transform_19(%arg0: i32) -> (i32, i32, i32) {
    %c0_i32 = arith.constant 0 : i32
    %c0_i32_0 = arith.constant 0 : i32
    %c0_i32_1 = arith.constant 0 : i32
    return %arg0, %c0_i32, %c0_i32_0 : i32, i32, i32
  }
  func.func @transform_20(%arg0: i32) -> (i32, i32, i32) {
    %c0_i32 = arith.constant 0 : i32
    %c0_i32_0 = arith.constant 0 : i32
    %c0_i32_1 = arith.constant 0 : i32
    return %arg0, %c0_i32, %c0_i32_0 : i32, i32, i32
  }
}

</mosaic_0001>

<bundles_post_ra>
// kernel: cos.4
= control target key start
LH: loop header
LB: loop body
LE: loop exit
PB: predicated region body
PF: predicated region fallthrough
CT: control target
= control target key end

     0   :  { %v125_v12 = vmov 683565275   ;;  %v126_v14 = vmov 2475754826   ;;  %v127_v16 = vmov 2131351028   ;;  %s168_s0 = inlined_call_operand.vmem [shape: f32[16,8], index: 0, kind: input, shape index: {}]   ;;  %s169_s1 = inlined_call_operand.vmem [shape: f32[16,8], index: 1, kind: output, shape index: {}]  }
   0x1   :  { %v144_v0 = vld [vmem:[%s168_s0] sm:$0xff]  ;;  %v128_v18 = vmov 2102212464   ;;  %v129_v20 = vmov 920167782  }
   0x2   :  { %v6_v1 = vand.u32 2139095040, %v144_v0  ;;  %v3_v3 = vand.u32 2147483647, %v144_v0  ;;  %v130_v27 = vmov 1326507024   ;;  %vm5_vm7 = vcmp.lt.s32.totalorder %v144_v0, 0 }
   0x3   :  { %vm95_vm12 = vweird.f32 %v144_v0 }
   0x4   :  { %v7_v2 = vshrl.u32 %v6_v1, 23  ;;  %v10_v6 = vand.u32 8388607, %v3_v3  ;;  %vm4_vm8 = vcmp.le.f32.partialorder %v3_v3, 0.7853982 }
   0x6   :  { %v107_v4 = vadd.s32 4294967169, %v7_v2  ;;  %v11_v9 = vor.u32 8388608, %v10_v6 }
   0x8   :  { %v13_v5 = vadd.s32 1, %v107_v4  ;;  %v51_v29 = vshll.u32 %v11_v9, 8 }
   0xa   :  { %vm14_vm0 = vcmp.gt.s32.totalorder %v13_v5, 0 }
   0xb   :  { %v15_v7 = vsel %vm14_vm0, %v13_v5, 0 }
   0xc   :  { %v17_v8 = vand.u32 31, %v15_v7  ;;  %v16_v10 = vshrl.u32 %v15_v7, 5 }
   0xe   :  { %v18_v11 = vsub.s32 32, %v17_v8  ;;  %v20_v13 = vshll.u32 %v125_v12, %v17_v8  ;;  %v23_v15 = vshll.u32 %v126_v14, %v17_v8  ;;  %v26_v17 = vshll.u32 %v127_v16, %v17_v8 }
   0xf   :  { %v29_v19 = vshll.u32 %v128_v18, %v17_v8  ;;  %v32_v21 = vshll.u32 %v129_v20, %v17_v8  ;;  %vm35_vm1 = vcmp.lt.s32.totalorder %v16_v10, 1  ;;  %vm38_vm2 = vcmp.lt.s32.totalorder %v16_v10, 4 }
  0x10   :  { %v19_v22 = vshrl.u32 %v125_v12, %v18_v11  ;;  %v21_v23 = vshrl.u32 %v126_v14, %v18_v11  ;;  %v24_v24 = vshrl.u32 %v127_v16, %v18_v11  ;;  %v27_v25 = vshrl.u32 %v128_v18, %v18_v11 }
  0x11   :  { %v30_v26 = vshrl.u32 %v129_v20, %v18_v11  ;;  %v33_v28 = vshrl.u32 %v130_v27, %v18_v11  ;;  %vm36_vm3 = vcmp.lt.s32.totalorder %v16_v10, 2  ;;  %vm37_vm4 = vcmp.lt.s32.totalorder %v16_v10, 3 }
  0x12   :  { %v22_v30 = vor.u32 %v21_v23, %v20_v13  ;;  %v25_v31 = vor.u32 %v24_v24, %v23_v15  ;;  %v28_v32 = vor.u32 %v27_v25, %v26_v17 }
  0x13   :  { %v31_v33 = vor.u32 %v30_v26, %v29_v19  ;;  %v34_v34 = vor.u32 %v33_v28, %v32_v21 }
  0x14   :  { %v39_v35 = vsel %vm35_vm1, %v19_v22, %v22_v30  ;;  %v40_v36 = vsel %vm38_vm2, %v28_v32, 2102212464  ;;  %v43_v37 = vsel %vm35_vm1, %v22_v30, %v25_v31  ;;  %v47_v38 = vsel %vm35_vm1, %v25_v31, %v28_v32 }
  0x15   :  { %v41_v39 = vsel %vm37_vm4, %v25_v31, %v40_v36  ;;  %v44_v40 = vsel %vm38_vm2, %v31_v33, 920167782  ;;  %v48_v41 = vsel %vm38_vm2, %v34_v34, 1326507024 }
  0x16   :  { %v45_v42 = vsel %vm37_vm4, %v28_v32, %v44_v40  ;;  %v49_v43 = vsel %vm37_vm4, %v31_v33, %v48_v41  ;;  %v42_v44 = vsel %vm36_vm3, %v39_v35, %v41_v39 }
  0x17   :  { %v46_v45 = vsel %vm36_vm3, %v43_v37, %v45_v42  ;;  %v50_v46 = vsel %vm36_vm3, %v47_v38, %v49_v43  ;;  %v58_v51 = vmul.u32 %v51_v29, %v42_v44 }
  0x18   :  { %v150_v47 = vmul.u32.u64.low %v51_v29, %v50_v46  ;;  %v151_v48 = vmul.u32.u64.high %v51_v29, %v50_v46, %v150_v47  ;;  %v153_v49 = vmul.u32.u64.low %v51_v29, %v46_v45  ;;  %v154_v50 = vmul.u32.u64.high %v51_v29, %v46_v45, %v153_v49 }
  0x1a   :  { %vm60_vm5 = vc.u32 %v151_v48, %v153_v49  ;;  %v61_v52 = vadd.s32 1, %v154_v50  ;;  %v59_v63 = vadd.s32 %v153_v49, %v151_v48 }
  0x1c   :  { %v62_v53 = vsel %vm60_vm5, %v61_v52, %v154_v50 }
  0x1d   :  { %v63_v54 = vadd.s32 %v62_v53, %v58_v51 }
  0x1f   :  { %v64_v55 = vadd.s32 536870912, %v63_v54 }
  0x21   :  { %v65_v56 = vshrl.u32 %v64_v55, 30 }
  0x23   :  { %v66_v57 = vshll.u32 %v65_v56, 30  ;;  %v89_v15 = vsub.s32 4, %v65_v56 }
  0x25   :  { %v67_v58 = vsub.s32 %v63_v54, %v66_v57  ;;  %v90_v17 = vsel %vm5_vm7, %v89_v15, %v65_v56 }
  0x26   :  { %v92_v18 = vsel %vm4_vm8, 0, %v90_v17 }
  0x27   :  { %v69_v59 = vsub.s32 0, %v67_v58  ;;  %v96_v19 = vand.u32 3, %v92_v18 }
  0x29   :  { %v108_v60 = vmin.u32 %v69_v59, %v67_v58  ;;  %vm101_vm9 = vcmp.eq.s32.totalorder %v96_v19, 2  ;;  %vm98_vm10 = vcmp.eq.s32.totalorder %v96_v19, 0  ;;  %vm97_vm11 = vcmp.lt.s32.totalorder %v96_v19, 2 }
  0x2b   :  { %v71_v61 = vclz %v108_v60 }
  0x2d   :  { %v109_v62 = vadd.s32 4294967294, %v71_v61 }
  0x2f   :  { %vm110_vm6 = vcmp.lt.s32.totalorder %v109_v62, 0 }
  0x30   :  { %v74_v1 = vsel %vm110_vm6, 0, %v109_v62 }
  0x31   :  { %v75_v2 = vsub.s32 32, %v74_v1  ;;  %v76_v4 = vshll.u32 %v67_v58, %v74_v1  ;;  %v79_v5 = vsub.s32 4294967266, %v74_v1 }
  0x33   :  { %v77_v6 = vshrl.u32 %v59_v63, %v75_v2  ;;  %v80_v7 = vadd.s32 127, %v79_v5 }
  0x35   :  { %v78_v8 = vor.u32 %v77_v6, %v76_v4  ;;  %v81_v9 = vshll.u32 %v80_v7, 23 }
  0x37   :  { %v82_v10 = vor.u32 4788187, %v81_v9  ;;  %v85_v11 = vcvt.s32.f32 %v78_v8 }
  0x39   :  { %v83_v12 = vand.u32 2147483647, %v82_v10 }
  0x3b   :  { %v86_v13 = vmul.f32 %v85_v11, %v83_v12 }
  0x3d   :  { %v87_v3 = vxor.u32 2147483648, %v86_v13 }
  0x3f   :  { %v88_v14 = vsel %vm5_vm7, %v87_v3, %v86_v13 }
  0x40   :  { %v91_v16 = vsel %vm4_vm8, %v144_v0, %v88_v14 }
  0x41   :  { %121 = vcosq.f32 %v91_v16 }
  0x42   :  { %123 = vsinq.f32 %v91_v16 }
  0x4e   :  { %v122_v20 = vpop.eup %121 }
  0x4f   :  { %v124_v21 = vpop.eup %123  ;;  %v102_v22 = vxor.u32 2147483648, %v122_v20 }
  0x50   :  { %v99_v23 = vxor.u32 2147483648, %v124_v21 }
  0x51   :  { %v103_v0 = vsel %vm101_vm9, %v102_v22, %v124_v21 }
  0x52   :  { %v100_v24 = vsel %vm98_vm10, %v122_v20, %v99_v23 }
  0x53   :  { %v104_v25 = vsel %vm97_vm11, %v100_v24, %v103_v0 }
  0x54   :  { %v105_v26 = vsel %vm95_vm12, nan, %v104_v25 }
  0x55   :  { %106 = vst [vmem:[%s169_s1] sm:$0xff] %v105_v26 }

// kernel: sin.4
= control target key start
LH: loop header
LB: loop body
LE: loop exit
PB: predicated region body
PF: predicated region fallthrough
CT: control target
= control target key end

     0   :  { %v126_v12 = vmov 683565275   ;;  %v127_v14 = vmov 2475754826   ;;  %v128_v16 = vmov 2131351028   ;;  %s169_s0 = inlined_call_operand.vmem [shape: f32[16,8], index: 0, kind: input, shape index: {}]   ;;  %s170_s1 = inlined_call_operand.vmem [shape: f32[16,8], index: 1, kind: output, shape index: {}]  }
   0x1   :  { %v145_v0 = vld [vmem:[%s169_s0] sm:$0xff]  ;;  %v129_v18 = vmov 2102212464   ;;  %v130_v20 = vmov 920167782  }
   0x2   :  { %v6_v1 = vand.u32 2139095040, %v145_v0  ;;  %v3_v3 = vand.u32 2147483647, %v145_v0  ;;  %v131_v27 = vmov 1326507024   ;;  %vm5_vm7 = vcmp.lt.s32.totalorder %v145_v0, 0 }
   0x3   :  { %vm95_vm12 = vweird.f32 %v145_v0 }
   0x4   :  { %v7_v2 = vshrl.u32 %v6_v1, 23  ;;  %v10_v6 = vand.u32 8388607, %v3_v3  ;;  %vm4_vm8 = vcmp.le.f32.partialorder %v3_v3, 0.7853982 }
   0x6   :  { %v108_v4 = vadd.s32 4294967169, %v7_v2  ;;  %v11_v9 = vor.u32 8388608, %v10_v6 }
   0x8   :  { %v13_v5 = vadd.s32 1, %v108_v4  ;;  %v51_v29 = vshll.u32 %v11_v9, 8 }
   0xa   :  { %vm14_vm0 = vcmp.gt.s32.totalorder %v13_v5, 0 }
   0xb   :  { %v15_v7 = vsel %vm14_vm0, %v13_v5, 0 }
   0xc   :  { %v17_v8 = vand.u32 31, %v15_v7  ;;  %v16_v10 = vshrl.u32 %v15_v7, 5 }
   0xe   :  { %v18_v11 = vsub.s32 32, %v17_v8  ;;  %v20_v13 = vshll.u32 %v126_v12, %v17_v8  ;;  %v23_v15 = vshll.u32 %v127_v14, %v17_v8  ;;  %v26_v17 = vshll.u32 %v128_v16, %v17_v8 }
   0xf   :  { %v29_v19 = vshll.u32 %v129_v18, %v17_v8  ;;  %v32_v21 = vshll.u32 %v130_v20, %v17_v8  ;;  %vm35_vm1 = vcmp.lt.s32.totalorder %v16_v10, 1  ;;  %vm38_vm2 = vcmp.lt.s32.totalorder %v16_v10, 4 }
  0x10   :  { %v19_v22 = vshrl.u32 %v126_v12, %v18_v11  ;;  %v21_v23 = vshrl.u32 %v127_v14, %v18_v11  ;;  %v24_v24 = vshrl.u32 %v128_v16, %v18_v11  ;;  %v27_v25 = vshrl.u32 %v129_v18, %v18_v11 }
  0x11   :  { %v30_v26 = vshrl.u32 %v130_v20, %v18_v11  ;;  %v33_v28 = vshrl.u32 %v131_v27, %v18_v11  ;;  %vm36_vm3 = vcmp.lt.s32.totalorder %v16_v10, 2  ;;  %vm37_vm4 = vcmp.lt.s32.totalorder %v16_v10, 3 }
  0x12   :  { %v22_v30 = vor.u32 %v21_v23, %v20_v13  ;;  %v25_v31 = vor.u32 %v24_v24, %v23_v15  ;;  %v28_v32 = vor.u32 %v27_v25, %v26_v17 }
  0x13   :  { %v31_v33 = vor.u32 %v30_v26, %v29_v19  ;;  %v34_v34 = vor.u32 %v33_v28, %v32_v21 }
  0x14   :  { %v39_v35 = vsel %vm35_vm1, %v19_v22, %v22_v30  ;;  %v40_v36 = vsel %vm38_vm2, %v28_v32, 2102212464  ;;  %v43_v37 = vsel %vm35_vm1, %v22_v30, %v25_v31  ;;  %v47_v38 = vsel %vm35_vm1, %v25_v31, %v28_v32 }
  0x15   :  { %v41_v39 = vsel %vm37_vm4, %v25_v31, %v40_v36  ;;  %v44_v40 = vsel %vm38_vm2, %v31_v33, 920167782  ;;  %v48_v41 = vsel %vm38_vm2, %v34_v34, 1326507024 }
  0x16   :  { %v45_v42 = vsel %vm37_vm4, %v28_v32, %v44_v40  ;;  %v49_v43 = vsel %vm37_vm4, %v31_v33, %v48_v41  ;;  %v42_v44 = vsel %vm36_vm3, %v39_v35, %v41_v39 }
  0x17   :  { %v46_v45 = vsel %vm36_vm3, %v43_v37, %v45_v42  ;;  %v50_v46 = vsel %vm36_vm3, %v47_v38, %v49_v43  ;;  %v58_v51 = vmul.u32 %v51_v29, %v42_v44 }
  0x18   :  { %v151_v47 = vmul.u32.u64.low %v51_v29, %v50_v46  ;;  %v152_v48 = vmul.u32.u64.high %v51_v29, %v50_v46, %v151_v47  ;;  %v154_v49 = vmul.u32.u64.low %v51_v29, %v46_v45  ;;  %v155_v50 = vmul.u32.u64.high %v51_v29, %v46_v45, %v154_v49 }
  0x1a   :  { %vm60_vm5 = vc.u32 %v152_v48, %v154_v49  ;;  %v61_v52 = vadd.s32 1, %v155_v50  ;;  %v59_v63 = vadd.s32 %v154_v49, %v152_v48 }
  0x1c   :  { %v62_v53 = vsel %vm60_vm5, %v61_v52, %v155_v50 }
  0x1d   :  { %v63_v54 = vadd.s32 %v62_v53, %v58_v51 }
  0x1f   :  { %v64_v55 = vadd.s32 536870912, %v63_v54 }
  0x21   :  { %v65_v56 = vshrl.u32 %v64_v55, 30 }
  0x23   :  { %v66_v57 = vshll.u32 %v65_v56, 30  ;;  %v89_v14 = vsub.s32 4, %v65_v56 }
  0x25   :  { %v67_v58 = vsub.s32 %v63_v54, %v66_v57  ;;  %v90_v16 = vsel %vm5_vm7, %v89_v14, %v65_v56 }
  0x26   :  { %v92_v18 = vsel %vm4_vm8, 0, %v90_v16 }
  0x27   :  { %v69_v59 = vsub.s32 0, %v67_v58  ;;  %v96_v19 = vadd.s32 3, %v92_v18 }
  0x29   :  { %v109_v60 = vmin.u32 %v69_v59, %v67_v58  ;;  %v97_v20 = vand.u32 3, %v96_v19 }
  0x2b   :  { %v71_v61 = vclz %v109_v60  ;;  %vm102_vm9 = vcmp.eq.s32.totalorder %v97_v20, 2  ;;  %vm99_vm10 = vcmp.eq.s32.totalorder %v97_v20, 0  ;;  %vm98_vm11 = vcmp.lt.s32.totalorder %v97_v20, 2 }
  0x2d   :  { %v110_v62 = vadd.s32 4294967294, %v71_v61 }
  0x2f   :  { %vm111_vm6 = vcmp.lt.s32.totalorder %v110_v62, 0 }
  0x30   :  { %v74_v1 = vsel %vm111_vm6, 0, %v110_v62 }
  0x31   :  { %v75_v2 = vsub.s32 32, %v74_v1  ;;  %v76_v4 = vshll.u32 %v67_v58, %v74_v1  ;;  %v79_v5 = vsub.s32 4294967266, %v74_v1 }
  0x33   :  { %v77_v6 = vshrl.u32 %v59_v63, %v75_v2  ;;  %v80_v7 = vadd.s32 127, %v79_v5 }
  0x35   :  { %v78_v8 = vor.u32 %v77_v6, %v76_v4  ;;  %v81_v9 = vshll.u32 %v80_v7, 23 }
  0x37   :  { %v82_v10 = vor.u32 4788187, %v81_v9  ;;  %v85_v11 = vcvt.s32.f32 %v78_v8 }
  0x39   :  { %v83_v12 = vand.u32 2147483647, %v82_v10 }
  0x3b   :  { %v86_v13 = vmul.f32 %v85_v11, %v83_v12 }
  0x3d   :  { %v87_v3 = vxor.u32 2147483648, %v86_v13 }
  0x3f   :  { %v88_v15 = vsel %vm5_vm7, %v87_v3, %v86_v13 }
  0x40   :  { %v91_v17 = vsel %vm4_vm8, %v145_v0, %v88_v15 }
  0x41   :  { %122 = vcosq.f32 %v91_v17 }
  0x42   :  { %124 = vsinq.f32 %v91_v17 }
  0x4e   :  { %v123_v21 = vpop.eup %122 }
  0x4f   :  { %v125_v22 = vpop.eup %124  ;;  %v103_v23 = vxor.u32 2147483648, %v123_v21 }
  0x50   :  { %v100_v24 = vxor.u32 2147483648, %v125_v22 }
  0x51   :  { %v104_v0 = vsel %vm102_vm9, %v103_v23, %v125_v22 }
  0x52   :  { %v101_v25 = vsel %vm99_vm10, %v123_v21, %v100_v24 }
  0x53   :  { %v105_v26 = vsel %vm98_vm11, %v101_v25, %v104_v0 }
  0x54   :  { %v106_v27 = vsel %vm95_vm12, nan, %v105_v26 }
  0x55   :  { %107 = vst [vmem:[%s170_s1] sm:$0xff] %v106_v27 }

// kernel: detr_forward.1
= control target key start
LH: loop header
LB: loop body
LE: loop exit
PB: predicated region body
PF: predicated region fallthrough
CT: control target
= control target key end

     0   :  { %s7326_s0 = inlined_call_operand.vmem [shape: f32[2,256,3], index: 0, kind: input, shape index: {}]   ;;  %s7327_s1 = inlined_call_operand.vmem [shape: f32[256,32], index: 1, kind: input, shape index: {}]   ;;  %s7328_s2 = inlined_call_operand.vmem [shape: f32[8,32], index: 2, kind: input, shape index: {}]   ;;  %s7329_s3 = inlined_call_operand.vmem [shape: f32[3,8], index: 3, kind: input, shape index: {}]   ;;  %s7330_s4 = inlined_call_operand.vmem [shape: f32[1,8], index: 4, kind: input, shape index: {}]   ;;  %s7331_s5 = inlined_call_operand.vmem [shape: f32[8,32], index: 5, kind: input, shape index: {}]   ;;  %s7332_s6 = inlined_call_operand.vmem [shape: f32[1,32], index: 6, kind: input, shape index: {}]   ;;  %s7333_s7 = inlined_call_operand.vmem [shape: bf16[32,32], index: 7, kind: input, shape index: {}]   ;;  %s7334_s8 = inlined_call_operand.vmem [shape: f32[1,32], index: 8, kind: input, shape index: {}]   ;;  %s7335_s9 = inlined_call_operand.vmem [shape: bf16[32,32], index: 9, kind: input, shape index: {}]   ;;  %s7336_s10 = inlined_call_operand.vmem [shape: f32[1,32], index: 10, kind: input, shape index: {}]   ;;  %s7337_s11 = inlined_call_operand.vmem [shape: bf16[32,32], index: 11, kind: input, shape index: {}]   ;;  %s7338_s12 = inlined_call_operand.vmem [shape: f32[1,32], index: 12, kind: input, shape index: {}]   ;;  %s7339_s13 = inlined_call_operand.vmem [shape: bf16[32,256], index: 13, kind: input, shape index: {}]   ;;  %s7340_s14 = inlined_call_operand.vmem [shape: f32[1,256], index: 14, kind: input, shape index: {}]   ;;  %s7341_s15 = inlined_call_operand.vmem [shape: bf16[128,32], index: 15, kind: input, shape index: {}]   ;;  %s7342_s16 = inlined_call_operand.vmem [shape: f32[1,32], index: 16, kind: input, shape index: {}]   ;;  %s7343_s17 = inlined_call_operand.vmem [shape: bf16[32,128], index: 17, kind: input, shape index: {}]   ;;  %s7344_s18 = inlined_call_operand.vmem [shape: f32[1,128], index: 18, kind: input, shape index: {}]   ;;  %s7345_s19 = inlined_call_operand.vmem [shape: f32[2,8,128], index: 19, kind: output, shape index: {0}]   ;;  %s7346_s20 = inlined_call_operand.vmem [shape: f32[2,8,128], index: 20, kind: output, shape index: {1}]  }
   0x1   :  { %7405 = sst [smem:[#allocation127_spill]] %s7326_s0 }
   0x2   :  { %7406 = sst [smem:[#allocation128_spill]] %s7327_s1  ;;  %s4753_s1 = smov 0  }
   0x3   :  { %7407 = sst [smem:[#allocation129_spill]] %s7328_s2 }
   0x4   :  { %7408 = sst [smem:[#allocation130_spill]] %s7329_s3 }
   0x5   :  { %7409 = sst [smem:[#allocation131_spill]] %s7330_s4 }
   0x6 LB: > { %s4116_s22 = sadd.s32 4294967295, %s4636_s1   ;;  %p4120_p0 = scmp.ge.s32.totalorder %s4636_s1, 1  ;;  %s4636_s1 = sphi %s4753_s1, %s31_s1  }
   0x7   : > { %p565_p1 = scmp.lt.s32.totalorder %s4636_s1, 3 }
   0x9   : > { %p566_p2 = pnand %p4120_p0, %p565_p1 }
   0xb   : > { %569 = sbr.rel (%p566_p2) target bundleno = 2975 (0xb9f), region = 96 }
  0x10   : > { %p626_p3 = scmp.lt.s32.totalorder %s4116_s22, 1  ;;  %v7358_v0 = vmov 0   ;;  %s7410_s25 = sld [smem:[#allocation127_spill]]  ;;  %v7352_v6 = vmov 1   ;;  %v7356_v9 = vmov 2   ;;  %v7350_v39 = vmov 6  }
  0x11   : > { %4429 = vset.pattern.permute.xlu1 %v7358_v0  ;;  %4428 = vset.pattern.permute.xlu0 %v7358_v0  ;;  %s7411_s28 = sld [smem:[#allocation130_spill]]  ;;  %vm3052_vm0 = vcmask 261120   ;;  %vm4647_vm1 = vmmov 0  }
  0x12   : > { %s7794_s22 = smov (!%p626_p3, %s4116_s22), 1  ;;  %s7412_s30 = sld [smem:[#allocation131_spill]] }
  0x13   : > { %s4202_s23 = sshll.u32 %s7794_s22, 8  ;;  %s7565_s26 = sld [smem:[#allocation128_spill]] }
  0x14   : > { %s7767_s24 = sld [smem:[#allocation129_spill]] }
  0x16   : > { %s4769_s3 = scalar_lea.vmem %s7410_s25, %s4202_s23 }
  0x17   : > { %v642_v1 = vld [vmem:[%s4769_s3 + $0x10] sm:$0xff]  ;;  %v640_v2 = vld [vmem:[%s4769_s3] sm:$0xff]  ;;  %v643_v3 = vld [vmem:[%s4769_s3 + $0x18] sm:$0xff] }
  0x18   : > { %686 = vperm.xlu1 %4429, %v642_v1   ;;  %676 = vperm.xlu0 %4428, %v640_v2   ;;  %v4775_v4 = vld [vmem:[%s4769_s3 + $0x8] sm:$0xff]  ;;  %v4779_v5 = vld [vmem:[%s4769_s3 + $0x20] sm:$0xff]  ;;  %v4784_v7 = vld [vmem:[%s4769_s3 + $0x38] sm:$0xff] }
  0x19   : > { %v4789_v8 = vld [vmem:[%s4769_s3 + $0x48] sm:$0xff]  ;;  %v4794_v10 = vld [vmem:[%s4769_s3 + $0x60] sm:$0xff]  ;;  %v4798_v11 = vld [vmem:[%s4769_s3 + $0x78] sm:$0xff] }
  0x1a   : > { %v4802_v12 = vld [vmem:[%s4769_s3 + $0x88] sm:$0xff]  ;;  %v4807_v14 = vld [vmem:[%s4769_s3 + $0xa0] sm:$0xff]  ;;  %v646_v15 = vld [vmem:[%s4769_s3 + $0x30] sm:$0xff] }
  0x1b   : > { %v645_v13 = vld [vmem:[%s4769_s3 + $0x28] sm:$0xff]  ;;  %v4813_v16 = vld [vmem:[%s4769_s3 + $0xb8] sm:$0xff]  ;;  %v648_v17 = vld [vmem:[%s4769_s3 + $0x40] sm:$0xff] }
  0x1c   : > { %691 = vperm.xlu1 %4429, %v643_v3   ;;  %681 = vperm.xlu0 %4428, %v4775_v4   ;;  %v651_v18 = vld [vmem:[%s4769_s3 + $0x58] sm:$0xff]  ;;  %v653_v19 = vld [vmem:[%s4769_s3 + $0x68] sm:$0xff]  ;;  %v4826_v20 = vld [vmem:[%s4769_s3 + $0x80] sm:$0xff] }
  0x1d   : > { %v650_v21 = vld [vmem:[%s4769_s3 + $0x50] sm:$0xff]  ;;  %v4831_v22 = vld [vmem:[%s4769_s3 + $0x98] sm:$0xff]  ;;  %v4835_v23 = vld [vmem:[%s4769_s3 + $0xa8] sm:$0xff] }
  0x1e   : > { %v4840_v24 = vld [vmem:[%s4769_s3 + $0xc0] sm:$0xff]  ;;  %v4845_v25 = vld [vmem:[%s4769_s3 + $0xd8] sm:$0xff]  ;;  %v4849_v26 = vld [vmem:[%s4769_s3 + $0xe8] sm:$0xff] }
  0x1f   : > { %v654_v27 = vld [vmem:[%s4769_s3 + $0x70] sm:$0xff]  ;;  %v4870_v29 = vld [vmem:[%s4769_s3 + $0xc8] sm:$0xff]  ;;  %v4877_v31 = vld [vmem:[%s4769_s3 + $0xe0] sm:$0xff] }
  0x20   : > { %4430 = vset.pattern.permute.xlu1 %v7352_v6  ;;  %696 = vperm.xlu0 %4428, %v4779_v5   ;;  %v658_v33 = vld [vmem:[%s4769_s3 + $0x90] sm:$0xff]  ;;  %v4885_v34 = vld [vmem:[%s4769_s3 + $0xf8] sm:$0xff]  ;;  %v4896_v38 = vld [vmem:[%s7411_s28] ss:$0 sm:$0xff] }
  0x21   : > { %914 = vperm.xlu1 %4430, %v4775_v4   ;;  %v4906_v42 = vld [vmem:[%s7412_s30] ss:$0 sm:$0xff]  ;;  %v4911_v43 = vld [vmem:[%s7411_s28 + $0x1] ss:$0 sm:$0xff]  ;;  %v4921_v47 = vld [vmem:[%s7411_s28 + $0x2] ss:$0 sm:$0xff] }
  0x22   : > { %v662_v61 = vld [vmem:[%s4769_s3 + $0xb0] sm:$0xff] }
  0x24   : > { %711 = vperm.xlu0 %4428, %v4784_v7  }
  0x25   : > { %918 = vperm.xlu1 %4430, %v642_v1  }
  0x28   : > { %721 = vperm.xlu0 %4428, %v4789_v8  }
  0x29   : > { %4431 = vset.pattern.permute.xlu1 %v7356_v9 }
  0x2a   : > { %1107 = vperm.xlu1 %4431, %v640_v2  }
  0x2c   : > { %736 = vperm.xlu0 %4428, %v4794_v10  }
  0x2e   : > { %1115 = vperm.xlu1 %4431, %v642_v1  }
  0x30   : > { %751 = vperm.xlu0 %4428, %v4798_v11  }
  0x32   : > { %1119 = vperm.xlu1 %4431, %v643_v3  }
  0x34   : > { %761 = vperm.xlu0 %4428, %v4802_v12  }
  0x36   : > { %4432 = vset.pattern.permute.xlu1 %v7358_v0 }
  0x37   : > { %701 = vperm.xlu1 %4432, %v645_v13  }
  0x38   : > { %776 = vperm.xlu0 %4428, %v4807_v14  }
  0x3b   : > { %706 = vperm.xlu1 %4432, %v646_v15  }
  0x3c   : > { %791 = vperm.xlu0 %4428, %v4813_v16  }
  0x3f   : > { %4433 = vset.pattern.permute.xlu1 %v7352_v6 }
  0x40   : > { %926 = vperm.xlu1 %4433, %v4779_v5   ;;  %4445 = vset.pattern.permute.xlu0 %v7352_v6 }
  0x41   : > { %910 = vperm.xlu0 %4445, %v640_v2  }
  0x44   : > { %934 = vperm.xlu1 %4433, %v646_v15  }
  0x45   : > { %922 = vperm.xlu0 %4445, %v643_v3  }
  0x48   : > { %938 = vperm.xlu1 %4433, %v4784_v7  }
  0x49   : > { %930 = vperm.xlu0 %4445, %v645_v13  }
  0x4c   : > { %4434 = vset.pattern.permute.xlu1 %v7356_v9 }
  0x4d   : > { %1127 = vperm.xlu1 %4434, %v645_v13   ;;  %942 = vperm.xlu0 %4445, %v648_v17  }
  0x51   : > { %1131 = vperm.xlu1 %4434, %v646_v15   ;;  %954 = vperm.xlu0 %4445, %v651_v18  }
  0x55   : > { %4435 = vset.pattern.permute.xlu1 %v7358_v0  ;;  %962 = vperm.xlu0 %4445, %v653_v19  }
  0x56   : > { %716 = vperm.xlu1 %4435, %v648_v17  }
  0x59   : > { %974 = vperm.xlu0 %4445, %v4826_v20  }
  0x5a   : > { %726 = vperm.xlu1 %4435, %v650_v21  }
  0x5d   : > { %986 = vperm.xlu0 %4445, %v4831_v22  }
  0x5e   : > { %731 = vperm.xlu1 %4435, %v651_v18  }
  0x61   : > { %994 = vperm.xlu0 %4445, %v4835_v23  }
  0x62   : > { %4436 = vset.pattern.permute.xlu1 %v7352_v6 }
  0x63   : > { %946 = vperm.xlu1 %4436, %v4789_v8  }
  0x65   : > { %1006 = vperm.xlu0 %4445, %v4840_v24  }
  0x67   : > { %950 = vperm.xlu1 %4436, %v650_v21  }
  0x69   : > { %1018 = vperm.xlu0 %4445, %v4845_v25  }
  0x6b   : > { %4437 = vset.pattern.permute.xlu1 %v7356_v9 }
  0x6c   : > { %1139 = vperm.xlu1 %4437, %v648_v17  }
  0x6d   : > { %1026 = vperm.xlu0 %4445, %v4849_v26  }
  0x70   : > { %1147 = vperm.xlu1 %4437, %v650_v21  }
  0x71   : > { %4453 = vset.pattern.permute.xlu0 %v7356_v9 }
  0x72   : > { %1111 = vperm.xlu0 %4453, %v4775_v4  }
  0x74   : > { %1151 = vperm.xlu1 %4437, %v651_v18  }
  0x76   : > { %1123 = vperm.xlu0 %4453, %v4779_v5  }
  0x78   : > { %4438 = vset.pattern.permute.xlu1 %v7358_v0 }
  0x79   : > { %741 = vperm.xlu1 %4438, %v653_v19  }
  0x7a   : > { %1135 = vperm.xlu0 %4453, %v4784_v7  }
  0x7d   : > { %746 = vperm.xlu1 %4438, %v654_v27  }
  0x7e   : > { %1143 = vperm.xlu0 %4453, %v4789_v8  }
  0x81   : > { %4439 = vset.pattern.permute.xlu1 %v7352_v6 }
  0x82   : > { %958 = vperm.xlu1 %4439, %v4794_v10   ;;  %1155 = vperm.xlu0 %4453, %v4794_v10  }
  0x86   : > { %966 = vperm.xlu1 %4439, %v654_v27   ;;  %1167 = vperm.xlu0 %4453, %v4798_v11  }
  0x8a   : > { %970 = vperm.xlu1 %4439, %v4798_v11   ;;  %1175 = vperm.xlu0 %4453, %v4802_v12  }
  0x8e   : > { %4440 = vset.pattern.permute.xlu1 %v7356_v9  ;;  %1187 = vperm.xlu0 %4453, %v4807_v14  }
  0x8f   : > { %1159 = vperm.xlu1 %4440, %v653_v19  }
  0x92   : > { %1199 = vperm.xlu0 %4453, %v4813_v16  }
  0x93   : > { %v687_v28 = vpop.permute.xlu1 %686  ;;  %1163 = vperm.xlu1 %4440, %v654_v27   ;;  %v4879_v32 = vpop.permute.xlu0 %676 }
  0x94   : > { %v840_v40 = vmul.f32 %v4896_v38, %v687_v28 }
  0x96   : > { %1207 = vperm.xlu0 %4453, %v4870_v29   ;;  %v878_v46 = vadd.f32 %v4906_v42, %v840_v40 }
  0x97   : > { %v4873_v30 = vpop.permute.xlu1 %691  ;;  %4441 = vset.pattern.permute.xlu1 %v7358_v0  ;;  %v4889_v36 = vpop.permute.xlu0 %681 }
  0x98   : > { %756 = vperm.xlu1 %4441, %v4826_v20  }
  0x9a   : > { %1219 = vperm.xlu0 %4453, %v4877_v31  }
  0x9b   : > { %v4900_v41 = vpop.permute.xlu0 %696 }
  0x9c   : > { %v4887_v35 = vpop.permute.xlu1 %914  ;;  %766 = vperm.xlu1 %4441, %v658_v33  }
  0x9e   : > { %1231 = vperm.xlu0 %4453, %v4885_v34  }
  0x9f   : > { %v4923_v50 = vpop.permute.xlu0 %711 }
  0xa0   : > { %v919_v37 = vpop.permute.xlu1 %918  ;;  %771 = vperm.xlu1 %4441, %v4831_v22  }
  0xa1   : > { %v1043_v45 = vmul.f32 %v4911_v43, %v919_v37 }
  0xa2   : > { %4470 = vset.pattern.permute.xlu0 %v7350_v39 }
  0xa3   : > { %v1075_v49 = vadd.f32 %v1043_v45, %v878_v46  ;;  %v4932_v55 = vpop.permute.xlu0 %721 }
  0xa4   : > { %4442 = vset.pattern.permute.xlu1 %v7352_v6 }
  0xa5   : > { %978 = vperm.xlu1 %4442, %v4802_v12   ;;  %v4914_v44 = vpop.permute.xlu1 %1107 }
  0xa7   : > { %v4937_v57 = vpop.permute.xlu0 %736 }
  0xa9   : > { %982 = vperm.xlu1 %4442, %v658_v33   ;;  %v1116_v48 = vpop.permute.xlu1 %1115 }
  0xaa   : > { %v1240_v51 = vmul.f32 %v4921_v47, %v1116_v48 }
  0xab   : > { %v4944_v60 = vpop.permute.xlu0 %751 }
  0xac   : > { %v1272_v52 = vadd.f32 %v1240_v51, %v1075_v49 }
  0xad   : > { %4443 = vset.pattern.permute.xlu1 %v7356_v9  ;;  %v4927_v53 = vpop.permute.xlu1 %1119 }
  0xae   : > { %v4929_v54 = vmax.f32 %v1272_v52, 0.0  ;;  %1171 = vperm.xlu1 %4443, %v4826_v20   ;;  %v666_v20 = vld [vmem:[%s4769_s3 + $0xd0] sm:$0xff] }
  0xaf   : > { %v4947_v63 = vpop.permute.xlu0 %761 }
  0xb0   : > { %7413 = vst [vmem:[#allocation2_spill] sm:$0xff] %v4929_v54  ;;  %2565 = vperm.xlu0 %4470, %v4929_v54  }
  0xb2   : > { %1179 = vperm.xlu1 %4443, %v658_v33   ;;  %v4935_v56 = vpop.permute.xlu1 %701 }
  0xb3   : > { %v4954_v3 = vpop.permute.xlu0 %776 }
  0xb4   : > { %7414 = vst [vmem:[#allocation3_spill] sm:$0xff] %v4954_v3 }
  0xb6   : > { %1183 = vperm.xlu1 %4443, %v4831_v22   ;;  %v707_v58 = vpop.permute.xlu1 %706 }
  0xb7   : > { %v844_v2 = vmul.f32 %v4896_v38, %v707_v58  ;;  %v4962_v12 = vpop.permute.xlu0 %791 }
  0xb8   : > { %7415 = vst [vmem:[#allocation4_spill] sm:$0xff] %v4962_v12 }
  0xb9   : > { %v882_v7 = vadd.f32 %v4906_v42, %v844_v2 }
  0xba   : > { %4444 = vset.pattern.permute.xlu1 %v7358_v0 }
  0xbb   : > { %781 = vperm.xlu1 %4444, %v4835_v23   ;;  %v4942_v59 = vpop.permute.xlu1 %926 }
  0xbc   : > { %v911_v17 = vpop.permute.xlu0 %910 }
  0xbf   : > { %786 = vperm.xlu1 %4444, %v662_v61   ;;  %v935_v62 = vpop.permute.xlu1 %934 }
  0xc0   : > { %v1047_v5 = vmul.f32 %v4911_v43, %v935_v62  ;;  %v4974_v19 = vpop.permute.xlu0 %922 }
  0xc2   : > { %v1079_v10 = vadd.f32 %v1047_v5, %v882_v7 }
  0xc3   : > { %4446 = vset.pattern.permute.xlu1 %v7352_v6  ;;  %v4950_v1 = vpop.permute.xlu1 %938 }
  0xc4   : > { %990 = vperm.xlu1 %4446, %v4807_v14   ;;  %v4980_v22 = vpop.permute.xlu0 %930 }
  0xc8   : > { %998 = vperm.xlu1 %4446, %v662_v61   ;;  %v4956_v4 = vpop.permute.xlu1 %1127  ;;  %v4983_v27 = vpop.permute.xlu0 %942 }
  0xcc   : > { %1002 = vperm.xlu1 %4446, %v4813_v16   ;;  %v1132_v8 = vpop.permute.xlu1 %1131  ;;  %v4992_v46 = vpop.permute.xlu0 %954 }
  0xcd   : > { %v1244_v11 = vmul.f32 %v4921_v47, %v1132_v8 }
  0xcf   : > { %v1276_v13 = vadd.f32 %v1244_v11, %v1079_v10 }
  0xd0   : > { %4447 = vset.pattern.permute.xlu1 %v7356_v9 }
  0xd1   : > { %v4965_v14 = vmax.f32 %v1276_v13, 0.0  ;;  %1191 = vperm.xlu1 %4447, %v4835_v23   ;;  %v4968_v15 = vpop.permute.xlu1 %716 }
  0xd3   : > { %2581 = vperm.xlu0 %4470, %v4965_v14  }
  0xd5   : > { %1195 = vperm.xlu1 %4447, %v662_v61   ;;  %v727_v16 = vpop.permute.xlu1 %726  ;;  %v5001_v61 = vpop.permute.xlu0 %962 }
  0xd6   : > { %v848_v28 = vmul.f32 %v4896_v38, %v727_v16  ;;  %v838_v16 = vmul.f32 %v4896_v38, %v4879_v32 }
  0xd8   : > { %v886_v40 = vadd.f32 %v4906_v42, %v848_v28 }
  0xd9   : > { %4448 = vset.pattern.permute.xlu1 %v7358_v0  ;;  %v4972_v18 = vpop.permute.xlu1 %731  ;;  %v5006_v2 = vpop.permute.xlu0 %974 }
  0xda   : > { %796 = vperm.xlu1 %4448, %v4840_v24  }
  0xdd   : > { %v5013_v8 = vpop.permute.xlu0 %986 }
  0xde   : > { %806 = vperm.xlu1 %4448, %v666_v20   ;;  %v4978_v21 = vpop.permute.xlu1 %946 }
  0xe1   : > { %v5016_v11 = vpop.permute.xlu0 %994 }
  0xe2   : > { %811 = vperm.xlu1 %4448, %v4845_v25   ;;  %v951_v23 = vpop.permute.xlu1 %950 }
  0xe3   : > { %v1051_v37 = vmul.f32 %v4911_v43, %v951_v23 }
  0xe5   : > { %v1083_v48 = vadd.f32 %v1051_v37, %v886_v40  ;;  %v876_v40 = vadd.f32 %v4906_v42, %v838_v16 }
  0xe6   : > { %4449 = vset.pattern.permute.xlu1 %v7352_v6 }
  0xe7   : > { %1010 = vperm.xlu1 %4449, %v4870_v29   ;;  %v4988_v33 = vpop.permute.xlu1 %1139 }
  0xeb   : > { %1014 = vperm.xlu1 %4449, %v666_v20   ;;  %v1148_v45 = vpop.permute.xlu1 %1147 }
  0xec   : > { %v1248_v49 = vmul.f32 %v4921_v47, %v1148_v45  ;;  %v1041_v45 = vmul.f32 %v4911_v43, %v911_v17  ;;  %v841_v17 = vmul.f32 %v4896_v38, %v4873_v30 }
  0xee   : > { %v1280_v51 = vadd.f32 %v1248_v49, %v1083_v48  ;;  %v1073_v39 = vadd.f32 %v1041_v45, %v876_v40  ;;  %v839_v45 = vmul.f32 %v4896_v38, %v4889_v36 }
  0xef   : > { %4450 = vset.pattern.permute.xlu1 %v7356_v9  ;;  %v4996_v52 = vpop.permute.xlu1 %1151 }
  0xf0   : > { %v4998_v58 = vmax.f32 %v1280_v51, 0.0  ;;  %1203 = vperm.xlu1 %4450, %v4840_v24   ;;  %v670_v24 = vld [vmem:[%s4769_s3 + $0xf0] sm:$0xff]  ;;  %v877_v36 = vadd.f32 %v4906_v42, %v839_v45  ;;  %v7418_v45 = vmov 1   ;;  %s4123_s3 = sshll.u32 %s7794_s22, 3 }
  0xf1   : > { %s634_s29 = scalar_lea.vmem %s7345_s19, %s4123_s3  ;;  %s638_s21 = scalar_lea.vmem %s7346_s20, %s4123_s3 }
  0xf2   : > { %2597 = vperm.xlu0 %4470, %v4998_v58  }
  0xf4   : > { %1211 = vperm.xlu1 %4450, %v666_v20   ;;  %v5004_v62 = vpop.permute.xlu1 %741  ;;  %v5025_v20 = vpop.permute.xlu0 %1006 }
  0xf5   : > { %7416 = vst [vmem:[#allocation5_spill] sm:$0xff] %v5025_v20 }
  0xf8   : > { %1215 = vperm.xlu1 %4450, %v4845_v25   ;;  %v747_v5 = vpop.permute.xlu1 %746  ;;  %v5035_v32 = vpop.permute.xlu0 %1018 }
  0xf9   : > { %v852_v25 = vmul.f32 %v4896_v38, %v747_v5  ;;  %7417 = vst [vmem:[#allocation6_spill] sm:$0xff] %v5035_v32 }
  0xfb   : > { %v890_v37 = vadd.f32 %v4906_v42, %v852_v25  ;;  %v1238_v25 = vmul.f32 %v4921_v47, %v4914_v44 }
  0xfc   : > { %4451 = vset.pattern.permute.xlu1 %v7358_v0 }
  0xfd   : > { %821 = vperm.xlu1 %4451, %v4849_v26   ;;  %v5011_v7 = vpop.permute.xlu1 %958  ;;  %v1270_v16 = vadd.f32 %v1238_v25, %v1073_v39 }
  0xff   : > { %v5056_v30 = vmax.f32 %v1270_v16, 0.0 }
 0x101   : > { %826 = vperm.xlu1 %4451, %v670_v24   ;;  %v967_v10 = vpop.permute.xlu1 %966 }
 0x102   : > { %v1055_v28 = vmul.f32 %v4911_v43, %v967_v10 }
 0x104   : > { %v1087_v49 = vadd.f32 %v1055_v28, %v890_v37  ;;  %v1044_v28 = vmul.f32 %v4911_v43, %v4974_v19  ;;  %v5050_v37 = vpop.permute.xlu0 %1026  ;;  %v1241_v19 = vmul.f32 %v4921_v47, %v4927_v53 }
 0x105   : > { %4452 = vset.pattern.permute.xlu1 %v7352_v6  ;;  %v5019_v13 = vpop.permute.xlu1 %970 }
 0x106   : > { %1022 = vperm.xlu1 %4452, %v4877_v31  }
 0x10a   : > { %1030 = vperm.xlu1 %4452, %v670_v24   ;;  %v5027_v23 = vpop.permute.xlu1 %1159 }
 0x10e   : > { %1034 = vperm.xlu1 %4452, %v4885_v34   ;;  %v1164_v48 = vpop.permute.xlu1 %1163 }
 0x10f   : > { %v1252_v51 = vmul.f32 %v4921_v47, %v1164_v48  ;;  %v7354_v48 = vmov 7  }
 0x111   : > { %v1284_v5 = vadd.f32 %v1252_v51, %v1087_v49  ;;  %v1042_v49 = vmul.f32 %v4911_v43, %v4887_v35 }
 0x112   : > { %4454 = vset.pattern.permute.xlu1 %v7356_v9 }
 0x113   : > { %v5038_v6 = vmax.f32 %v1284_v5, 0.0  ;;  %1223 = vperm.xlu1 %4454, %v4849_v26   ;;  %v5041_v10 = vpop.permute.xlu1 %756  ;;  %v879_v26 = vadd.f32 %v4906_v42, %v841_v17  ;;  %v1074_v25 = vadd.f32 %v1042_v49, %v877_v36 }
 0x115   : > { %2613 = vperm.xlu0 %4470, %v5038_v6   ;;  %v1076_v44 = vadd.f32 %v1044_v28, %v879_v26 }
 0x117   : > { %1227 = vperm.xlu1 %4454, %v670_v24   ;;  %v767_v40 = vpop.permute.xlu1 %766  ;;  %v1112_v24 = vpop.permute.xlu0 %1111  ;;  %v1273_v51 = vadd.f32 %v1241_v19, %v1076_v44 }
 0x118   : > { %v1239_v5 = vmul.f32 %v4921_v47, %v1112_v24  ;;  %v856_v26 = vmul.f32 %v4896_v38, %v767_v40 }
 0x119   : > { %4519 = vset.pattern.permute.xlu0 %v7354_v48  ;;  %v5073_v16 = vmax.f32 %v1273_v51, 0.0 }
 0x11a   : > { %2762 = vperm.xlu0 %4519, %v4929_v54   ;;  %v1271_v53 = vadd.f32 %v1239_v5, %v1074_v25  ;;  %v894_v24 = vadd.f32 %v4906_v42, %v856_v26 }
 0x11b   : > { %4455 = vset.pattern.permute.xlu1 %v7358_v0  ;;  %v5060_v39 = vpop.permute.xlu1 %771 }
 0x11c   : > { %1338 = vperm.xlu1 %4455, %v5056_v30   ;;  %v5078_v35 = vmax.f32 %v1271_v53, 0.0 }
 0x11e   : > { %2778 = vperm.xlu0 %4519, %v4965_v14  }
 0x120   : > { %v5070_v17 = vpop.permute.xlu1 %978  ;;  %1348 = vperm.xlu1 %4455, %v4929_v54  }
 0x122   : > { %2794 = vperm.xlu0 %4519, %v4998_v58  }
 0x124   : > { %v983_v28 = vpop.permute.xlu1 %982  ;;  %1353 = vperm.xlu1 %4455, %v5073_v16  }
 0x125   : > { %v1059_v19 = vmul.f32 %v4911_v43, %v983_v28  ;;  %v842_v28 = vmul.f32 %v4896_v38, %v4900_v41 }
 0x126   : > { %2810 = vperm.xlu0 %4519, %v5038_v6  }
 0x127   : > { %v1091_v49 = vadd.f32 %v1059_v19, %v894_v24  ;;  %v1124_v19 = vpop.permute.xlu0 %1123  ;;  %v880_v24 = vadd.f32 %v4906_v42, %v842_v28  ;;  %v845_v28 = vmul.f32 %v4896_v38, %v4923_v50  ;;  %v7362_v50 = vmov 4  }
 0x128   : > { %4456 = vset.pattern.permute.xlu1 %v7418_v45 }
 0x129   : > { %v5082_v44 = vpop.permute.xlu1 %1171  ;;  %1576 = vperm.xlu1 %4456, %v5078_v35   ;;  %v883_v32 = vadd.f32 %v4906_v42, %v845_v28 }
 0x12d   : > { %v1180_v36 = vpop.permute.xlu1 %1179  ;;  %1580 = vperm.xlu1 %4456, %v4929_v54  }
 0x12e   : > { %v1256_v51 = vmul.f32 %v4921_v47, %v1180_v36  ;;  %v1045_v36 = vmul.f32 %v4911_v43, %v4942_v59 }
 0x130   : > { %v1288_v5 = vadd.f32 %v1256_v51, %v1091_v49  ;;  %v1242_v49 = vmul.f32 %v4921_v47, %v1124_v19  ;;  %v7360_v51 = vmov 3   ;;  %v1077_v48 = vadd.f32 %v1045_v36, %v880_v24 }
 0x131   : > { %v5089_v25 = vpop.permute.xlu1 %1183  ;;  %4457 = vset.pattern.permute.xlu1 %v7356_v9  ;;  %v7421_v19 = vmov 0  }
 0x132   : > { %v5092_v40 = vmax.f32 %v1288_v5, 0.0  ;;  %1769 = vperm.xlu1 %4457, %v5056_v30   ;;  %v1274_v41 = vadd.f32 %v1242_v49, %v1077_v48  ;;  %v1048_v48 = vmul.f32 %v4911_v43, %v4950_v1 }
 0x134   : > { %2826 = vperm.xlu0 %4519, %v5092_v40   ;;  %v5113_v0 = vmax.f32 %v1274_v41, 0.0  ;;  %v1080_v20 = vadd.f32 %v1048_v48, %v883_v32  ;;  %v843_v32 = vmul.f32 %v4896_v38, %v4935_v56  ;;  %v1243_v48 = vmul.f32 %v4921_v47, %v4956_v4 }
 0x135   : > { %v7364_v56 = vmov 5   ;;  %v1050_v4 = vmul.f32 %v4911_v43, %v4978_v21 }
 0x136   : > { %v5096_v53 = vpop.permute.xlu1 %781  ;;  %1777 = vperm.xlu1 %4457, %v4929_v54  }
 0x13a   : > { %v787_v26 = vpop.permute.xlu1 %786  ;;  %1781 = vperm.xlu1 %4457, %v5073_v16  }
 0x13b   : > { %v860_v24 = vmul.f32 %v4896_v38, %v787_v26 }
 0x13e   : > { %4458 = vset.pattern.permute.xlu1 %v7360_v51  ;;  %v1136_v51 = vpop.permute.xlu0 %1135 }
 0x13f   : > { %v5107_v5 = vpop.permute.xlu1 %990  ;;  %1970 = vperm.xlu1 %4458, %v5078_v35   ;;  %v1245_v36 = vmul.f32 %v4921_v47, %v1136_v51 }
 0x140   : > { %7419 = vst [vmem:[#allocation7_spill] sm:$0xff] %v5107_v5 }
 0x141   : > { %v1277_v28 = vadd.f32 %v1245_v36, %v1080_v20  ;;  %v7423_v20 = vmov 4  }
 0x143   : > { %v999_v9 = vpop.permute.xlu1 %998  ;;  %1974 = vperm.xlu1 %4458, %v4929_v54   ;;  %v5132_v51 = vmax.f32 %v1277_v28, 0.0 }
 0x144   : > { %v1063_v41 = vmul.f32 %v4911_v43, %v999_v9 }
 0x147   : > { %v5115_v59 = vpop.permute.xlu1 %1002  ;;  %4459 = vset.pattern.permute.xlu1 %v7421_v19 }
 0x148   : > { %7420 = vst [vmem:[#allocation8_spill] sm:$0xff] %v5115_v59  ;;  %1358 = vperm.xlu1 %4459, %v5113_v0   ;;  %v898_v59 = vadd.f32 %v4906_v42, %v860_v24 }
 0x14a   : > { %v1095_v5 = vadd.f32 %v1063_v41, %v898_v59  ;;  %v881_v59 = vadd.f32 %v4906_v42, %v843_v32  ;;  %v1144_v41 = vpop.permute.xlu0 %1143  ;;  %v851_v32 = vmul.f32 %v4896_v38, %v5004_v62  ;;  %v1251_v62 = vmul.f32 %v4921_v47, %v5027_v23 }
 0x14c   : > { %v5124_v49 = vpop.permute.xlu1 %1191  ;;  %4460 = vset.pattern.permute.xlu1 %v7362_v50 }
 0x14d   : > { %2163 = vperm.xlu1 %4460, %v5056_v30  }
 0x150   : > { %v1196_v12 = vpop.permute.xlu1 %1195 }
 0x151   : > { %v1260_v1 = vmul.f32 %v4921_v47, %v1196_v12  ;;  %2167 = vperm.xlu1 %4460, %v5078_v35  }
 0x153   : > { %v1292_v26 = vadd.f32 %v1260_v1, %v1095_v5  ;;  %v1046_v5 = vmul.f32 %v4911_v43, %v4980_v22  ;;  %v1247_v1 = vmul.f32 %v4921_v47, %v1144_v41  ;;  %v855_v41 = vmul.f32 %v4896_v38, %v4947_v63 }
 0x155   : > { %v5134_v3 = vmax.f32 %v1292_v26, 0.0  ;;  %v5136_v50 = vpop.permute.xlu1 %796  ;;  %4461 = vset.pattern.permute.xlu1 %v7421_v19  ;;  %v1078_v24 = vadd.f32 %v1046_v5, %v881_v59  ;;  %v889_v59 = vadd.f32 %v4906_v42, %v851_v32  ;;  %v893_v23 = vadd.f32 %v4906_v42, %v855_v41 }
 0x156   : > { %7422 = vst [vmem:[#allocation9_spill] sm:$0xff] %v5136_v50  ;;  %1373 = vperm.xlu1 %4461, %v5132_v51   ;;  %v1049_v50 = vmul.f32 %v4911_v43, %v4983_v27 }
 0x157   : > { %2842 = vperm.xlu0 %4519, %v5134_v3   ;;  %v1275_v22 = vadd.f32 %v1243_v48, %v1078_v24  ;;  %v5187_v48 = vpop.permute.xlu0 %1155  ;;  %v1054_v24 = vmul.f32 %v4911_v43, %v5001_v61 }
 0x159   : > { %v5141_v9 = vpop.permute.xlu1 %806  ;;  %v5173_v28 = vmax.f32 %v1275_v22, 0.0 }
 0x15a   : > { %4462 = vset.pattern.permute.xlu1 %v7423_v20 }
 0x15b   : > { %4556 = vset.pattern.permute.xlu0 %v7421_v19  ;;  %2175 = vperm.xlu1 %4462, %v5073_v16  }
 0x15c   : > { %801 = vperm.xlu0 %4556, %v4870_v29  }
 0x15d   : > { %v5147_v12 = vpop.permute.xlu1 %811 }
 0x15e   : > { %7424 = vst [vmem:[#allocation10_spill] sm:$0xff] %v5147_v12 }
 0x15f   : > { %4463 = vset.pattern.permute.xlu1 %v7418_v45 }
 0x160   : > { %816 = vperm.xlu0 %4556, %v4877_v31   ;;  %1588 = vperm.xlu1 %4463, %v5113_v0   ;;  %v847_v31 = vmul.f32 %v4896_v38, %v4932_v55 }
 0x162   : > { %v5159_v29 = vpop.permute.xlu1 %1010 }
 0x164   : > { %831 = vperm.xlu0 %4556, %v4885_v34   ;;  %4464 = vset.pattern.permute.xlu1 %v7364_v56  ;;  %v885_v34 = vadd.f32 %v4906_v42, %v847_v31 }
 0x165   : > { %2360 = vperm.xlu1 %4464, %v5056_v30  }
 0x166   : > { %v5166_v36 = vpop.permute.xlu1 %1014  ;;  %v1082_v55 = vadd.f32 %v1050_v4, %v885_v34  ;;  %v1086_v4 = vadd.f32 %v1054_v24, %v889_v59  ;;  %v5202_v34 = vpop.permute.xlu0 %1167 }
 0x168   : > { %1343 = vperm.xlu0 %4556, %v5078_v35   ;;  %v1279_v21 = vadd.f32 %v1247_v1, %v1082_v55  ;;  %v1283_v61 = vadd.f32 %v1251_v62, %v1086_v4  ;;  %v1058_v1 = vmul.f32 %v4911_v43, %v5070_v17  ;;  %v7427_v55 = vmov 2  }
 0x169   : > { %2364 = vperm.xlu1 %4464, %v5078_v35   ;;  %v859_v62 = vmul.f32 %v4896_v38, %v5096_v53  ;;  %v7428_v4 = vmov 6   ;;  %v1062_v53 = vmul.f32 %v4911_v43, %v5016_v11 }
 0x16a   : > { %v5191_v31 = vmax.f32 %v1279_v21, 0.0  ;;  %v1176_v63 = vpop.permute.xlu0 %1175  ;;  %v5212_v21 = vmax.f32 %v1283_v61, 0.0  ;;  %v1090_v24 = vadd.f32 %v1058_v1, %v893_v23  ;;  %v1259_v23 = vmul.f32 %v4921_v47, %v5124_v49 }
 0x16b   : > { %v5176_v26 = vpop.permute.xlu1 %1203  ;;  %v1255_v59 = vmul.f32 %v4921_v47, %v1176_v63 }
 0x16c   : > { %7425 = vst [vmem:[#allocation11_spill] sm:$0xff] %v5176_v26  ;;  %1363 = vperm.xlu0 %4556, %v5173_v28   ;;  %v846_v26 = vmul.f32 %v4896_v38, %v4968_v15 }
 0x16d   : > { %4465 = vset.pattern.permute.xlu1 %v7418_v45  ;;  %v1287_v41 = vadd.f32 %v1255_v59, %v1090_v24 }
 0x16e   : > { %1600 = vperm.xlu1 %4465, %v5132_v51   ;;  %v5241_v11 = vpop.permute.xlu0 %1187 }
 0x16f   : > { %v5183_v5 = vpop.permute.xlu1 %1211  ;;  %v5229_v1 = vmax.f32 %v1287_v41, 0.0  ;;  %7431 = vst [vmem:[#allocation15_spill] sm:$0xff] %v5241_v11 }
 0x170   : > { %1368 = vperm.xlu0 %4556, %v4965_v14  }
 0x172   : > { %4466 = vset.pattern.permute.xlu1 %v7364_v56  ;;  %v897_v56 = vadd.f32 %v4906_v42, %v859_v62 }
 0x173   : > { %v5196_v22 = vpop.permute.xlu1 %1215  ;;  %2372 = vperm.xlu1 %4466, %v5073_v16  }
 0x174   : > { %7426 = vst [vmem:[#allocation12_spill] sm:$0xff] %v5196_v22  ;;  %1383 = vperm.xlu0 %4556, %v5191_v31   ;;  %v1094_v63 = vadd.f32 %v1062_v53, %v897_v56  ;;  %v7433_v56 = vmov 3   ;;  %v5251_v53 = vpop.permute.xlu0 %1199 }
 0x175   : > { %7434 = vst [vmem:[#allocation17_spill] sm:$0xff] %v5251_v53  ;;  %v1246_v53 = vmul.f32 %v4921_v47, %v4988_v33 }
 0x176   : > { %v1291_v24 = vadd.f32 %v1259_v23, %v1094_v63  ;;  %v7435_v63 = vmov 7  }
 0x177   : > { %4467 = vset.pattern.permute.xlu1 %v7427_v55 }
 0x178   : > { %v5208_v32 = vpop.permute.xlu1 %821  ;;  %1785 = vperm.xlu1 %4467, %v5113_v0   ;;  %1388 = vperm.xlu0 %4556, %v4998_v58   ;;  %v5243_v41 = vmax.f32 %v1291_v24, 0.0  ;;  %v5259_v24 = vpop.permute.xlu0 %1207 }
 0x17a   : > { %7432 = vst [vmem:[#allocation16_spill] sm:$0xff] %v5243_v41 }
 0x17c   : > { %v5217_v17 = vpop.permute.xlu1 %826  ;;  %4468 = vset.pattern.permute.xlu1 %v7428_v4  ;;  %1403 = vperm.xlu0 %4556, %v5212_v21  }
 0x17d   : > { %2557 = vperm.xlu1 %4468, %v5056_v30  }
 0x180   : > { %1408 = vperm.xlu0 %4556, %v5038_v6  }
 0x181   : > { %v5224_v61 = vpop.permute.xlu1 %1022  ;;  %2561 = vperm.xlu1 %4468, %v5078_v35  }
 0x182   : > { %7429 = vst [vmem:[#allocation13_spill] sm:$0xff] %v5224_v61  ;;  %v5271_v61 = vpop.permute.xlu0 %1219 }
 0x183   : > { %7438 = vst [vmem:[#allocation20_spill] sm:$0xff] %v5271_v61 }
 0x184   : > { %1423 = vperm.xlu0 %4556, %v5229_v1  }
 0x185   : > { %v5234_v59 = vpop.permute.xlu1 %1030  ;;  %4469 = vset.pattern.permute.xlu1 %v7427_v55 }
 0x186   : > { %1797 = vperm.xlu1 %4469, %v5132_v51   ;;  %v5279_v54 = vpop.permute.xlu0 %1231 }
 0x187   : > { %7440 = vst [vmem:[#allocation22_spill] sm:$0xff] %v5279_v54 }
 0x188   : > { %1428 = vperm.xlu0 %4556, %v5092_v40  }
 0x189   : > { %v5239_v62 = vpop.permute.xlu1 %1034 }
 0x18a   : > { %7430 = vst [vmem:[#allocation14_spill] sm:$0xff] %v5239_v62  ;;  %4471 = vset.pattern.permute.xlu1 %v7428_v4  ;;  %v884_v62 = vadd.f32 %v4906_v42, %v846_v26  ;;  %v849_v26 = vmul.f32 %v4896_v38, %v4972_v18  ;;  %v5289_v33 = vpop.permute.xlu0 %2565  ;;  %v1249_v18 = vmul.f32 %v4921_v47, %v4996_v52 }
 0x18b   : > { %2569 = vperm.xlu1 %4471, %v5073_v16   ;;  %7441 = vst [vmem:[#allocation23_spill] sm:$0xff] %v5289_v33 }
 0x18c   : > { %1443 = vperm.xlu0 %4556, %v5243_v41   ;;  %v1081_v15 = vadd.f32 %v1049_v50, %v884_v62  ;;  %v1052_v50 = vmul.f32 %v4911_v43, %v4992_v46  ;;  %v887_v62 = vadd.f32 %v4906_v42, %v849_v26 }
 0x18e   : > { %v5248_v49 = vpop.permute.xlu1 %1223  ;;  %v1278_v11 = vadd.f32 %v1246_v53, %v1081_v15  ;;  %v5298_v53 = vpop.permute.xlu0 %2581  ;;  %v1084_v15 = vadd.f32 %v1052_v50, %v887_v62 }
 0x18f   : > { %4472 = vset.pattern.permute.xlu1 %v7433_v56  ;;  %7443 = vst [vmem:[#allocation25_spill] sm:$0xff] %v5298_v53 }
 0x190   : > { %1982 = vperm.xlu1 %4472, %v5113_v0   ;;  %1448 = vperm.xlu0 %4556, %v5134_v3  }
 0x192   : > { %v5255_v23 = vpop.permute.xlu1 %1227  ;;  %v5306_v33 = vpop.permute.xlu0 %2597 }
 0x193   : > { %7445 = vst [vmem:[#allocation27_spill] sm:$0xff] %v5306_v33 }
 0x194   : > { %4473 = vset.pattern.permute.xlu1 %v7435_v63 }
 0x195   : > { %2754 = vperm.xlu1 %4473, %v5056_v30  }
 0x196   : > { %v5311_v46 = vpop.permute.xlu0 %2613 }
 0x197   : > { %v5261_v22 = vpop.permute.xlu1 %1338  ;;  %7447 = vst [vmem:[#allocation29_spill] sm:$0xff] %v5311_v46  ;;  %v7454_v46 = vmov 5  }
 0x198   : > { %7436 = vst [vmem:[#allocation18_spill] sm:$0xff] %v5261_v22 }
 0x199   : > { %2758 = vperm.xlu1 %4473, %v5078_v35  }
 0x19a   : > { %v5319_v52 = vpop.permute.xlu0 %2762 }
 0x19b   : > { %v5266_v12 = vpop.permute.xlu1 %1348  ;;  %7449 = vst [vmem:[#allocation31_spill] sm:$0xff] %v5319_v52 }
 0x19c   : > { %7437 = vst [vmem:[#allocation19_spill] sm:$0xff] %v5266_v12  ;;  %v5287_v12 = vmax.f32 %v1278_v11, 0.0 }
 0x19d   : > { %4474 = vset.pattern.permute.xlu1 %v7433_v56 }
 0x19e   : > { %1994 = vperm.xlu1 %4474, %v5132_v51   ;;  %v5325_v62 = vpop.permute.xlu0 %2778 }
 0x19f   : > { %v5277_v22 = vpop.permute.xlu1 %1353  ;;  %7450 = vst [vmem:[#allocation32_spill] sm:$0xff] %v5325_v62 }
 0x1a0   : > { %7439 = vst [vmem:[#allocation21_spill] sm:$0xff] %v5277_v22 }
 0x1a2   : > { %4475 = vset.pattern.permute.xlu1 %v7435_v63 }
 0x1a3   : > { %2766 = vperm.xlu1 %4475, %v5073_v16  }
 0x1a4   : > { %v5283_v27 = vpop.permute.xlu1 %1576 }
 0x1a7   : > { %4476 = vset.pattern.permute.xlu1 %v7421_v19 }
 0x1a8   : > { %v5292_v22 = vpop.permute.xlu1 %1580  ;;  %1378 = vperm.xlu1 %4476, %v5287_v12  }
 0x1a9   : > { %7442 = vst [vmem:[#allocation24_spill] sm:$0xff] %v5292_v22  ;;  %v1281_v22 = vadd.f32 %v1249_v18, %v1084_v15  ;;  %v5333_v15 = vpop.permute.xlu0 %2794 }
 0x1aa   : > { %7453 = vst [vmem:[#allocation35_spill] sm:$0xff] %v5333_v15 }
 0x1ab   : > { %v5313_v26 = vmax.f32 %v1281_v22, 0.0 }
 0x1ac   : > { %4477 = vset.pattern.permute.xlu1 %v7423_v20 }
 0x1ad   : > { %v5303_v11 = vpop.permute.xlu1 %1769  ;;  %2179 = vperm.xlu1 %4477, %v5113_v0   ;;  %v5340_v52 = vpop.permute.xlu0 %2810 }
 0x1ae   : > { %7444 = vst [vmem:[#allocation26_spill] sm:$0xff] %v5303_v11  ;;  %7456 = vst [vmem:[#allocation37_spill] sm:$0xff] %v5340_v52 }
 0x1b1   : > { %v5308_v54 = vpop.permute.xlu1 %1777  ;;  %2183 = vperm.xlu1 %4477, %v5173_v28  }
 0x1b2   : > { %7446 = vst [vmem:[#allocation28_spill] sm:$0xff] %v5308_v54 }
 0x1b5   : > { %v5315_v53 = vpop.permute.xlu1 %1781  ;;  %4478 = vset.pattern.permute.xlu1 %v7421_v19 }
 0x1b6   : > { %7448 = vst [vmem:[#allocation30_spill] sm:$0xff] %v5315_v53  ;;  %1393 = vperm.xlu1 %4478, %v5313_v26  }
 0x1ba   : > { %v5321_v50 = vpop.permute.xlu1 %1970  ;;  %4479 = vset.pattern.permute.xlu1 %v7423_v20 }
 0x1bb   : > { %2191 = vperm.xlu1 %4479, %v5132_v51  }
 0x1be   : > { %v5327_v18 = vpop.permute.xlu1 %1974 }
 0x1bf   : > { %7451 = vst [vmem:[#allocation33_spill] sm:$0xff] %v5327_v18  ;;  %4480 = vset.pattern.permute.xlu1 %v7418_v45  ;;  %v5345_v18 = vpop.permute.xlu0 %2826 }
 0x1c0   : > { %1604 = vperm.xlu1 %4480, %v5287_v12   ;;  %7458 = vst [vmem:[#allocation39_spill] sm:$0xff] %v5345_v18 }
 0x1c3   : > { %v5331_v22 = vpop.permute.xlu1 %1358 }
 0x1c4   : > { %7452 = vst [vmem:[#allocation34_spill] sm:$0xff] %v5331_v22  ;;  %4481 = vset.pattern.permute.xlu1 %v7454_v46  ;;  %v864_v22 = vmul.f32 %v4896_v38, %v5141_v9  ;;  %v1263_v9 = vmul.f32 %v4921_v47, %v5259_v24  ;;  %v868_v24 = vmul.f32 %v4896_v38, %v5217_v17 }
 0x1c5   : > { %2376 = vperm.xlu1 %4481, %v5113_v0  }
 0x1c8   : > { %v5337_v53 = vpop.permute.xlu1 %2163 }
 0x1c9   : > { %7455 = vst [vmem:[#allocation36_spill] sm:$0xff] %v5337_v53  ;;  %2380 = vperm.xlu1 %4481, %v5173_v28   ;;  %v867_v53 = vmul.f32 %v4896_v38, %v5208_v32 }
 0x1cc   : > { %v5342_v62 = vpop.permute.xlu1 %2167 }
 0x1cd   : > { %7457 = vst [vmem:[#allocation38_spill] sm:$0xff] %v5342_v62  ;;  %4482 = vset.pattern.permute.xlu1 %v7418_v45  ;;  %v1264_v62 = vmul.f32 %v4921_v47, %v5183_v5 }
 0x1ce   : > { %1616 = vperm.xlu1 %4482, %v5313_v26  }
 0x1d1   : > { %v5348_v33 = vpop.permute.xlu1 %1373 }
 0x1d2   : > { %7459 = vst [vmem:[#allocation40_spill] sm:$0xff] %v5348_v33  ;;  %4483 = vset.pattern.permute.xlu1 %v7454_v46  ;;  %v5351_v15 = vpop.permute.xlu0 %2842  ;;  %v1066_v33 = vmul.f32 %v4911_v43, %v5159_v29 }
 0x1d3   : > { %7460 = vst [vmem:[#allocation41_spill] sm:$0xff] %v5351_v15  ;;  %2388 = vperm.xlu1 %4483, %v5132_v51   ;;  %v1067_v15 = vmul.f32 %v4911_v43, %v5166_v36  ;;  %v905_v36 = vadd.f32 %v4906_v42, %v867_v53  ;;  %v906_v53 = vadd.f32 %v4906_v42, %v868_v24 }
 0x1d6   : > { %v5354_v54 = vpop.permute.xlu1 %2175 }
 0x1d7   : > { %7461 = vst [vmem:[#allocation42_spill] sm:$0xff] %v5354_v54  ;;  %4484 = vset.pattern.permute.xlu1 %v7427_v55  ;;  %v802_v52 = vpop.permute.xlu0 %801 }
 0x1d8   : > { %v863_v18 = vmul.f32 %v4896_v38, %v802_v52  ;;  %1801 = vperm.xlu1 %4484, %v5287_v12   ;;  %v902_v52 = vadd.f32 %v4906_v42, %v864_v22  ;;  %v1267_v22 = vmul.f32 %v4921_v47, %v5248_v49  ;;  %v1268_v49 = vmul.f32 %v4921_v47, %v5255_v23 }
 0x1da   : > { %v901_v54 = vadd.f32 %v4906_v42, %v863_v18  ;;  %v1099_v29 = vadd.f32 %v1067_v15, %v902_v52  ;;  %v1070_v18 = vmul.f32 %v4911_v43, %v5050_v37 }
 0x1db   : > { %v5368_v11 = vpop.permute.xlu1 %1588 }
 0x1dc   : > { %7462 = vst [vmem:[#allocation43_spill] sm:$0xff] %v5368_v11  ;;  %v1098_v61 = vadd.f32 %v1066_v33, %v901_v54  ;;  %4485 = vset.pattern.permute.xlu1 %v7428_v4  ;;  %v1296_v11 = vadd.f32 %v1264_v62, %v1099_v29  ;;  %v1071_v33 = vmul.f32 %v4911_v43, %v5234_v59 }
 0x1dd   : > { %2573 = vperm.xlu1 %4485, %v5113_v0  }
 0x1de   : > { %v1295_v32 = vadd.f32 %v1263_v9, %v1098_v61  ;;  %v1102_v61 = vadd.f32 %v1070_v18, %v905_v36  ;;  %v5392_v37 = vmax.f32 %v1296_v11, 0.0  ;;  %v1103_v15 = vadd.f32 %v1071_v33, %v906_v53 }
 0x1df   : > { %v850_v36 = vmul.f32 %v4896_v38, %v4937_v57  ;;  %v1053_v18 = vmul.f32 %v4911_v43, %v5011_v7  ;;  %v1250_v33 = vmul.f32 %v4921_v47, %v5187_v48  ;;  %v853_v7 = vmul.f32 %v4896_v38, %v4944_v60 }
 0x1e0   : > { %v5384_v5 = vmax.f32 %v1295_v32, 0.0  ;;  %v5386_v54 = vpop.permute.xlu1 %2360  ;;  %v1299_v17 = vadd.f32 %v1267_v22, %v1102_v61  ;;  %v1300_v9 = vadd.f32 %v1268_v49, %v1103_v15  ;;  %v1056_v48 = vmul.f32 %v4911_v43, %v5019_v13  ;;  %v5466_v13 = vpop.permute.xlu0 %816 }
 0x1e1   : > { %2577 = vperm.xlu1 %4485, %v5173_v28   ;;  %v888_v24 = vadd.f32 %v4906_v42, %v850_v36  ;;  %v1253_v60 = vmul.f32 %v4921_v47, %v5202_v34 }
 0x1e2   : > { %7463 = vst [vmem:[#allocation44_spill] sm:$0xff] %v5384_v5  ;;  %1463 = vperm.xlu0 %4556, %v5384_v5   ;;  %v5402_v59 = vmax.f32 %v1299_v17, 0.0  ;;  %v5409_v23 = vmax.f32 %v1300_v9, 0.0 }
 0x1e4   : > { %v5397_v62 = vpop.permute.xlu1 %2364  ;;  %7464 = vst [vmem:[#allocation45_spill] sm:$0xff] %v5402_v59  ;;  %7466 = vst [vmem:[#allocation47_spill] sm:$0xff] %v5409_v23  ;;  %v5476_v47 = vpop.permute.xlu0 %831 }
 0x1e5   : > { %4486 = vset.pattern.permute.xlu1 %v7427_v55 }
 0x1e6   : > { %1813 = vperm.xlu1 %4486, %v5313_v26   ;;  %1468 = vperm.xlu0 %4556, %v5392_v37  }
 0x1e8   : > { %v5484_v36 = vpop.permute.xlu0 %1343 }
 0x1e9   : > { %v5404_v11 = vpop.permute.xlu1 %1600 }
 0x1ea   : > { %7465 = vst [vmem:[#allocation46_spill] sm:$0xff] %v5404_v11  ;;  %4487 = vset.pattern.permute.xlu1 %v7428_v4  ;;  %1483 = vperm.xlu0 %4556, %v5402_v59  }
 0x1eb   : > { %2585 = vperm.xlu1 %4487, %v5132_v51  }
 0x1ee   : > { %v5411_v52 = vpop.permute.xlu1 %2372  ;;  %1488 = vperm.xlu0 %4556, %v5409_v23  }
 0x1ef   : > { %7467 = vst [vmem:[#allocation48_spill] sm:$0xff] %v5411_v52  ;;  %4488 = vset.pattern.permute.xlu1 %v7433_v56 }
 0x1f0   : > { %1998 = vperm.xlu1 %4488, %v5287_v12  }
 0x1f2   : > { %4560 = vset.pattern.permute.xlu0 %v7418_v45 }
 0x1f3   : > { %v5417_v29 = vpop.permute.xlu1 %1785  ;;  %1572 = vperm.xlu0 %4560, %v5056_v30  }
 0x1f4   : > { %7468 = vst [vmem:[#allocation49_spill] sm:$0xff] %v5417_v29  ;;  %4489 = vset.pattern.permute.xlu1 %v7435_v63  ;;  %v7530_v29 = vld [vmem:[#allocation7_spill] sm:$0xff] }
 0x1f5   : > { %2770 = vperm.xlu1 %4489, %v5113_v0   ;;  %v1085_v0 = vadd.f32 %v1053_v18, %v888_v24  ;;  %v5491_v24 = vpop.permute.xlu0 %1363 }
 0x1f6   : > { %7474 = vst [vmem:[#allocation55_spill] sm:$0xff] %v5491_v24 }
 0x1f7   : > { %1584 = vperm.xlu0 %4560, %v5073_v16   ;;  %v1282_v61 = vadd.f32 %v1250_v33, %v1085_v0 }
 0x1f8   : > { %v5425_v32 = vpop.permute.xlu1 %2557 }
 0x1f9   : > { %2774 = vperm.xlu1 %4489, %v5173_v28   ;;  %v5446_v53 = vmax.f32 %v1282_v61, 0.0  ;;  %v5501_v61 = vpop.permute.xlu0 %1368 }
 0x1fa   : > { %7477 = vst [vmem:[#allocation58_spill] sm:$0xff] %v5501_v61 }
 0x1fb   : > { %1592 = vperm.xlu0 %4560, %v5173_v28  }
 0x1fc   : > { %v5432_v22 = vpop.permute.xlu1 %2561 }
 0x1fd   : > { %4490 = vset.pattern.permute.xlu1 %v7433_v56 }
 0x1fe   : > { %2010 = vperm.xlu1 %4490, %v5313_v26  }
 0x1ff   : > { %1596 = vperm.xlu0 %4560, %v4965_v14  }
 0x201   : > { %v5439_v57 = vpop.permute.xlu1 %1797 }
 0x202   : > { %7469 = vst [vmem:[#allocation50_spill] sm:$0xff] %v5439_v57  ;;  %4491 = vset.pattern.permute.xlu1 %v7435_v63 }
 0x203   : > { %2782 = vperm.xlu1 %4491, %v5132_v51   ;;  %1608 = vperm.xlu0 %4560, %v5191_v31   ;;  %v891_v51 = vadd.f32 %v4906_v42, %v853_v7 }
 0x205   : > { %v1088_v38 = vadd.f32 %v1056_v48, %v891_v51  ;;  %v5509_v48 = vpop.permute.xlu0 %1383 }
 0x206   : > { %v5448_v17 = vpop.permute.xlu1 %2569  ;;  %7479 = vst [vmem:[#allocation60_spill] sm:$0xff] %v5509_v48 }
 0x207   : > { %7470 = vst [vmem:[#allocation51_spill] sm:$0xff] %v5448_v17  ;;  %4492 = vset.pattern.permute.xlu1 %v7421_v19  ;;  %1612 = vperm.xlu0 %4560, %v4998_v58   ;;  %v1285_v15 = vadd.f32 %v1253_v60, %v1088_v38 }
 0x208   : > { %1398 = vperm.xlu1 %4492, %v5446_v53  }
 0x209   : > { %v5470_v42 = vmax.f32 %v1285_v15, 0.0  ;;  %v5518_v38 = vpop.permute.xlu0 %1388 }
 0x20a   : > { %7481 = vst [vmem:[#allocation62_spill] sm:$0xff] %v5518_v38 }
 0x20b   : > { %v5456_v49 = vpop.permute.xlu1 %1982  ;;  %1624 = vperm.xlu0 %4560, %v5212_v21  }
 0x20c   : > { %7471 = vst [vmem:[#allocation52_spill] sm:$0xff] %v5456_v49  ;;  %4493 = vset.pattern.permute.xlu1 %v7423_v20 }
 0x20d   : > { %2195 = vperm.xlu1 %4493, %v5287_v12   ;;  %v5525_v15 = vpop.permute.xlu0 %1403 }
 0x20e   : > { %7483 = vst [vmem:[#allocation64_spill] sm:$0xff] %v5525_v15 }
 0x20f   : > { %1628 = vperm.xlu0 %4560, %v5038_v6  }
 0x210   : > { %v5464_v43 = vpop.permute.xlu1 %2754 }
 0x211   : > { %2199 = vperm.xlu1 %4493, %v5191_v31  }
 0x213   : > { %1640 = vperm.xlu0 %4560, %v5229_v1  }
 0x214   : > { %v5472_v9 = vpop.permute.xlu1 %2758 }
 0x215   : > { %4494 = vset.pattern.permute.xlu1 %v7421_v19 }
 0x216   : > { %1413 = vperm.xlu1 %4494, %v5470_v42  }
 0x217   : > { %1644 = vperm.xlu0 %4560, %v5092_v40  }
 0x219   : > { %v5479_v34 = vpop.permute.xlu1 %1994 }
 0x21a   : > { %7472 = vst [vmem:[#allocation53_spill] sm:$0xff] %v5479_v34  ;;  %4495 = vset.pattern.permute.xlu1 %v7423_v20 }
 0x21b   : > { %2207 = vperm.xlu1 %4495, %v5313_v26   ;;  %1656 = vperm.xlu0 %4560, %v5243_v41  }
 0x21e   : > { %v5486_v18 = vpop.permute.xlu1 %2766 }
 0x21f   : > { %7473 = vst [vmem:[#allocation54_spill] sm:$0xff] %v5486_v18  ;;  %4496 = vset.pattern.permute.xlu1 %v7418_v45  ;;  %1660 = vperm.xlu0 %4560, %v5134_v3   ;;  %v5535_v18 = vpop.permute.xlu0 %1408 }
 0x220   : > { %1620 = vperm.xlu1 %4496, %v5446_v53   ;;  %7486 = vst [vmem:[#allocation67_spill] sm:$0xff] %v5535_v18 }
 0x223   : > { %v5493_v0 = vpop.permute.xlu1 %1378  ;;  %1672 = vperm.xlu0 %4560, %v5384_v5  }
 0x224   : > { %7475 = vst [vmem:[#allocation56_spill] sm:$0xff] %v5493_v0  ;;  %4497 = vset.pattern.permute.xlu1 %v7454_v46 }
 0x225   : > { %2392 = vperm.xlu1 %4497, %v5287_v12  }
 0x227   : > { %1676 = vperm.xlu0 %4560, %v5392_v37  }
 0x228   : > { %v5499_v33 = vpop.permute.xlu1 %2179 }
 0x229   : > { %7476 = vst [vmem:[#allocation57_spill] sm:$0xff] %v5499_v33  ;;  %2396 = vperm.xlu1 %4497, %v5191_v31  }
 0x22b   : > { %1688 = vperm.xlu0 %4560, %v5402_v59  }
 0x22c   : > { %v5505_v7 = vpop.permute.xlu1 %2183 }
 0x22d   : > { %7478 = vst [vmem:[#allocation59_spill] sm:$0xff] %v5505_v7  ;;  %4498 = vset.pattern.permute.xlu1 %v7418_v45 }
 0x22e   : > { %1632 = vperm.xlu1 %4498, %v5470_v42  }
 0x22f   : > { %1692 = vperm.xlu0 %4560, %v5409_v23  }
 0x231   : > { %v5512_v51 = vpop.permute.xlu1 %1393 }
 0x232   : > { %7480 = vst [vmem:[#allocation61_spill] sm:$0xff] %v5512_v51  ;;  %4499 = vset.pattern.permute.xlu1 %v7454_v46 }
 0x233   : > { %2404 = vperm.xlu1 %4499, %v5313_v26   ;;  %4565 = vset.pattern.permute.xlu0 %v7427_v55 }
 0x234   : > { %1773 = vperm.xlu0 %4565, %v5078_v35  }
 0x236   : > { %v5520_v60 = vpop.permute.xlu1 %2191 }
 0x237   : > { %7482 = vst [vmem:[#allocation63_spill] sm:$0xff] %v5520_v60  ;;  %4500 = vset.pattern.permute.xlu1 %v7427_v55 }
 0x238   : > { %1817 = vperm.xlu1 %4500, %v5446_v53   ;;  %1789 = vperm.xlu0 %4565, %v5173_v28  }
 0x23b   : > { %v5527_v7 = vpop.permute.xlu1 %1604 }
 0x23c   : > { %7484 = vst [vmem:[#allocation65_spill] sm:$0xff] %v5527_v7  ;;  %4501 = vset.pattern.permute.xlu1 %v7428_v4  ;;  %1793 = vperm.xlu0 %4565, %v4965_v14   ;;  %v5543_v7 = vpop.permute.xlu0 %1423 }
 0x23d   : > { %2589 = vperm.xlu1 %4501, %v5287_v12  }
 0x240   : > { %v5532_v35 = vpop.permute.xlu1 %2376  ;;  %1805 = vperm.xlu0 %4565, %v5191_v31   ;;  %v5551_v51 = vpop.permute.xlu0 %1428 }
 0x241   : > { %7485 = vst [vmem:[#allocation66_spill] sm:$0xff] %v5532_v35  ;;  %2593 = vperm.xlu1 %4501, %v5191_v31  }
 0x244   : > { %v5538_v17 = vpop.permute.xlu1 %2380  ;;  %1809 = vperm.xlu0 %4565, %v4998_v58   ;;  %v5558_v52 = vpop.permute.xlu0 %1443 }
 0x245   : > { %7487 = vst [vmem:[#allocation68_spill] sm:$0xff] %v5538_v17  ;;  %4502 = vset.pattern.permute.xlu1 %v7427_v55 }
 0x246   : > { %1829 = vperm.xlu1 %4502, %v5470_v42  }
 0x248   : > { %1821 = vperm.xlu0 %4565, %v5212_v21   ;;  %v5575_v34 = vpop.permute.xlu0 %1448 }
 0x249   : > { %v5546_v60 = vpop.permute.xlu1 %1616 }
 0x24a   : > { %7488 = vst [vmem:[#allocation69_spill] sm:$0xff] %v5546_v60  ;;  %4503 = vset.pattern.permute.xlu1 %v7428_v4 }
 0x24b   : > { %2601 = vperm.xlu1 %4503, %v5313_v26  }
 0x24c   : > { %1825 = vperm.xlu0 %4565, %v5038_v6  }
 0x24e   : > { %v5553_v17 = vpop.permute.xlu1 %2388 }
 0x24f   : > { %7489 = vst [vmem:[#allocation70_spill] sm:$0xff] %v5553_v17  ;;  %4504 = vset.pattern.permute.xlu1 %v7433_v56  ;;  %v5568_v17 = vld [vmem:[%s7411_s28] ss:$0 sm:$0xff] }
 0x250   : > { %2014 = vperm.xlu1 %4504, %v5446_v53   ;;  %1837 = vperm.xlu0 %4565, %v5229_v1   ;;  %v854_v60 = vmul.f32 %v5568_v17, %v5041_v10 }
 0x253   : > { %v5560_v35 = vpop.permute.xlu1 %1801 }
 0x254   : > { %7490 = vst [vmem:[#allocation71_spill] sm:$0xff] %v5560_v35  ;;  %4505 = vset.pattern.permute.xlu1 %v7435_v63  ;;  %1841 = vperm.xlu0 %4565, %v5092_v40  }
 0x255   : > { %2786 = vperm.xlu1 %4505, %v5287_v12   ;;  %v5581_v12 = vld [vmem:[%s7412_s30] ss:$0 sm:$0xff] }
 0x256   : > { %7492 = vst [vmem:[#allocation73_spill] sm:$0xff] %v5581_v12  ;;  %v892_v35 = vadd.f32 %v5581_v12, %v854_v60  ;;  %v5600_v60 = vld [vmem:[%s7411_s28 + $0x2] ss:$0 sm:$0xff] }
 0x258   : > { %v5572_v0 = vpop.permute.xlu1 %2573  ;;  %1853 = vperm.xlu0 %4565, %v5243_v41  }
 0x259   : > { %7491 = vst [vmem:[#allocation72_spill] sm:$0xff] %v5572_v0  ;;  %2790 = vperm.xlu1 %4505, %v5191_v31   ;;  %v5593_v0 = vld [vmem:[%s7411_s28 + $0x1] ss:$0 sm:$0xff] }
 0x25a   : > { %7494 = vst [vmem:[#allocation75_spill] sm:$0xff] %v5593_v0  ;;  %v1057_v15 = vmul.f32 %v5593_v0, %v5006_v2 }
 0x25c   : > { %v5584_v18 = vpop.permute.xlu1 %2577  ;;  %1857 = vperm.xlu0 %4565, %v5134_v3   ;;  %v1089_v38 = vadd.f32 %v1057_v15, %v892_v35  ;;  %v1060_v35 = vmul.f32 %v5593_v0, %v5013_v8 }
 0x25d   : > { %7493 = vst [vmem:[#allocation74_spill] sm:$0xff] %v5584_v18  ;;  %4506 = vset.pattern.permute.xlu1 %v7433_v56  ;;  %v5588_v10 = vpop.permute.xlu0 %1463  ;;  %v1254_v18 = vmul.f32 %v5600_v60, %v5082_v44  ;;  %v857_v44 = vmul.f32 %v5568_v17, %v5060_v39  ;;  %v1257_v39 = vmul.f32 %v5600_v60, %v5089_v25 }
 0x25e   : > { %2026 = vperm.xlu1 %4506, %v5470_v42  }
 0x25f   : > { %v1286_v57 = vadd.f32 %v1254_v18, %v1089_v38 }
 0x260   : > { %1869 = vperm.xlu0 %4565, %v5384_v5  }
 0x261   : > { %v5606_v48 = vpop.permute.xlu1 %1813  ;;  %v5608_v33 = vpop.permute.xlu0 %1468  ;;  %v5617_v61 = vmax.f32 %v1286_v57, 0.0 }
 0x262   : > { %7495 = vst [vmem:[#allocation76_spill] sm:$0xff] %v5606_v48  ;;  %4507 = vset.pattern.permute.xlu1 %v7435_v63 }
 0x263   : > { %2798 = vperm.xlu1 %4507, %v5313_v26   ;;  %v895_v26 = vadd.f32 %v5581_v12, %v857_v44 }
 0x264   : > { %1873 = vperm.xlu0 %4565, %v5392_v37  }
 0x265   : > { %v5613_v2 = vpop.permute.xlu0 %1483  ;;  %v1092_v57 = vadd.f32 %v1060_v35, %v895_v26 }
 0x266   : > { %7496 = vst [vmem:[#allocation77_spill] sm:$0xff] %v5613_v2  ;;  %v5619_v15 = vpop.permute.xlu1 %2585 }
 0x267   : > { %7497 = vst [vmem:[#allocation78_spill] sm:$0xff] %v5619_v15  ;;  %4508 = vset.pattern.permute.xlu1 %v7421_v19  ;;  %v1289_v48 = vadd.f32 %v1257_v39, %v1092_v57 }
 0x268   : > { %1418 = vperm.xlu1 %4508, %v5617_v61   ;;  %1885 = vperm.xlu0 %4565, %v5402_v59  }
 0x269   : > { %v5624_v18 = vpop.permute.xlu0 %1488  ;;  %v5645_v25 = vmax.f32 %v1289_v48, 0.0 }
 0x26a   : > { %7498 = vst [vmem:[#allocation79_spill] sm:$0xff] %v5624_v18 }
 0x26b   : > { %v5627_v38 = vpop.permute.xlu1 %1998 }
 0x26c   : > { %7499 = vst [vmem:[#allocation80_spill] sm:$0xff] %v5627_v38  ;;  %4509 = vset.pattern.permute.xlu1 %v7423_v20  ;;  %1889 = vperm.xlu0 %4565, %v5409_v23  }
 0x26d   : > { %2211 = vperm.xlu1 %4509, %v5446_v53  }
 0x26e   : > { %v5636_v15 = vpop.permute.xlu0 %1572 }
 0x270   : > { %v5638_v49 = vpop.permute.xlu1 %2770  ;;  %4570 = vset.pattern.permute.xlu0 %v7433_v56 }
 0x271   : > { %7500 = vst [vmem:[#allocation81_spill] sm:$0xff] %v5638_v49  ;;  %2215 = vperm.xlu1 %4509, %v5212_v21   ;;  %1966 = vperm.xlu0 %4570, %v5056_v30  }
 0x272   : > { %v5643_v8 = vpop.permute.xlu0 %1584 }
 0x273   : > { %7501 = vst [vmem:[#allocation82_spill] sm:$0xff] %v5643_v8 }
 0x274   : > { %v5647_v44 = vpop.permute.xlu1 %2774 }
 0x275   : > { %7502 = vst [vmem:[#allocation83_spill] sm:$0xff] %v5647_v44  ;;  %4510 = vset.pattern.permute.xlu1 %v7421_v19  ;;  %1978 = vperm.xlu0 %4570, %v5073_v16  }
 0x276   : > { %1433 = vperm.xlu1 %4510, %v5645_v25   ;;  %v5652_v26 = vpop.permute.xlu0 %1592 }
 0x277   : > { %7503 = vst [vmem:[#allocation84_spill] sm:$0xff] %v5652_v26 }
 0x279   : > { %v5654_v35 = vpop.permute.xlu1 %2010  ;;  %1986 = vperm.xlu0 %4570, %v5173_v28  }
 0x27a   : > { %7504 = vst [vmem:[#allocation85_spill] sm:$0xff] %v5654_v35  ;;  %4511 = vset.pattern.permute.xlu1 %v7423_v20  ;;  %v5658_v30 = vpop.permute.xlu0 %1596 }
 0x27b   : > { %7505 = vst [vmem:[#allocation86_spill] sm:$0xff] %v5658_v30  ;;  %2223 = vperm.xlu1 %4511, %v5470_v42  }
 0x27d   : > { %1990 = vperm.xlu0 %4570, %v4965_v14  }
 0x27e   : > { %v5662_v48 = vpop.permute.xlu1 %2782  ;;  %v5664_v39 = vpop.permute.xlu0 %1608 }
 0x27f   : > { %7506 = vst [vmem:[#allocation87_spill] sm:$0xff] %v5662_v48  ;;  %7507 = vst [vmem:[#allocation88_spill] sm:$0xff] %v5664_v39  ;;  %4512 = vset.pattern.permute.xlu1 %v7418_v45 }
 0x280   : > { %1636 = vperm.xlu1 %4512, %v5617_v61  }
 0x281   : > { %2002 = vperm.xlu0 %4570, %v5191_v31  }
 0x282   : > { %v5669_v16 = vpop.permute.xlu0 %1612 }
 0x283   : > { %7508 = vst [vmem:[#allocation89_spill] sm:$0xff] %v5669_v16  ;;  %v5671_v28 = vpop.permute.xlu1 %1398 }
 0x284   : > { %7509 = vst [vmem:[#allocation90_spill] sm:$0xff] %v5671_v28  ;;  %4513 = vset.pattern.permute.xlu1 %v7454_v46 }
 0x285   : > { %2408 = vperm.xlu1 %4513, %v5446_v53   ;;  %2006 = vperm.xlu0 %4570, %v4998_v58  }
 0x286   : > { %v5676_v57 = vpop.permute.xlu0 %1624 }
 0x287   : > { %7510 = vst [vmem:[#allocation91_spill] sm:$0xff] %v5676_v57 }
 0x288   : > { %v5678_v44 = vpop.permute.xlu1 %2195 }
 0x289   : > { %7511 = vst [vmem:[#allocation92_spill] sm:$0xff] %v5678_v44  ;;  %2412 = vperm.xlu1 %4513, %v5212_v21   ;;  %2018 = vperm.xlu0 %4570, %v5212_v21  }
 0x28a   : > { %v5682_v39 = vpop.permute.xlu0 %1628 }
 0x28b   : > { %7512 = vst [vmem:[#allocation93_spill] sm:$0xff] %v5682_v39 }
 0x28c   : > { %v5684_v31 = vpop.permute.xlu1 %2199 }
 0x28d   : > { %7513 = vst [vmem:[#allocation94_spill] sm:$0xff] %v5684_v31  ;;  %4514 = vset.pattern.permute.xlu1 %v7418_v45  ;;  %2022 = vperm.xlu0 %4570, %v5038_v6  }
 0x28e   : > { %1648 = vperm.xlu1 %4514, %v5645_v25   ;;  %v5689_v28 = vpop.permute.xlu0 %1640 }
 0x291   : > { %v5691_v16 = vpop.permute.xlu1 %1413  ;;  %2034 = vperm.xlu0 %4570, %v5229_v1  }
 0x292   : > { %7514 = vst [vmem:[#allocation95_spill] sm:$0xff] %v5691_v16  ;;  %4515 = vset.pattern.permute.xlu1 %v7454_v46  ;;  %v5695_v44 = vpop.permute.xlu0 %1644 }
 0x293   : > { %2420 = vperm.xlu1 %4515, %v5470_v42  }
 0x295   : > { %2038 = vperm.xlu0 %4570, %v5092_v40  }
 0x296   : > { %v5699_v31 = vpop.permute.xlu1 %2207  ;;  %v5701_v39 = vpop.permute.xlu0 %1656 }
 0x297   : > { %7515 = vst [vmem:[#allocation96_spill] sm:$0xff] %v5699_v31  ;;  %4516 = vset.pattern.permute.xlu1 %v7427_v55 }
 0x298   : > { %1833 = vperm.xlu1 %4516, %v5617_v61  }
 0x299   : > { %2050 = vperm.xlu0 %4570, %v5243_v41  }
 0x29a   : > { %v5706_v16 = vpop.permute.xlu0 %1660 }
 0x29b   : > { %v5708_v57 = vpop.permute.xlu1 %1620 }
 0x29c   : > { %7516 = vst [vmem:[#allocation97_spill] sm:$0xff] %v5708_v57  ;;  %4517 = vset.pattern.permute.xlu1 %v7428_v4 }
 0x29d   : > { %2605 = vperm.xlu1 %4517, %v5446_v53   ;;  %2054 = vperm.xlu0 %4570, %v5134_v3  }
 0x29e   : > { %v5713_v30 = vpop.permute.xlu0 %1672 }
 0x2a0   : > { %v5715_v31 = vpop.permute.xlu1 %2392 }
 0x2a1   : > { %7517 = vst [vmem:[#allocation98_spill] sm:$0xff] %v5715_v31  ;;  %2609 = vperm.xlu1 %4517, %v5212_v21   ;;  %2066 = vperm.xlu0 %4570, %v5384_v5  }
 0x2a2   : > { %v5719_v35 = vpop.permute.xlu0 %1676 }
 0x2a3   : > { %7518 = vst [vmem:[#allocation99_spill] sm:$0xff] %v5719_v35 }
 0x2a4   : > { %v5721_v48 = vpop.permute.xlu1 %2396 }
 0x2a5   : > { %7519 = vst [vmem:[#allocation100_spill] sm:$0xff] %v5721_v48  ;;  %4518 = vset.pattern.permute.xlu1 %v7427_v55  ;;  %2070 = vperm.xlu0 %4570, %v5392_v37  }
 0x2a6   : > { %1845 = vperm.xlu1 %4518, %v5645_v25   ;;  %v5726_v57 = vpop.permute.xlu0 %1688 }
 0x2a7   : > { %7520 = vst [vmem:[#allocation101_spill] sm:$0xff] %v5726_v57 }
 0x2a9   : > { %v5728_v26 = vpop.permute.xlu1 %1632  ;;  %2082 = vperm.xlu0 %4570, %v5402_v59  }
 0x2aa   : > { %7521 = vst [vmem:[#allocation102_spill] sm:$0xff] %v5728_v26  ;;  %4520 = vset.pattern.permute.xlu1 %v7428_v4  ;;  %v5732_v31 = vpop.permute.xlu0 %1692  ;;  %v7524_v26 = vld [vmem:[#allocation2_spill] sm:$0xff] }
 0x2ab   : > { %7522 = vst [vmem:[#allocation103_spill] sm:$0xff] %v5732_v31  ;;  %2617 = vperm.xlu1 %4520, %v5470_v42   ;;  %v7548_v31 = vld [vmem:[#allocation13_spill] sm:$0xff] }
 0x2ac   : > { %v1069_v18 = vmul.f32 %v5593_v0, %v7548_v31 }
 0x2ad   : > { %2086 = vperm.xlu0 %4570, %v5409_v23  }
 0x2ae   : > { %v5736_v5 = vpop.permute.xlu1 %2404 }
 0x2af   : > { %7523 = vst [vmem:[#allocation104_spill] sm:$0xff] %v5736_v5  ;;  %4521 = vset.pattern.permute.xlu1 %v7433_v56  ;;  %v5739_v48 = vpop.permute.xlu0 %1773  ;;  %v7528_v5 = vld [vmem:[#allocation3_spill] sm:$0xff] }
 0x2b0   : > { %2030 = vperm.xlu1 %4521, %v5617_v61   ;;  %v858_v49 = vmul.f32 %v5568_v17, %v7528_v5 }
 0x2b1   : > { %4575 = vset.pattern.permute.xlu0 %v7423_v20 }
 0x2b2   : > { %2171 = vperm.xlu0 %4575, %v7524_v26  }
 0x2b3   : > { %v5744_v38 = vpop.permute.xlu1 %1817  ;;  %v5746_v8 = vpop.permute.xlu0 %1789 }
 0x2b4   : > { %7525 = vst [vmem:[#allocation2_spill] sm:$0xff] %v5744_v38  ;;  %7526 = vst [vmem:[#allocation105_spill] sm:$0xff] %v5746_v8  ;;  %4522 = vset.pattern.permute.xlu1 %v7435_v63  ;;  %v1061_v38 = vmul.f32 %v5593_v0, %v7530_v29 }
 0x2b5   : > { %2802 = vperm.xlu1 %4522, %v5446_v53   ;;  %v896_v53 = vadd.f32 %v5581_v12, %v858_v49 }
 0x2b6   : > { %2187 = vperm.xlu0 %4575, %v4965_v14  }
 0x2b7   : > { %v5751_v23 = vpop.permute.xlu0 %1793 }
 0x2b8   : > { %7527 = vst [vmem:[#allocation106_spill] sm:$0xff] %v5751_v23  ;;  %v5755_v41 = vpop.permute.xlu1 %2589  ;;  %v1093_v23 = vadd.f32 %v1061_v38, %v896_v53  ;;  %v7537_v38 = vld [vmem:[#allocation4_spill] sm:$0xff] }
 0x2b9   : > { %7529 = vst [vmem:[#allocation3_spill] sm:$0xff] %v5755_v41  ;;  %2806 = vperm.xlu1 %4522, %v5212_v21   ;;  %v7534_v21 = vld [vmem:[#allocation15_spill] sm:$0xff]  ;;  %v861_v53 = vmul.f32 %v5568_v17, %v7537_v38 }
 0x2ba   : > { %2203 = vperm.xlu0 %4575, %v4998_v58   ;;  %v1258_v29 = vmul.f32 %v5600_v60, %v7534_v21  ;;  %v7540_v21 = vld [vmem:[#allocation8_spill] sm:$0xff] }
 0x2bb   : > { %v5761_v8 = vpop.permute.xlu0 %1805 }
 0x2bc   : > { %7531 = vst [vmem:[#allocation7_spill] sm:$0xff] %v5761_v8  ;;  %v5764_v11 = vpop.permute.xlu1 %2593  ;;  %v1290_v24 = vadd.f32 %v1258_v29, %v1093_v23  ;;  %v1064_v29 = vmul.f32 %v5593_v0, %v7540_v21 }
 0x2bd   : > { %7532 = vst [vmem:[#allocation107_spill] sm:$0xff] %v5764_v11  ;;  %4523 = vset.pattern.permute.xlu1 %v7433_v56 }
 0x2be   : > { %2042 = vperm.xlu1 %4523, %v5645_v25   ;;  %2219 = vperm.xlu0 %4575, %v5038_v6   ;;  %v5782_v11 = vmax.f32 %v1290_v24, 0.0 }
 0x2bf   : > { %v5769_v5 = vpop.permute.xlu0 %1809 }
 0x2c0   : > { %7533 = vst [vmem:[#allocation108_spill] sm:$0xff] %v5769_v5 }
 0x2c1   : > { %v5773_v41 = vpop.permute.xlu1 %1829 }
 0x2c2   : > { %7535 = vst [vmem:[#allocation15_spill] sm:$0xff] %v5773_v41  ;;  %4524 = vset.pattern.permute.xlu1 %v7435_v63  ;;  %2235 = vperm.xlu0 %4575, %v5092_v40  }
 0x2c3   : > { %2814 = vperm.xlu1 %4524, %v5470_v42   ;;  %v5778_v49 = vpop.permute.xlu0 %1821  ;;  %v899_v42 = vadd.f32 %v5581_v12, %v861_v53 }
 0x2c4   : > { %7536 = vst [vmem:[#allocation109_spill] sm:$0xff] %v5778_v49  ;;  %v7542_v49 = vld [vmem:[#allocation17_spill] sm:$0xff] }
 0x2c6   : > { %v5784_v5 = vpop.permute.xlu1 %2601  ;;  %2251 = vperm.xlu0 %4575, %v5134_v3  }
 0x2c7   : > { %7538 = vst [vmem:[#allocation4_spill] sm:$0xff] %v5784_v5  ;;  %4525 = vset.pattern.permute.xlu1 %v7421_v19  ;;  %v5788_v23 = vpop.permute.xlu0 %1825  ;;  %v1096_v5 = vadd.f32 %v1064_v29, %v899_v42  ;;  %v4587_v42 = vld [vmem:[%s7335_s9] sm:$0xff]  }
 0x2c8   : > { %7539 = vst [vmem:[#allocation110_spill] sm:$0xff] %v5788_v23  ;;  %1438 = vperm.xlu1 %4525, %v5782_v11   ;;  %v1261_v23 = vmul.f32 %v5600_v60, %v7542_v49  ;;  %v4586_v49 = vld [vmem:[%s7333_s7 + $0x8] sm:$0xff]  }
 0x2c9   : > { %4294 = vmatprep.subr.bf16.mxu0 %v4586_v49 }
 0x2ca   : > { %2267 = vperm.xlu0 %4575, %v5392_v37   ;;  %v1293_v41 = vadd.f32 %v1261_v23, %v1096_v5  ;;  %4295 = vmatpush3.bf16.msra.mxu0 %v4586_v49 }
 0x2cb   : > { %v5795_v38 = vpop.permute.xlu1 %2014  ;;  %v5797_v24 = vpop.permute.xlu0 %1837 }
 0x2cc   : > { %7541 = vst [vmem:[#allocation8_spill] sm:$0xff] %v5795_v38  ;;  %4526 = vset.pattern.permute.xlu1 %v7423_v20  ;;  %v4585_v38 = vld [vmem:[%s7335_s9 + $0x8] sm:$0xff]   ;;  %v5819_v5 = vmax.f32 %v1293_v41, 0.0  ;;  %v5834_v41 = vld [vmem:[%s7331_s5] ss:$0 sm:$0xff] }
 0x2cd   : > { %2227 = vperm.xlu1 %4526, %v5617_v61   ;;  %4330 = vmatprep.subr.bf16.mxu1 %v4585_v38  ;;  %v1501_v49 = vmul.f32 %v5834_v41, %v5484_v36 }
 0x2ce   : > { %2279 = vperm.xlu0 %4575, %v5402_v59   ;;  %4331 = vmatpush3.bf16.msra.mxu1 %v4585_v38 }
 0x2cf   : > { %v5804_v21 = vpop.permute.xlu0 %1841  ;;  %4332 = vmatprep.subr.bf16.mxu1 %v4587_v42 }
 0x2d0   : > { %v5806_v53 = vpop.permute.xlu1 %2786 }
 0x2d1   : > { %7543 = vst [vmem:[#allocation17_spill] sm:$0xff] %v5806_v53  ;;  %2231 = vperm.xlu1 %4526, %v5229_v1   ;;  %v5847_v53 = vld [vmem:[%s7332_s6] ss:$0 sm:$0xff] }
 0x2d2   : > { %4579 = vset.pattern.permute.xlu0 %v7454_v46  ;;  %4333 = vmatpush3.bf16.msra.mxu1 %v4587_v42  ;;  %v1539_v42 = vadd.f32 %v5847_v53, %v1501_v49 }
 0x2d3   : > { %2368 = vperm.xlu0 %4579, %v7524_v26   ;;  %v5817_v29 = vpop.permute.xlu0 %1853  ;;  %v4588_v26 = vld [vmem:[%s7333_s7] sm:$0xff]  }
 0x2d4   : > { %v5821_v23 = vpop.permute.xlu1 %2790  ;;  %4296 = vmatprep.subr.bf16.mxu0 %v4588_v26 }
 0x2d5   : > { %7544 = vst [vmem:[#allocation111_spill] sm:$0xff] %v5821_v23  ;;  %4527 = vset.pattern.permute.xlu1 %v7421_v19  ;;  %4297 = vmatpush3.bf16.msra.mxu0 %v4588_v26  ;;  %v5862_v26 = vld [vmem:[%s7331_s5 + $0x2] ss:$0 sm:$0xff] }
 0x2d6   : > { %1453 = vperm.xlu1 %4527, %v5819_v5  }
 0x2d7   : > { %2384 = vperm.xlu0 %4579, %v4965_v14   ;;  %v5837_v38 = vpop.permute.xlu0 %1857  ;;  %v5852_v14 = vld [vmem:[%s7331_s5 + $0x1] ss:$0 sm:$0xff] }
 0x2d8   : > { %v1704_v8 = vmul.f32 %v5852_v14, %v5283_v27 }
 0x2d9   : > { %v5841_v23 = vpop.permute.xlu1 %2026 }
 0x2da   : > { %7545 = vst [vmem:[#allocation112_spill] sm:$0xff] %v5841_v23  ;;  %4528 = vset.pattern.permute.xlu1 %v7423_v20  ;;  %v866_v23 = vmul.f32 %v5568_v17, %v5466_v13  ;;  %v1901_v20 = vmul.f32 %v5862_v26, %v5739_v48  ;;  %v1736_v49 = vadd.f32 %v1704_v8, %v1539_v42  ;;  %v5880_v13 = vld [vmem:[%s7331_s5 + $0x3] ss:$0 sm:$0xff] }
 0x2db   : > { %2239 = vperm.xlu1 %4528, %v5645_v25   ;;  %2400 = vperm.xlu0 %4579, %v4998_v58   ;;  %v5856_v36 = vpop.permute.xlu0 %1869  ;;  %v869_v48 = vmul.f32 %v5568_v17, %v5476_v47  ;;  %v1703_v47 = vmul.f32 %v5852_v14, %v5636_v15  ;;  %v7555_v15 = vld [vmem:[#allocation38_spill] sm:$0xff] }
 0x2dc   : > { %v904_v27 = vadd.f32 %v5581_v12, %v866_v23 }
 0x2de   : > { %v5870_v19 = vpop.permute.xlu1 %2798  ;;  %v1101_v23 = vadd.f32 %v1069_v18, %v904_v27 }
 0x2df   : > { %7546 = vst [vmem:[#allocation113_spill] sm:$0xff] %v5870_v19  ;;  %4529 = vset.pattern.permute.xlu1 %v7418_v45  ;;  %2416 = vperm.xlu0 %4579, %v5038_v6   ;;  %v5874_v58 = vpop.permute.xlu0 %1873  ;;  %v1933_v19 = vadd.f32 %v1901_v20, %v1736_v49  ;;  %v7549_v6 = vld [vmem:[#allocation18_spill] sm:$0xff]  ;;  %v907_v20 = vadd.f32 %v5581_v12, %v869_v48  ;;  %v7552_v49 = vld [vmem:[#allocation20_spill] sm:$0xff] }
 0x2e0   : > { %7547 = vst [vmem:[#allocation114_spill] sm:$0xff] %v5874_v58  ;;  %1652 = vperm.xlu1 %4529, %v5782_v11   ;;  %v1500_v57 = vmul.f32 %v5834_v41, %v7549_v6  ;;  %v2098_v58 = vmul.f32 %v5880_v13, %v5321_v50  ;;  %v1266_v6 = vmul.f32 %v5600_v60, %v7552_v49  ;;  %v5909_v50 = vld [vmem:[%s7331_s5 + $0x4] ss:$0 sm:$0xff] }
 0x2e1   : > { %v7558_v12 = vld [vmem:[#allocation26_spill] sm:$0xff] }
 0x2e2   : > { %v2130_v31 = vadd.f32 %v2098_v58, %v1933_v19  ;;  %v1538_v2 = vadd.f32 %v5847_v53, %v1500_v57  ;;  %v2295_v19 = vmul.f32 %v5909_v50, %v7555_v15  ;;  %v1298_v27 = vadd.f32 %v1266_v6, %v1101_v23  ;;  %v5941_v15 = vld [vmem:[%s7331_s5 + $0x6] ss:$0 sm:$0xff] }
 0x2e3   : > { %v5889_v8 = vpop.permute.xlu1 %1418  ;;  %2432 = vperm.xlu0 %4579, %v5092_v40   ;;  %v5892_v42 = vpop.permute.xlu0 %1885  ;;  %v1900_v35 = vmul.f32 %v5862_v26, %v7558_v12 }
 0x2e4   : > { %7550 = vst [vmem:[#allocation13_spill] sm:$0xff] %v5889_v8  ;;  %7551 = vst [vmem:[#allocation18_spill] sm:$0xff] %v5892_v42  ;;  %4530 = vset.pattern.permute.xlu1 %v7454_v46  ;;  %v7553_v8 = vld [vmem:[#allocation14_spill] sm:$0xff]  ;;  %v1735_v49 = vadd.f32 %v1703_v47, %v1538_v2  ;;  %v2327_v57 = vadd.f32 %v2295_v19, %v2130_v31 }
 0x2e5   : > { %2424 = vperm.xlu1 %4530, %v5617_v61   ;;  %v1072_v42 = vmul.f32 %v5593_v0, %v7553_v8  ;;  %v7557_v8 = vld [vmem:[#allocation22_spill] sm:$0xff] }
 0x2e6   : > { %v1269_v0 = vmul.f32 %v5600_v60, %v7557_v8  ;;  %v1932_v31 = vadd.f32 %v1900_v35, %v1735_v49 }
 0x2e7   : > { %2448 = vperm.xlu0 %4579, %v5134_v3   ;;  %v5912_v18 = vpop.permute.xlu0 %1889  ;;  %v1104_v48 = vadd.f32 %v1072_v42, %v907_v20  ;;  %v5933_v20 = vmax.f32 %v1298_v27, 0.0 }
 0x2e8   : > { %7554 = vst [vmem:[#allocation20_spill] sm:$0xff] %v5912_v18  ;;  %v5916_v58 = vpop.permute.xlu1 %2211  ;;  %v5926_v18 = vld [vmem:[%s7331_s5 + $0x5] ss:$0 sm:$0xff] }
 0x2e9   : > { %7556 = vst [vmem:[#allocation14_spill] sm:$0xff] %v5916_v58  ;;  %2428 = vperm.xlu1 %4530, %v5229_v1   ;;  %v2492_v42 = vmul.f32 %v5926_v18, %v5397_v62  ;;  %7560 = vst [vmem:[#allocation22_spill] sm:$0xff] %v5933_v20  ;;  %v1301_v47 = vadd.f32 %v1269_v0, %v1104_v48  ;;  %v7561_v62 = vld [vmem:[#allocation36_spill] sm:$0xff]  ;;  %v2689_v0 = vmul.f32 %v5941_v15, %v5432_v22 }
 0x2ea   : > { %v2294_v19 = vmul.f32 %v5909_v50, %v7561_v62  ;;  %v2491_v48 = vmul.f32 %v5926_v18, %v5386_v54  ;;  %v2688_v22 = vmul.f32 %v5941_v15, %v5425_v32  ;;  %v2949_v32 = vld [vmem:[%s7565_s26] sm:$0xff]  ;;  %v7644_v58 = vld [vmem:[#allocation72_spill] sm:$0xff] }
 0x2eb   : > { %2464 = vperm.xlu0 %4579, %v5392_v37   ;;  %v2524_v12 = vadd.f32 %v2492_v42, %v2327_v57  ;;  %v5950_v27 = vmax.f32 %v1301_v47, 0.0 }
 0x2ec   : > { %v5931_v2 = vpop.permute.xlu1 %2215  ;;  %v1967_v23 = vpop.permute.xlu0 %1966 }
 0x2ed   : > { %7559 = vst [vmem:[#allocation38_spill] sm:$0xff] %v5931_v2  ;;  %v2097_v6 = vmul.f32 %v5880_v13, %v1967_v23  ;;  %4531 = vset.pattern.permute.xlu1 %v7418_v45  ;;  %7562 = vst [vmem:[#allocation26_spill] sm:$0xff] %v5950_v27  ;;  %v2721_v42 = vadd.f32 %v2689_v0, %v2524_v12  ;;  %v5960_v23 = vld [vmem:[%s7331_s5 + $0x7] ss:$0 sm:$0xff]  ;;  %v7643_v2 = vld [vmem:[#allocation65_spill] sm:$0xff] }
 0x2ee   : > { %1664 = vperm.xlu1 %4531, %v5819_v5   ;;  %v2886_v54 = vmul.f32 %v5960_v23, %v5472_v9  ;;  %v2885_v12 = vmul.f32 %v5960_v23, %v5464_v43  ;;  %v2950_v9 = vld [vmem:[%s7565_s26 + $0x8] sm:$0xff] }
 0x2ef   : > { %v2129_v8 = vadd.f32 %v2097_v6, %v1932_v31  ;;  %2472 = vperm.xlu0 %4579, %v5933_v20  }
 0x2f0   : > { %v5948_v35 = vpop.permute.xlu0 %1978 }
 0x2f1   : > { %v2326_v49 = vadd.f32 %v2294_v19, %v2129_v8  ;;  %v5954_v57 = vpop.permute.xlu1 %1433  ;;  %v2918_v19 = vadd.f32 %v2886_v54, %v2721_v42 }
 0x2f2   : > { %7563 = vst [vmem:[#allocation36_spill] sm:$0xff] %v5954_v57  ;;  %4532 = vset.pattern.permute.xlu1 %v7454_v46  ;;  %v7591_v57 = vld [vmem:[#allocation18_spill] sm:$0xff] }
 0x2f3   : > { %v2523_v31 = vadd.f32 %v2491_v48, %v2326_v49  ;;  %2436 = vperm.xlu1 %4532, %v5645_v25   ;;  %2484 = vperm.xlu0 %4579, %v5950_v27   ;;  %v2982_v49 = vadd.f32 %v2950_v9, %v2918_v19 }
 0x2f4   : > { %v5968_v47 = vpop.permute.xlu0 %1986 }
 0x2f5   : > { %v2720_v6 = vadd.f32 %v2688_v22, %v2523_v31 }
 0x2f6   : > { %v5972_v62 = vpop.permute.xlu1 %2223 }
 0x2f7   : > { %7564 = vst [vmem:[#allocation115_spill] sm:$0xff] %v5972_v62  ;;  %4533 = vset.pattern.permute.xlu1 %v7427_v55  ;;  %4581 = vset.pattern.permute.xlu0 %v7428_v4  ;;  %v2917_v8 = vadd.f32 %v2885_v12, %v2720_v6 }
 0x2f8   : > { %1849 = vperm.xlu1 %4533, %v5782_v11   ;;  %2629 = vperm.xlu0 %4581, %v5092_v40   ;;  %v5984_v43 = vpop.permute.xlu0 %1990 }
 0x2f9   : > { %v3278_v0 = vpack.c.bf16 %v2918_v19, %v2917_v8  ;;  %v2981_v48 = vadd.f32 %v2949_v32, %v2917_v8  ;;  %v1517_v19 = vmul.f32 %v5834_v41, %v5543_v7  ;;  %v1518_v8 = vmul.f32 %v5834_v41, %v5551_v51 }
 0x2fa   : > { %v1521_v51 = vmul.f32 %v5834_v41, %v5558_v52 }
 0x2fb   : > { %v5986_v42 = vpop.permute.xlu1 %1636  ;;  %4334 = vmatprep.mubr.msk.bf16.mxu1 %vm3052_vm0, %v3278_v0  ;;  %v3013_v31 = vpack.c.bf16 %v2982_v49, %v2981_v48  ;;  %v1555_v9 = vadd.f32 %v5847_v53, %v1517_v19  ;;  %v1917_v0 = vmul.f32 %v5862_v26, %v5797_v24  ;;  %v1556_v24 = vadd.f32 %v5847_v53, %v1518_v8 }
 0x2fc   : > { %7566 = vst [vmem:[#allocation116_spill] sm:$0xff] %v5986_v42  ;;  %4534 = vset.pattern.permute.xlu1 %v7428_v4  ;;  %v5990_v22 = vpop.permute.xlu0 %2002  ;;  %2645 = vperm.xlu0 %4581, %v5134_v3   ;;  %v1720_v3 = vmul.f32 %v5852_v14, %v5689_v28  ;;  %v1721_v28 = vmul.f32 %v5852_v14, %v5695_v44  ;;  %v7618_v42 = vld [vmem:[#allocation46_spill] sm:$0xff] }
 0x2fd   : > { %2621 = vperm.xlu1 %4534, %v5617_v61   ;;  %4298 = vmatprep.mubr.msk.bf16.mxu0 %vm3052_vm0, %v3013_v31  ;;  %v1918_v19 = vmul.f32 %v5862_v26, %v5804_v21  ;;  %v1724_v44 = vmul.f32 %v5852_v14, %v5701_v39  ;;  %v1559_v52 = vadd.f32 %v5847_v53, %v1521_v51 }
 0x2fe   : > { %v1752_v48 = vadd.f32 %v1720_v3, %v1555_v9  ;;  %v1753_v9 = vadd.f32 %v1721_v28, %v1556_v24  ;;  %v1522_v21 = vmul.f32 %v5834_v41, %v5575_v34 }
 0x2ff   : > { %v1756_v39 = vadd.f32 %v1724_v44, %v1559_v52  ;;  %v1728_v44 = vmul.f32 %v5852_v14, %v5713_v30 }
 0x300   : > { %v5995_v40 = vpop.permute.xlu1 %2408  ;;  %v5997_v54 = vpop.permute.xlu0 %2006  ;;  %2661 = vperm.xlu0 %4581, %v5392_v37   ;;  %v1949_v31 = vadd.f32 %v1917_v0, %v1752_v48  ;;  %v1950_v0 = vadd.f32 %v1918_v19, %v1753_v9  ;;  %v1921_v48 = vmul.f32 %v5862_v26, %v5817_v29  ;;  %v1560_v29 = vadd.f32 %v5847_v53, %v1522_v21 }
 0x301   : > { %7567 = vst [vmem:[#allocation117_spill] sm:$0xff] %v5995_v40  ;;  %7568 = vst [vmem:[#allocation118_spill] sm:$0xff] %v5997_v54  ;;  %2625 = vperm.xlu1 %4534, %v5229_v1  }
 0x302   : > { %v1953_v19 = vadd.f32 %v1921_v48, %v1756_v39 }
 0x304   : > { %v6001_v6 = vpop.permute.xlu1 %2412  ;;  %v6003_v12 = vpop.permute.xlu0 %2018  ;;  %2673 = vperm.xlu0 %4581, %v5402_v59  }
 0x305   : > { %7569 = vst [vmem:[#allocation119_spill] sm:$0xff] %v6001_v6  ;;  %7570 = vst [vmem:[#allocation120_spill] sm:$0xff] %v6003_v12  ;;  %4535 = vset.pattern.permute.xlu1 %v7427_v55  ;;  %v7636_v6 = vld [vmem:[#allocation16_spill] sm:$0xff] }
 0x306   : > { %1861 = vperm.xlu1 %4535, %v5819_v5   ;;  %v7655_v12 = vld [vmem:[#allocation84_spill] sm:$0xff] }
 0x308   : > { %v6012_v32 = vpop.permute.xlu0 %2022  ;;  %4583 = vset.pattern.permute.xlu0 %v7435_v63 }
 0x309   : > { %7571 = vst [vmem:[#allocation121_spill] sm:$0xff] %v6012_v32  ;;  %v6020_v7 = vpop.permute.xlu1 %1648  ;;  %2858 = vperm.xlu0 %4583, %v5392_v37   ;;  %v7641_v32 = vld [vmem:[#allocation61_spill] sm:$0xff] }
 0x30a   : > { %7572 = vst [vmem:[#allocation122_spill] sm:$0xff] %v6020_v7  ;;  %4536 = vset.pattern.permute.xlu1 %v7428_v4 }
 0x30b   : > { %2633 = vperm.xlu1 %4536, %v5645_v25  }
 0x30c   : > { %v2035_v49 = vpop.permute.xlu0 %2034 }
 0x30d   : > { %v2114_v37 = vmul.f32 %v5880_v13, %v2035_v49  ;;  %2866 = vperm.xlu0 %4583, %v5933_v20   ;;  %v1725_v49 = vmul.f32 %v5852_v14, %v5706_v16  ;;  %v7612_v20 = vld [vmem:[#allocation31_spill] sm:$0xff] }
 0x30e   : > { %v6034_v3 = vpop.permute.xlu1 %2420 }
 0x30f   : > { %7573 = vst [vmem:[#allocation123_spill] sm:$0xff] %v6034_v3  ;;  %v6038_v59 = vadd.f32 %v2114_v37, %v1949_v31  ;;  %4537 = vset.pattern.permute.xlu1 %v7433_v56  ;;  %v1525_v31 = vmul.f32 %v5834_v41, %v5588_v10  ;;  %v1922_v37 = vmul.f32 %v5862_v26, %v5837_v38  ;;  %v7577_v10 = vld [vmem:[#allocation9_spill] sm:$0xff]  ;;  %v7627_v3 = vld [vmem:[#allocation42_spill] sm:$0xff] }
 0x310   : > { %2046 = vperm.xlu1 %4537, %v5782_v11   ;;  %v2039_v8 = vpop.permute.xlu0 %2038  ;;  %v1757_v16 = vadd.f32 %v1725_v49, %v1560_v29  ;;  %v1526_v38 = vmul.f32 %v5834_v41, %v5608_v33  ;;  %v7579_v49 = vld [vmem:[#allocation99_spill] sm:$0xff]  ;;  %v7582_v33 = vld [vmem:[#allocation77_spill] sm:$0xff] }
 0x311   : > { %7574 = vst [vmem:[#allocation124_spill] sm:$0xff] %v6038_v59  ;;  %v2115_v28 = vmul.f32 %v5880_v13, %v2039_v8  ;;  %2878 = vperm.xlu0 %4583, %v5950_v27   ;;  %v862_v8 = vmul.f32 %v5568_v17, %v7577_v10  ;;  %v7590_v59 = vld [vmem:[#allocation79_spill] sm:$0xff] }
 0x313   : > { %v6051_v24 = vadd.f32 %v2115_v28, %v1950_v0  ;;  %v6053_v51 = vpop.permute.xlu1 %1833  ;;  %v1563_v0 = vadd.f32 %v5847_v53, %v1525_v31  ;;  %v1954_v28 = vadd.f32 %v1922_v37, %v1757_v16  ;;  %v7580_v31 = vld [vmem:[#allocation73_spill] sm:$0xff]  ;;  %v1529_v37 = vmul.f32 %v5834_v41, %v7582_v33 }
 0x314   : > { %7575 = vst [vmem:[#allocation125_spill] sm:$0xff] %v6053_v51  ;;  %4538 = vset.pattern.permute.xlu1 %v7435_v63  ;;  %v2051_v34 = vpop.permute.xlu0 %2050  ;;  %v7617_v51 = vld [vmem:[#allocation55_spill] sm:$0xff] }
 0x315   : > { %v2118_v9 = vmul.f32 %v5880_v13, %v2051_v34  ;;  %2818 = vperm.xlu1 %4538, %v5617_v61   ;;  %v1925_v61 = vmul.f32 %v5862_v26, %v5856_v36  ;;  %v1760_v30 = vadd.f32 %v1728_v44, %v1563_v0  ;;  %v1729_v34 = vmul.f32 %v5852_v14, %v7579_v49  ;;  %v7584_v44 = vld [vmem:[#allocation114_spill] sm:$0xff] }
 0x316   : > { %v1926_v0 = vmul.f32 %v5862_v26, %v7584_v44 }
 0x317   : > { %v6065_v52 = vadd.f32 %v2118_v9, %v1953_v19  ;;  %v900_v19 = vadd.f32 %v7580_v31, %v862_v8  ;;  %v7581_v9 = vld [vmem:[#allocation10_spill] sm:$0xff]  ;;  %v7585_v8 = vld [vmem:[#allocation5_spill] sm:$0xff] }
 0x318   : > { %v6070_v21 = vpop.permute.xlu1 %2605  ;;  %v2055_v48 = vpop.permute.xlu0 %2054  ;;  %v865_v10 = vmul.f32 %v5568_v17, %v7581_v9  ;;  %v7587_v17 = vld [vmem:[#allocation11_spill] sm:$0xff] }
 0x319   : > { %7576 = vst [vmem:[#allocation126_spill] sm:$0xff] %v6065_v52  ;;  %7578 = vst [vmem:[#allocation9_spill] sm:$0xff] %v6070_v21  ;;  %v2119_v39 = vmul.f32 %v5880_v13, %v2055_v48  ;;  %2822 = vperm.xlu1 %4538, %v5229_v1   ;;  %v1564_v48 = vadd.f32 %v5847_v53, %v1526_v38  ;;  %v1957_v1 = vadd.f32 %v1925_v61, %v1760_v30  ;;  %v7588_v52 = vld [vmem:[#allocation101_spill] sm:$0xff]  ;;  %v7633_v21 = vld [vmem:[#allocation62_spill] sm:$0xff] }
 0x31a   : > { %v1262_v9 = vmul.f32 %v5600_v60, %v7587_v17  ;;  %v1732_v38 = vmul.f32 %v5852_v14, %v7588_v52  ;;  %v903_v30 = vadd.f32 %v7580_v31, %v865_v10  ;;  %v1929_v17 = vmul.f32 %v5862_v26, %v7591_v57  ;;  %v7593_v52 = vld [vmem:[#allocation6_spill] sm:$0xff]  ;;  %v7594_v31 = vld [vmem:[#allocation12_spill] sm:$0xff]  ;;  %v7596_v57 = vld [vmem:[#allocation19_spill] sm:$0xff] }
 0x31b   : > { %v6080_v29 = vadd.f32 %v2119_v39, %v1954_v28  ;;  %v7586_v39 = vld [vmem:[#allocation75_spill] sm:$0xff]  ;;  %v1761_v33 = vadd.f32 %v1729_v34, %v1564_v48 }
 0x31c   : > { %v6087_v16 = vpop.permute.xlu1 %2609  ;;  %v2067_v36 = vpop.permute.xlu0 %2066  ;;  %v1065_v49 = vmul.f32 %v7586_v39, %v7585_v8  ;;  %v1530_v8 = vmul.f32 %v5834_v41, %v7590_v59 }
 0x31d   : > { %7583 = vst [vmem:[#allocation99_spill] sm:$0xff] %v6087_v16  ;;  %v2122_v28 = vmul.f32 %v5880_v13, %v2067_v36  ;;  %4539 = vset.pattern.permute.xlu1 %v7433_v56  ;;  %v1567_v36 = vadd.f32 %v5847_v53, %v1529_v37  ;;  %v1958_v7 = vadd.f32 %v1926_v0, %v1761_v33  ;;  %v7595_v37 = vld [vmem:[#allocation103_spill] sm:$0xff]  ;;  %v7620_v56 = vmov 4  }
 0x31e   : > { %2058 = vperm.xlu1 %4539, %v5819_v5   ;;  %v1097_v44 = vadd.f32 %v1065_v49, %v900_v19  ;;  %v1265_v19 = vmul.f32 %v5600_v60, %v7594_v31  ;;  %v1733_v59 = vmul.f32 %v5852_v14, %v7595_v37  ;;  %v1502_v49 = vmul.f32 %v5834_v41, %v7596_v57  ;;  %v7606_v57 = vld [vmem:[#allocation21_spill] sm:$0xff] }
 0x31f   : > { %v6101_v61 = vadd.f32 %v2122_v28, %v1957_v1  ;;  %v1068_v1 = vmul.f32 %v7586_v39, %v7593_v52  ;;  %v1764_v10 = vadd.f32 %v1732_v38, %v1567_v36  ;;  %v1568_v39 = vadd.f32 %v5847_v53, %v1530_v8  ;;  %v7601_v8 = vld [vmem:[#allocation23_spill] sm:$0xff] }
 0x320   : > { %v2071_v27 = vpop.permute.xlu0 %2070  ;;  %v1294_v28 = vadd.f32 %v1262_v9, %v1097_v44  ;;  %v7597_v44 = vld [vmem:[#allocation20_spill] sm:$0xff]  ;;  %v7600_v31 = vmov 0  }
 0x321   : > { %7589 = vst [vmem:[#allocation73_spill] sm:$0xff] %v6101_v61  ;;  %v2123_v34 = vmul.f32 %v5880_v13, %v2071_v27  ;;  %v6110_v48 = vpop.permute.xlu1 %1845  ;;  %v1100_v27 = vadd.f32 %v1068_v1, %v903_v30  ;;  %v1961_v9 = vadd.f32 %v1929_v17, %v1764_v10  ;;  %v1930_v60 = vmul.f32 %v5862_v26, %v7597_v44  ;;  %v7603_v10 = vld [vmem:[#allocation25_spill] sm:$0xff]  ;;  %v7611_v61 = vld [vmem:[#allocation43_spill] sm:$0xff] }
 0x322   : > { %7592 = vst [vmem:[#allocation10_spill] sm:$0xff] %v6110_v48  ;;  %4540 = vset.pattern.permute.xlu1 %v7435_v63  ;;  %v6128_v36 = vmax.f32 %v1294_v28, 0.0  ;;  %v1765_v30 = vadd.f32 %v1733_v59, %v1568_v39  ;;  %v6139_v17 = vmul.f32 %v5941_v15, %v7601_v8  ;;  %v6143_v37 = vmul.f32 %v5941_v15, %v7603_v10  ;;  %v7607_v39 = vld [vmem:[#allocation28_spill] sm:$0xff]  ;;  %v7619_v63 = vld [vmem:[#allocation49_spill] sm:$0xff] }
 0x323   : > { %v6119_v0 = vadd.f32 %v2123_v34, %v1958_v7  ;;  %2830 = vperm.xlu1 %4540, %v5645_v25   ;;  %v1297_v52 = vadd.f32 %v1265_v19, %v1100_v27  ;;  %v7599_v34 = vld [vmem:[#allocation24_spill] sm:$0xff]  ;;  %v1540_v28 = vadd.f32 %v5847_v53, %v1502_v49  ;;  %v7605_v19 = vld [vmem:[#allocation34_spill] sm:$0xff]  ;;  %v1707_v48 = vmul.f32 %v5852_v14, %v7611_v61 }
 0x324   : > { %v2083_v33 = vpop.permute.xlu0 %2082  ;;  %v1705_v25 = vmul.f32 %v5852_v14, %v7599_v34  ;;  %7602 = vst [vmem:[#allocation114_spill] sm:$0xff] %v6139_v17  ;;  %7604 = vst [vmem:[#allocation5_spill] sm:$0xff] %v6143_v37  ;;  %v1504_v27 = vmul.f32 %v5834_v41, %v7605_v19  ;;  %v1962_v44 = vadd.f32 %v1930_v60, %v1765_v30  ;;  %v7608_v34 = vld [vmem:[#allocation27_spill] sm:$0xff]  ;;  %v7610_v10 = vld [vmem:[#allocation40_spill] sm:$0xff] }
 0x325   : > { %v2126_v38 = vmul.f32 %v5880_v13, %v2083_v33  ;;  %v1503_v33 = vmul.f32 %v5834_v41, %v7606_v57  ;;  %v6156_v8 = vmul.f32 %v5941_v15, %v7608_v34  ;;  %v6158_v49 = vmax.f32 %v1297_v52, 0.0  ;;  %v7614_v60 = vld [vmem:[#allocation33_spill] sm:$0xff]  ;;  %v7654_v17 = vld [vmem:[#allocation80_spill] sm:$0xff] }
 0x326   : > { %v6130_v7 = vpop.permute.xlu1 %2617  ;;  %v1507_v19 = vmul.f32 %v5834_v41, %v7610_v10  ;;  %v6166_v57 = vmul.f32 %v5960_v23, %v7612_v20  ;;  %v2099_v30 = vmul.f32 %v5880_v13, %v7614_v60  ;;  %v1542_v52 = vadd.f32 %v5847_v53, %v1504_v27  ;;  %v7625_v60 = vld [vmem:[#allocation30_spill] sm:$0xff] }
 0x327   : > { %7598 = vst [vmem:[#allocation77_spill] sm:$0xff] %v6130_v7  ;;  %v6134_v1 = vadd.f32 %v2126_v38, %v1961_v9  ;;  %4541 = vset.pattern.permute.xlu1 %v7600_v31  ;;  %v1902_v9 = vmul.f32 %v5862_v26, %v7607_v39  ;;  %7609 = vst [vmem:[#allocation75_spill] sm:$0xff] %v6156_v8  ;;  %v1737_v39 = vadd.f32 %v1705_v25, %v1540_v28  ;;  %v7621_v25 = vld [vmem:[#allocation32_spill] sm:$0xff] }
 0x328   : > { %1458 = vperm.xlu1 %4541, %v6128_v36   ;;  %v2087_v59 = vpop.permute.xlu0 %2086  ;;  %7613 = vst [vmem:[#allocation11_spill] sm:$0xff] %v6166_v57  ;;  %v1505_v10 = vmul.f32 %v5834_v41, %v7617_v51  ;;  %v1710_v61 = vmul.f32 %v5852_v14, %v7618_v42  ;;  %v1904_v20 = vmul.f32 %v5862_v26, %v7619_v63 }
 0x329   : > { %v2127_v38 = vmul.f32 %v5880_v13, %v2087_v59  ;;  %v6184_v28 = vmul.f32 %v5960_v23, %v7621_v25  ;;  %v6191_v27 = vadd.f32 %v5847_v53, %v1503_v33  ;;  %v1934_v51 = vadd.f32 %v1902_v9, %v1737_v39  ;;  %v7628_v9 = vld [vmem:[#allocation58_spill] sm:$0xff] }
 0x32a   : > { %v6198_v63 = vmul.f32 %v5862_v26, %v7625_v60  ;;  %v1739_v25 = vadd.f32 %v1707_v48, %v1542_v52  ;;  %v6207_v33 = vmul.f32 %v5909_v50, %v7627_v3  ;;  %v1506_v39 = vmul.f32 %v5834_v41, %v7628_v9  ;;  %v7630_v52 = vld [vmem:[#allocation57_spill] sm:$0xff]  ;;  %v7634_v9 = vld [vmem:[#allocation64_spill] sm:$0xff] }
 0x32b   : > { %v6170_v59 = vadd.f32 %v2127_v38, %v1962_v44  ;;  %v6172_v34 = vpop.permute.xlu1 %2030  ;;  %7622 = vst [vmem:[#allocation18_spill] sm:$0xff] %v6184_v28  ;;  %v7623_v44 = vld [vmem:[#allocation35_spill] sm:$0xff]  ;;  %v6214_v60 = vadd.f32 %v5847_v53, %v1505_v10  ;;  %v1510_v8 = vmul.f32 %v5834_v41, %v7633_v21  ;;  %v1513_v16 = vmul.f32 %v5834_v41, %v7634_v9  ;;  %v7640_v9 = vld [vmem:[#allocation48_spill] sm:$0xff] }
 0x32c   : > { %7616 = vst [vmem:[#allocation79_spill] sm:$0xff] %v6172_v34  ;;  %4542 = vset.pattern.permute.xlu1 %v7620_v56  ;;  %v6188_v38 = vmul.f32 %v5960_v23, %v7623_v44  ;;  %v7626_v34 = vld [vmem:[#allocation52_spill] sm:$0xff]  ;;  %v6203_v44 = vadd.f32 %v2099_v30, %v1934_v51  ;;  %v1936_v48 = vadd.f32 %v1904_v20, %v1739_v25  ;;  %v7637_v20 = vld [vmem:[#allocation53_spill] sm:$0xff]  ;;  %v7642_v28 = vld [vmem:[#allocation63_spill] sm:$0xff] }
 0x32d   : > { %7615 = vst [vmem:[#allocation101_spill] sm:$0xff] %v6170_v59  ;;  %2243 = vperm.xlu1 %4542, %v5782_v11   ;;  %v6194_v42 = vpop.permute.xlu0 %2171  ;;  %v1545_v59 = vadd.f32 %v5847_v53, %v1507_v19  ;;  %v2101_v7 = vmul.f32 %v5880_v13, %v7626_v34  ;;  %v2298_v34 = vmul.f32 %v5909_v50, %v7630_v52  ;;  %v7632_v51 = vld [vmem:[#allocation60_spill] sm:$0xff] }
 0x32e   : > { %7624 = vst [vmem:[#allocation6_spill] sm:$0xff] %v6188_v38  ;;  %v7629_v38 = vld [vmem:[#allocation50_spill] sm:$0xff]  ;;  %v1509_v3 = vmul.f32 %v5834_v41, %v7632_v51  ;;  %v2104_v25 = vmul.f32 %v5880_v13, %v7637_v20  ;;  %v7638_v52 = vld [vmem:[#allocation56_spill] sm:$0xff]  ;;  %v6238_v4 = vadd.f32 %v5847_v53, %v1506_v39  ;;  %v2301_v20 = vmul.f32 %v5909_v50, %v7642_v28 }
 0x32f   : > { %v1907_v62 = vmul.f32 %v5862_v26, %v7629_v38  ;;  %v1742_v19 = vadd.f32 %v1710_v61, %v1545_v59  ;;  %v7635_v38 = vld [vmem:[#allocation67_spill] sm:$0xff]  ;;  %v2133_v61 = vadd.f32 %v2101_v7, %v1936_v48  ;;  %v1508_v51 = vmul.f32 %v5834_v41, %v7638_v52 }
 0x330   : > { %v6218_v30 = vpop.permute.xlu1 %2802  ;;  %v1514_v10 = vmul.f32 %v5834_v41, %v7635_v38  ;;  %v6242_v38 = vmul.f32 %v5926_v18, %v7640_v9  ;;  %v1511_v7 = vmul.f32 %v5834_v41, %v7641_v32  ;;  %v1711_v52 = vmul.f32 %v5852_v14, %v7643_v2 }
 0x331   : > { %7631 = vst [vmem:[#allocation12_spill] sm:$0xff] %v6218_v30  ;;  %2247 = vperm.xlu1 %4542, %v7636_v6   ;;  %v6229_v59 = vpop.permute.xlu0 %2187  ;;  %v7639_v30 = vld [vmem:[#allocation66_spill] sm:$0xff]  ;;  %v1939_v40 = vadd.f32 %v1907_v62, %v1742_v19  ;;  %v2330_v48 = vadd.f32 %v2298_v34, %v2133_v61  ;;  %v6255_v55 = vadd.f32 %v5847_v53, %v1509_v3  ;;  %v7647_v61 = vld [vmem:[#allocation69_spill] sm:$0xff] }
 0x332   : > { %v2495_v21 = vmul.f32 %v5926_v18, %v7639_v30  ;;  %v2692_v30 = vmul.f32 %v5941_v15, %v7644_v58  ;;  %v6258_v62 = vadd.f32 %v5847_v53, %v1510_v8  ;;  %v6261_v32 = vadd.f32 %v5847_v53, %v1513_v16  ;;  %v7648_v16 = vld [vmem:[#allocation70_spill] sm:$0xff] }
 0x333   : > { %v6264_v19 = vadd.f32 %v5847_v53, %v1514_v10  ;;  %v2136_v28 = vadd.f32 %v2104_v25, %v1939_v40  ;;  %v1546_v58 = vadd.f32 %v5847_v53, %v1508_v51  ;;  %v1714_v3 = vmul.f32 %v5852_v14, %v7647_v61  ;;  %v7649_v10 = vld [vmem:[#allocation71_spill] sm:$0xff]  ;;  %v7652_v61 = vld [vmem:[#allocation76_spill] sm:$0xff] }
 0x334   : > { %v6252_v39 = vpop.permute.xlu1 %2806  ;;  %v2527_v34 = vadd.f32 %v2495_v21, %v2330_v48  ;;  %v1549_v8 = vadd.f32 %v5847_v53, %v1511_v7  ;;  %v2498_v9 = vmul.f32 %v5926_v18, %v7648_v16  ;;  %v7651_v21 = vld [vmem:[#allocation82_spill] sm:$0xff]  ;;  %v1911_v57 = vmul.f32 %v5862_v26, %v7652_v61  ;;  %v7663_v61 = vld [vmem:[#allocation87_spill] sm:$0xff] }
 0x335   : > { %7645 = vst [vmem:[#allocation103_spill] sm:$0xff] %v6252_v39  ;;  %4543 = vset.pattern.permute.xlu1 %v7600_v31  ;;  %v6267_v2 = vpop.permute.xlu0 %2203  ;;  %v1908_v39 = vmul.f32 %v5862_v26, %v7649_v10  ;;  %v7650_v31 = vld [vmem:[#allocation81_spill] sm:$0xff]  ;;  %v2333_v40 = vadd.f32 %v2301_v20, %v2136_v28  ;;  %v1743_v25 = vadd.f32 %v1711_v52, %v1546_v58  ;;  %v7658_v20 = vld [vmem:[#allocation51_spill] sm:$0xff] }
 0x336   : > { %7646 = vst [vmem:[#allocation19_spill] sm:$0xff] %v6267_v2  ;;  %1473 = vperm.xlu1 %4543, %v6158_v49   ;;  %v2889_v37 = vmul.f32 %v5960_v23, %v7650_v31  ;;  %v2724_v51 = vadd.f32 %v2692_v30, %v2527_v34  ;;  %v1706_v48 = vmul.f32 %v5852_v14, %v7651_v21  ;;  %v7653_v2 = vld [vmem:[#allocation78_spill] sm:$0xff]  ;;  %v7661_v58 = vld [vmem:[#allocation59_spill] sm:$0xff] }
 0x337   : > { %v2695_v7 = vmul.f32 %v5941_v15, %v7653_v2  ;;  %v2105_v16 = vmul.f32 %v5880_v13, %v7654_v17  ;;  %v1708_v10 = vmul.f32 %v5852_v14, %v7655_v12  ;;  %v6296_v52 = vmul.f32 %v5941_v15, %v7658_v20  ;;  %v7659_v30 = vld [vmem:[#allocation54_spill] sm:$0xff]  ;;  %v7664_v20 = vld [vmem:[#allocation68_spill] sm:$0xff] }
 0x338   : > { %v6300_v28 = vmul.f32 %v5960_v23, %v7659_v30  ;;  %v2299_v2 = vmul.f32 %v5909_v50, %v7661_v58  ;;  %v1746_v34 = vadd.f32 %v1714_v3, %v1549_v8  ;;  %v2530_v17 = vadd.f32 %v2498_v9, %v2333_v40  ;;  %v7665_v30 = vld [vmem:[#allocation74_spill] sm:$0xff] }
 0x339   : > { %v6290_v54 = vpop.permute.xlu1 %2042  ;;  %v6292_v31 = vpop.permute.xlu0 %2219  ;;  %v1940_v12 = vadd.f32 %v1908_v39, %v1743_v25  ;;  %v6305_v21 = vadd.f32 %v2889_v37, %v2724_v51  ;;  %v2953_v3 = vld [vmem:[%s7565_s26 + $0x20] sm:$0xff]  ;;  %v1738_v37 = vadd.f32 %v1706_v48, %v6191_v27  ;;  %v7666_v39 = vld [vmem:[#allocation105_spill] sm:$0xff]  ;;  %v1740_v51 = vadd.f32 %v1708_v10, %v6214_v60  ;;  %v7671_v10 = vld [vmem:[#allocation88_spill] sm:$0xff] }
 0x33a   : > { %7656 = vst [vmem:[#allocation20_spill] sm:$0xff] %v6290_v54  ;;  %7657 = vst [vmem:[#allocation24_spill] sm:$0xff] %v6292_v31  ;;  %4544 = vset.pattern.permute.xlu1 %v7620_v56  ;;  %v2892_v54 = vmul.f32 %v5960_v23, %v7663_v61  ;;  %v6312_v31 = vmul.f32 %v5926_v18, %v7664_v20  ;;  %v1905_v8 = vmul.f32 %v5862_v26, %v7666_v39  ;;  %v7667_v61 = vld [vmem:[#allocation85_spill] sm:$0xff] }
 0x33b   : > { %7660 = vst [vmem:[#allocation23_spill] sm:$0xff] %v6300_v28  ;;  %7662 = vst [vmem:[#allocation25_spill] sm:$0xff] %v6305_v21  ;;  %2255 = vperm.xlu1 %4544, %v5819_v5   ;;  %v6316_v28 = vmul.f32 %v5941_v15, %v7665_v30  ;;  %v1943_v9 = vadd.f32 %v1911_v57, %v1746_v34  ;;  %v2727_v40 = vadd.f32 %v2695_v7, %v2530_v17  ;;  %v7670_v7 = vld [vmem:[#allocation86_spill] sm:$0xff] }
 0x33c   : > { %v2137_v25 = vadd.f32 %v2105_v16, %v1940_v12  ;;  %v2108_v20 = vmul.f32 %v5880_v13, %v7667_v61  ;;  %v2100_v30 = vmul.f32 %v5880_v13, %v5948_v35  ;;  %v2102_v56 = vmul.f32 %v5880_v13, %v5968_v47  ;;  %v2956_v35 = vld [vmem:[%s7565_s26 + $0x38] sm:$0xff] }
 0x33d   : > { %v2236_v58 = vpop.permute.xlu0 %2235  ;;  %v6335_v57 = vadd.f32 %v2953_v3, %v6305_v21  ;;  %v1709_v60 = vmul.f32 %v5852_v14, %v7670_v7  ;;  %v6339_v16 = vadd.f32 %v2892_v54, %v2727_v40  ;;  %v1712_v34 = vmul.f32 %v5852_v14, %v7671_v10  ;;  %v7672_v47 = vld [vmem:[#allocation89_spill] sm:$0xff]  ;;  %v7674_v54 = vld [vmem:[#allocation83_spill] sm:$0xff] }
 0x33e   : > { %v2312_v27 = vmul.f32 %v5909_v50, %v2236_v58  ;;  %v6332_v48 = vpop.permute.xlu1 %2814  ;;  %v1713_v17 = vmul.f32 %v5852_v14, %v7672_v47  ;;  %v1937_v12 = vadd.f32 %v1905_v8, %v1740_v51  ;;  %v1935_v3 = vadd.f32 %v6198_v63, %v1738_v37  ;;  %v7675_v58 = vld [vmem:[#allocation90_spill] sm:$0xff]  ;;  %v7676_v7 = vld [vmem:[#allocation91_spill] sm:$0xff] }
 0x33f   : > { %7668 = vst [vmem:[#allocation34_spill] sm:$0xff] %v6332_v48  ;;  %7669 = vst [vmem:[#allocation21_spill] sm:$0xff] %v6335_v57  ;;  %4545 = vset.pattern.permute.xlu1 %v7418_v45  ;;  %v6356_v40 = vmul.f32 %v5960_v23, %v7674_v54  ;;  %v1512_v61 = vmul.f32 %v5834_v41, %v7675_v58  ;;  %v1716_v10 = vmul.f32 %v5852_v14, %v7676_v7  ;;  %v7677_v48 = vld [vmem:[#allocation92_spill] sm:$0xff]  ;;  %v7678_v58 = vld [vmem:[#allocation93_spill] sm:$0xff] }
 0x340   : > { %v6351_v39 = vadd.f32 %v2312_v27, %v6051_v24  ;;  %1668 = vperm.xlu1 %4545, %v6128_v36   ;;  %v2302_v8 = vmul.f32 %v5909_v50, %v7677_v48  ;;  %v2140_v63 = vadd.f32 %v2108_v20, %v1943_v9  ;;  %v2132_v37 = vadd.f32 %v2100_v30, %v1935_v3  ;;  %v7679_v21 = vld [vmem:[#allocation95_spill] sm:$0xff]  ;;  %v7683_v3 = vld [vmem:[#allocation97_spill] sm:$0xff] }
 0x341   : > { %v2252_v51 = vpop.permute.xlu0 %2251  ;;  %v2134_v24 = vadd.f32 %v2102_v56, %v1937_v12  ;;  %v1741_v47 = vadd.f32 %v1709_v60, %v6238_v4  ;;  %v6367_v54 = vadd.f32 %v2956_v35, %v6339_v16  ;;  %v1717_v57 = vmul.f32 %v5852_v14, %v7678_v58  ;;  %v7680_v56 = vld [vmem:[#allocation7_spill] sm:$0xff]  ;;  %v7687_v58 = vld [vmem:[#allocation2_spill] sm:$0xff] }
 0x342   : > { %7673 = vst [vmem:[#allocation28_spill] sm:$0xff] %v6351_v39  ;;  %v2316_v27 = vmul.f32 %v5909_v50, %v2252_v51  ;;  %v1744_v39 = vadd.f32 %v1712_v34, %v6255_v55  ;;  %v1745_v48 = vadd.f32 %v1713_v17, %v6258_v62  ;;  %v1515_v9 = vmul.f32 %v5834_v41, %v7679_v21  ;;  %v7681_v34 = vld [vmem:[#allocation96_spill] sm:$0xff] }
 0x343   : > { %v6372_v7 = vpop.permute.xlu1 %1438  ;;  %v1909_v20 = vmul.f32 %v5862_v26, %v7680_v56  ;;  %v1550_v55 = vadd.f32 %v5847_v53, %v1512_v61  ;;  %v6385_v30 = vadd.f32 %v1716_v10, %v6261_v32  ;;  %v2334_v60 = vadd.f32 %v2302_v8, %v2137_v25  ;;  %v7682_v32 = vld [vmem:[#allocation94_spill] sm:$0xff] }
 0x344   : > { %v6380_v4 = vadd.f32 %v2316_v27, %v6080_v29  ;;  %4546 = vset.pattern.permute.xlu1 %v7454_v46  ;;  %v2305_v62 = vmul.f32 %v5909_v50, %v7681_v34  ;;  %v2329_v21 = vadd.f32 %v6207_v33, %v2132_v37  ;;  %v2331_v35 = vadd.f32 %v2299_v2, %v2134_v24  ;;  %v7684_v10 = vld [vmem:[#allocation98_spill] sm:$0xff]  ;;  %v7686_v24 = vld [vmem:[#allocation104_spill] sm:$0xff] }
 0x345   : > { %2440 = vperm.xlu1 %4546, %v5782_v11   ;;  %v2268_v41 = vpop.permute.xlu0 %2267  ;;  %v2106_v29 = vmul.f32 %v5880_v13, %v5990_v22  ;;  %v6395_v12 = vadd.f32 %v1717_v57, %v6264_v19  ;;  %v2303_v25 = vmul.f32 %v5909_v50, %v7682_v32  ;;  %v1715_v61 = vmul.f32 %v5852_v14, %v7683_v3  ;;  %v7685_v2 = vld [vmem:[#allocation102_spill] sm:$0xff]  ;;  %v7690_v3 = vld [vmem:[#allocation100_spill] sm:$0xff] }
 0x346   : > { %v2320_v17 = vmul.f32 %v5909_v50, %v2268_v41  ;;  %v2499_v8 = vmul.f32 %v5926_v18, %v7684_v10  ;;  %v1553_v33 = vadd.f32 %v5847_v53, %v1515_v9  ;;  %v1718_v51 = vmul.f32 %v5852_v14, %v7685_v2  ;;  %v7688_v34 = vld [vmem:[#allocation106_spill] sm:$0xff] }
 0x347   : > { %v1941_v22 = vadd.f32 %v1909_v20, %v1744_v39  ;;  %v2337_v57 = vadd.f32 %v2305_v62, %v2140_v63  ;;  %v2502_v27 = vmul.f32 %v5926_v18, %v7686_v24  ;;  %v1912_v56 = vmul.f32 %v5862_v26, %v7687_v58  ;;  %v7689_v62 = vld [vmem:[#allocation3_spill] sm:$0xff]  ;;  %v7691_v24 = vld [vmem:[#allocation108_spill] sm:$0xff] }
 0x348   : > { %v6407_v37 = vadd.f32 %v2320_v17, %v6119_v0  ;;  %v6409_v19 = vpop.permute.xlu1 %2227  ;;  %v1906_v41 = vmul.f32 %v5862_v26, %v7688_v34  ;;  %v2526_v14 = vadd.f32 %v6242_v38, %v2329_v21  ;;  %v2528_v0 = vadd.f32 %v6312_v31, %v2331_v35  ;;  %v7692_v35 = vld [vmem:[#allocation15_spill] sm:$0xff]  ;;  %v7694_v34 = vld [vmem:[#allocation109_spill] sm:$0xff] }
 0x349   : > { %2444 = vperm.xlu1 %4546, %v7636_v6   ;;  %v2280_v53 = vpop.permute.xlu0 %2279  ;;  %v2138_v39 = vadd.f32 %v2106_v29, %v1941_v22  ;;  %v1747_v63 = vadd.f32 %v1715_v61, %v1550_v55  ;;  %v2531_v20 = vadd.f32 %v2499_v8, %v2334_v60  ;;  %v2696_v17 = vmul.f32 %v5941_v15, %v7689_v62 }
 0x34a   : > { %v2323_v9 = vmul.f32 %v5909_v50, %v2280_v53  ;;  %v2296_v32 = vmul.f32 %v5909_v50, %v6194_v42  ;;  %v2500_v10 = vmul.f32 %v5926_v18, %v7690_v3  ;;  %v1750_v2 = vadd.f32 %v1718_v51, %v1553_v33  ;;  %v7696_v53 = vld [vmem:[#allocation17_spill] sm:$0xff] }
 0x34b   : > { %v1910_v38 = vmul.f32 %v5862_v26, %v7691_v24  ;;  %v2534_v55 = vadd.f32 %v2502_v27, %v2337_v57  ;;  %v6434_v60 = vadd.f32 %v1912_v56, %v1747_v63  ;;  %v1915_v29 = vmul.f32 %v5862_v26, %v7692_v35  ;;  %v7700_v24 = vld [vmem:[#allocation114_spill] sm:$0xff] }
 0x34c   : > { %v6430_v31 = vadd.f32 %v2323_v9, %v6134_v1  ;;  %v6432_v21 = vpop.permute.xlu1 %2231  ;;  %v2103_v42 = vmul.f32 %v5880_v13, %v5984_v43  ;;  %v1938_v61 = vadd.f32 %v1906_v41, %v1741_v47  ;;  %v2723_v8 = vadd.f32 %v6296_v52, %v2526_v14  ;;  %v7693_v43 = vld [vmem:[#allocation107_spill] sm:$0xff]  ;;  %v7697_v9 = vld [vmem:[#allocation118_spill] sm:$0xff] }
 0x34d   : > { %4547 = vset.pattern.permute.xlu1 %v7418_v45  ;;  %v2725_v33 = vadd.f32 %v6316_v28, %v2528_v0  ;;  %v2335_v1 = vadd.f32 %v2303_v25, %v2138_v39  ;;  %v2728_v22 = vadd.f32 %v2696_v17, %v2531_v20  ;;  %v2328_v57 = vadd.f32 %v2296_v32, %v6203_v44  ;;  %v7695_v28 = vld [vmem:[#allocation4_spill] sm:$0xff]  ;;  %v7698_v20 = vld [vmem:[#allocation23_spill] sm:$0xff] }
 0x34e   : > { %1680 = vperm.xlu1 %4547, %v6158_v49   ;;  %v2369_v51 = vpop.permute.xlu0 %2368  ;;  %v2300_v27 = vmul.f32 %v5909_v50, %v6229_v59  ;;  %v2697_v56 = vmul.f32 %v5941_v15, %v7693_v43  ;;  %v1942_v47 = vadd.f32 %v1910_v38, %v1745_v48  ;;  %v1913_v52 = vmul.f32 %v5862_v26, %v7694_v34  ;;  %v7699_v32 = vld [vmem:[#allocation120_spill] sm:$0xff]  ;;  %v7704_v43 = vld [vmem:[#allocation11_spill] sm:$0xff] }
 0x34f   : > { %v2493_v58 = vmul.f32 %v5926_v18, %v2369_v51  ;;  %v2699_v25 = vmul.f32 %v5941_v15, %v7695_v28  ;;  %v6454_v41 = vadd.f32 %v1915_v29, %v1750_v2  ;;  %v2893_v44 = vmul.f32 %v5960_v23, %v7696_v53  ;;  %v2954_v29 = vld [vmem:[%s7565_s26 + $0x28] sm:$0xff]  ;;  %v2951_v51 = vld [vmem:[%s7565_s26 + $0x10] sm:$0xff] }
 0x350   : > { %v2135_v14 = vadd.f32 %v2103_v42, %v1938_v61  ;;  %v2532_v39 = vadd.f32 %v2500_v10, %v2335_v1  ;;  %v2107_v63 = vmul.f32 %v5880_v13, %v7697_v9  ;;  %v2920_v62 = vadd.f32 %v7698_v20, %v2723_v8  ;;  %v2952_v10 = vld [vmem:[%s7565_s26 + $0x18] sm:$0xff]  ;;  %v7701_v61 = vld [vmem:[#allocation110_spill] sm:$0xff] }
 0x351   : > { %v2525_v0 = vadd.f32 %v2493_v58, %v2328_v57  ;;  %v6458_v59 = vpop.permute.xlu1 %1453  ;;  %v2922_v17 = vadd.f32 %v6356_v40, %v2725_v33  ;;  %v2110_v3 = vmul.f32 %v5880_v13, %v7699_v32  ;;  %v1945_v40 = vadd.f32 %v1913_v52, %v6385_v30  ;;  %v7702_v33 = vld [vmem:[#allocation19_spill] sm:$0xff]  ;;  %v7703_v57 = vld [vmem:[#allocation8_spill] sm:$0xff]  ;;  %v7705_v9 = vld [vmem:[#allocation5_spill] sm:$0xff] }
 0x352   : > { %4548 = vset.pattern.permute.xlu1 %v7454_v46  ;;  %v2385_v48 = vpop.permute.xlu0 %2384  ;;  %v2332_v2 = vadd.f32 %v2300_v27, %v2135_v14  ;;  %v6477_v42 = vadd.f32 %v2699_v25, %v2534_v55  ;;  %v1914_v8 = vmul.f32 %v5862_v26, %v7701_v61  ;;  %v2304_v1 = vmul.f32 %v5909_v50, %v7702_v33  ;;  %v7712_v61 = vld [vmem:[#allocation121_spill] sm:$0xff] }
 0x353   : > { %v2722_v38 = vadd.f32 %v7700_v24, %v2525_v0  ;;  %v2497_v35 = vmul.f32 %v5926_v18, %v2385_v48  ;;  %2452 = vperm.xlu1 %4548, %v5819_v5   ;;  %v2109_v27 = vmul.f32 %v5880_v13, %v7703_v57  ;;  %v6488_v58 = vadd.f32 %v2893_v44, %v2728_v22  ;;  %v7707_v22 = vld [vmem:[#allocation111_spill] sm:$0xff]  ;;  %v7708_v24 = vld [vmem:[#allocation14_spill] sm:$0xff]  ;;  %v7713_v57 = vld [vmem:[#allocation21_spill] sm:$0xff] }
 0x354   : > { %v2729_v55 = vadd.f32 %v2697_v56, %v2532_v39  ;;  %v2139_v52 = vadd.f32 %v2107_v63, %v1942_v47  ;;  %v2984_v25 = vadd.f32 %v2952_v10, %v2920_v62  ;;  %v2986_v53 = vadd.f32 %v2954_v29, %v2922_v17  ;;  %v2957_v63 = vld [vmem:[%s7565_s26 + $0x40] sm:$0xff]  ;;  %v7711_v10 = vld [vmem:[#allocation25_spill] sm:$0xff] }
 0x355   : > { %v2919_v34 = vadd.f32 %v7704_v43, %v2722_v38  ;;  %v2529_v30 = vadd.f32 %v2497_v35, %v2332_v2  ;;  %v2142_v14 = vadd.f32 %v2110_v3, %v1945_v40  ;;  %v7706_v32 = vmov 2   ;;  %v7709_v3 = vld [vmem:[#allocation38_spill] sm:$0xff] }
 0x356   : > { %v6491_v28 = vpop.permute.xlu1 %2239  ;;  %v2401_v26 = vpop.permute.xlu0 %2400  ;;  %v2894_v44 = vmul.f32 %v5960_v23, %v7707_v22  ;;  %v2306_v56 = vmul.f32 %v5909_v50, %v7708_v24  ;;  %v2336_v47 = vadd.f32 %v2304_v1, %v2139_v52  ;;  %v2307_v2 = vmul.f32 %v5909_v50, %v7709_v3  ;;  %v7710_v38 = vld [vmem:[#allocation18_spill] sm:$0xff]  ;;  %v2955_v1 = vld [vmem:[%s7565_s26 + $0x30] sm:$0xff]  ;;  %v7719_v24 = vld [vmem:[#allocation75_spill] sm:$0xff] }
 0x357   : > { %v2983_v0 = vadd.f32 %v2951_v51, %v2919_v34  ;;  %v2726_v48 = vadd.f32 %v7705_v9, %v2529_v30  ;;  %v2501_v20 = vmul.f32 %v5926_v18, %v2401_v26  ;;  %4549 = vset.pattern.permute.xlu1 %v7706_v32  ;;  %v3279_v39 = vpack.c.bf16 %v2920_v62, %v2919_v34  ;;  %v7714_v9 = vld [vmem:[#allocation117_spill] sm:$0xff] }
 0x358   : > { %1865 = vperm.xlu1 %4549, %v6128_v36   ;;  %v3280_v29 = vpack.c.bf16 %v2922_v17, %v7711_v10  ;;  %v2111_v33 = vmul.f32 %v5880_v13, %v7712_v61  ;;  %v3015_v43 = vpack.c.bf16 %v2986_v53, %v7713_v57  ;;  %v2926_v34 = vadd.f32 %v2894_v44, %v2729_v55  ;;  %v7715_v53 = vld [vmem:[#allocation24_spill] sm:$0xff] }
 0x359   : > { %v2923_v35 = vadd.f32 %v7710_v38, %v2726_v48  ;;  %v3014_v40 = vpack.c.bf16 %v2984_v25, %v2983_v0  ;;  %v2533_v62 = vadd.f32 %v2501_v20, %v2336_v47  ;;  %4335 = vmatmul.mubr.msk.bf16.vlgmr.msra.gmra.mxu1 %vm3052_vm0, %v3279_v39  ;;  %v1946_v30 = vadd.f32 %v1914_v8, %v6395_v12  ;;  %v2958_v25 = vld [vmem:[%s7565_s26 + $0x48] sm:$0xff]  ;;  %v7721_v38 = vld [vmem:[#allocation9_spill] sm:$0xff] }
 0x35a   : > { %v2417_v51 = vpop.permute.xlu0 %2416  ;;  %v2141_v52 = vadd.f32 %v2109_v27, %v6434_v60  ;;  %v2339_v17 = vadd.f32 %v2307_v2, %v2142_v14  ;;  %4338 = vmatprep.mubr.msk.bf16.mxu1 %vm3052_vm0, %v3280_v29  ;;  %v2989_v0 = vadd.f32 %v2957_v63, %v6488_v58  ;;  %v2503_v55 = vmul.f32 %v5926_v18, %v7714_v9  ;;  %v7717_v27 = vld [vmem:[#allocation119_spill] sm:$0xff]  ;;  %v7720_v2 = vld [vmem:[#allocation112_spill] sm:$0xff] }
 0x35b   : > { %v6518_v26 = vpop.permute.xlu1 %1652  ;;  %4299 = vmatmul.mubr.msk.bf16.vlgmr.msra.gmra.mxu0 %vm3052_vm0, %v3014_v40  ;;  %v2308_v12 = vmul.f32 %v5909_v50, %v7715_v53  ;;  %v7716_v60 = vmov 6   ;;  %v2504_v14 = vmul.f32 %v5926_v18, %v7717_v27  ;;  %v7718_v48 = vld [vmem:[#allocation99_spill] sm:$0xff]  ;;  %v2987_v22 = vadd.f32 %v2955_v1, %v2923_v35  ;;  %v7723_v1 = vld [vmem:[#allocation113_spill] sm:$0xff]  ;;  %v7726_v27 = vld [vmem:[#allocation6_spill] sm:$0xff] }
 0x35c   : > { %4550 = vset.pattern.permute.xlu1 %v7716_v60  ;;  %4302 = vmatprep.mubr.msk.bf16.mxu0 %vm3052_vm0, %v3015_v43  ;;  %v2338_v8 = vadd.f32 %v2306_v56, %v2141_v52  ;;  %v2701_v20 = vmul.f32 %v5941_v15, %v7718_v48  ;;  %v2143_v44 = vadd.f32 %v2111_v33, %v1946_v30  ;;  %v7722_v40 = vld [vmem:[#allocation103_spill] sm:$0xff]  ;;  %v7724_v52 = vld [vmem:[#allocation12_spill] sm:$0xff] }
 0x35d   : > { %2637 = vperm.xlu1 %4550, %v5782_v11   ;;  %v2730_v47 = vadd.f32 %v7719_v24, %v2533_v62  ;;  %v2505_v39 = vmul.f32 %v5926_v18, %v2417_v51  ;;  %v2990_v3 = vadd.f32 %v2958_v25, %v2926_v34  ;;  %v2112_v56 = vmul.f32 %v5880_v13, %v7720_v2  ;;  %v7725_v9 = vld [vmem:[#allocation115_spill] sm:$0xff]  ;;  %v2959_v48 = vld [vmem:[%s7565_s26 + $0x50] sm:$0xff] }
 0x35e   : > { %v6538_v63 = vpop.permute.xlu0 %2432  ;;  %v2700_v10 = vmul.f32 %v5941_v15, %v7721_v38  ;;  %v2536_v29 = vadd.f32 %v2504_v14, %v2339_v17  ;;  %v2898_v61 = vmul.f32 %v5960_v23, %v7722_v40  ;;  %v2896_v33 = vmul.f32 %v5960_v23, %v7723_v1  ;;  %v7730_v40 = vld [vmem:[#allocation37_spill] sm:$0xff] }
 0x35f   : > { %v2535_v57 = vadd.f32 %v2503_v55, %v2338_v8  ;;  %v2340_v62 = vadd.f32 %v2308_v12, %v2143_v44  ;;  %v3281_v51 = vpack.c.bf16 %v6339_v16, %v2923_v35  ;;  %v2897_v13 = vmul.f32 %v5960_v23, %v7724_v52  ;;  %v2962_v44 = vld [vmem:[%s7565_s26 + $0x68] sm:$0xff] }
 0x360   : > { %v6548_v43 = vpop.permute.xlu1 %2424  ;;  %v2733_v30 = vadd.f32 %v2701_v20, %v2536_v29  ;;  %v3282_v17 = vpack.c.bf16 %v2926_v34, %v6488_v58  ;;  %v3016_v25 = vpack.c.bf16 %v6367_v54, %v2987_v22  ;;  %v2309_v53 = vmul.f32 %v5909_v50, %v7725_v9  ;;  %v7727_v50 = vld [vmem:[#allocation29_spill] sm:$0xff] }
 0x361   : > { %2641 = vperm.xlu1 %4550, %v7636_v6   ;;  %v2927_v55 = vadd.f32 %v7726_v27, %v2730_v47  ;;  %v2537_v12 = vadd.f32 %v2505_v39, %v2340_v62  ;;  %4339 = vmatmul.mubr.msk.bf16.gmra.mxu1 %vm3052_vm0, %v3281_v51  ;;  %v3017_v16 = vpack.c.bf16 %v2990_v3, %v2989_v0  ;;  %v7728_v0 = vld [vmem:[#allocation123_spill] sm:$0xff]  ;;  %v2960_v47 = vld [vmem:[%s7565_s26 + $0x58] sm:$0xff]  ;;  %v7731_v62 = vld [vmem:[#allocation34_spill] sm:$0xff] }
 0x362   : > { %v2449_v8 = vpop.permute.xlu0 %2448  ;;  %v2732_v35 = vadd.f32 %v2700_v10, %v2535_v57  ;;  %v2930_v14 = vadd.f32 %v2898_v61, %v2733_v30  ;;  %4342 = vmatprep.mubr.msk.bf16.mxu1 %vm3052_vm0, %v3282_v17  ;;  %v2702_v58 = vmul.f32 %v5941_v15, %v7727_v50  ;;  %v2144_v34 = vadd.f32 %v2112_v56, %v6454_v41  ;;  %v7729_v3 = vld [vmem:[#allocation77_spill] sm:$0xff]  ;;  %v2961_v56 = vld [vmem:[%s7565_s26 + $0x60] sm:$0xff] }
 0x363   : > { %v2513_v54 = vmul.f32 %v5926_v18, %v2449_v8  ;;  %4303 = vmatmul.mubr.msk.bf16.gmra.mxu0 %vm3052_vm0, %v3016_v25  ;;  %v2928_v20 = vadd.f32 %v2896_v33, %v6477_v42  ;;  %v2506_v22 = vmul.f32 %v5926_v18, %v7728_v0  ;;  %v2703_v2 = vmul.f32 %v5941_v15, %v7729_v3  ;;  %v2964_v27 = vld [vmem:[%s7565_s26 + $0x78] sm:$0xff] }
 0x364   : > { %v6575_v24 = vpop.permute.xlu1 %2428  ;;  %4306 = vmatprep.mubr.msk.bf16.mxu0 %vm3052_vm0, %v3017_v16  ;;  %v2929_v39 = vadd.f32 %v2897_v13, %v2732_v35  ;;  %v2341_v42 = vadd.f32 %v2309_v53, %v2144_v34  ;;  %v2991_v38 = vadd.f32 %v2959_v48, %v2927_v55  ;;  %v2734_v10 = vadd.f32 %v2702_v58, %v2537_v12  ;;  %v2963_v53 = vld [vmem:[%s7565_s26 + $0x70] sm:$0xff]  ;;  %v7734_v0 = vld [vmem:[#allocation13_spill] sm:$0xff] }
 0x365   : > { %v6582_v41 = vadd.f32 %v2513_v54, %v6380_v4  ;;  %4551 = vset.pattern.permute.xlu1 %v7706_v32  ;;  %v2899_v61 = vmul.f32 %v5960_v23, %v7730_v40  ;;  %v2994_v4 = vadd.f32 %v2962_v44, %v2930_v14  ;;  %v2992_v33 = vadd.f32 %v2960_v47, %v2928_v20  ;;  %v7736_v3 = vld [vmem:[#allocation125_spill] sm:$0xff]  ;;  %v6666_v40 = vld [vmem:[%s7331_s5 + $0x3] ss:$0 sm:$0xff] }
 0x366   : > { %1877 = vperm.xlu1 %4551, %v6158_v49   ;;  %v2465_v29 = vpop.permute.xlu0 %2464  ;;  %v2538_v57 = vadd.f32 %v2506_v22, %v2341_v42  ;;  %v2900_v15 = vmul.f32 %v5960_v23, %v7731_v62  ;;  %v3283_v51 = vpack.c.bf16 %v2928_v20, %v2927_v55  ;;  %v2993_v30 = vadd.f32 %v2961_v56, %v2929_v39  ;;  %v6632_v20 = vld [vmem:[%s7331_s5] ss:$0 sm:$0xff]  ;;  %v7735_v22 = vld [vmem:[#allocation116_spill] sm:$0xff] }
 0x367   : > { %v2517_v1 = vmul.f32 %v5926_v18, %v2465_v29  ;;  %v3284_v52 = vpack.c.bf16 %v2930_v14, %v2929_v39  ;;  %v2931_v9 = vadd.f32 %v2899_v61, %v2734_v10  ;;  %v3018_v18 = vpack.c.bf16 %v2992_v33, %v2991_v38  ;;  %v6649_v39 = vld [vmem:[%s7332_s6] ss:$0 sm:$0xff]  ;;  %v7739_v61 = vld [vmem:[#allocation79_spill] sm:$0xff]  ;;  %v6673_v33 = vld [vmem:[%s7331_s5 + $0x4] ss:$0 sm:$0xff] }
 0x368   : > { %v2735_v25 = vadd.f32 %v2703_v2, %v2538_v57  ;;  %v3019_v23 = vpack.c.bf16 %v2994_v4, %v2993_v30  ;;  %v7732_v8 = vmov 3   ;;  %v7733_v54 = vmov 7   ;;  %v7738_v10 = vld [vmem:[#allocation22_spill] sm:$0xff] }
 0x369   : > { %v6597_v13 = vadd.f32 %v2517_v1, %v6407_v37  ;;  %v6599_v17 = vpop.permute.xlu1 %1664  ;;  %4343 = vmatmul.mubr.msk.bf16.gmra.mxu1 %vm3052_vm0, %v3283_v51  ;;  %v2995_v55 = vadd.f32 %v2963_v53, %v2931_v9  ;;  %v7737_v56 = vmov 0   ;;  %v2113_v4 = vmul.f32 %v6666_v40, %v7739_v61  ;;  %v7746_v61 = vld [vmem:[#allocation20_spill] sm:$0xff] }
 0x36a   : > { %4552 = vset.pattern.permute.xlu1 %v7716_v60  ;;  %4346 = vmatprep.mubr.msk.bf16.mxu1 %vm3052_vm0, %v3284_v52  ;;  %v2932_v37 = vadd.f32 %v2900_v15, %v2735_v25  ;;  %v6660_v38 = vpop.permute.xlu0 %2472  ;;  %v2310_v57 = vmul.f32 %v6673_v33, %v6409_v19  ;;  %v7740_v15 = vmov 4   ;;  %v2311_v30 = vmul.f32 %v6673_v33, %v6432_v21  ;;  %v6685_v52 = vld [vmem:[%s7331_s5 + $0x5] ss:$0 sm:$0xff]  ;;  %v6699_v21 = vld [vmem:[%s7331_s5 + $0x6] ss:$0 sm:$0xff] }
 0x36b   : > { %2649 = vperm.xlu1 %4552, %v5819_v5   ;;  %4307 = vmatmul.mubr.msk.bf16.gmra.mxu0 %vm3052_vm0, %v3018_v18  ;;  %v2507_v25 = vmul.f32 %v6685_v52, %v6548_v43 }
 0x36c   : > { %4310 = vmatprep.mubr.msk.bf16.mxu0 %vm3052_vm0, %v3019_v23  ;;  %v2996_v16 = vadd.f32 %v2964_v27, %v2932_v37  ;;  %v3285_v35 = vpack.c.bf16 %v2932_v37, %v2931_v9  ;;  %v7741_v9 = vld [vmem:[#allocation36_spill] sm:$0xff]  ;;  %v2508_v23 = vmul.f32 %v6685_v52, %v6575_v24  ;;  %v7742_v27 = vld [vmem:[#allocation122_spill] sm:$0xff] }
 0x36d   : > { %v1519_v19 = vmul.f32 %v6632_v20, %v7741_v9  ;;  %v6709_v24 = vld [vmem:[%s7331_s5 + $0x7] ss:$0 sm:$0xff] }
 0x36e   : > { %v6613_v12 = vpop.permute.xlu1 %2436  ;;  %v3020_v14 = vpack.c.bf16 %v2996_v16, %v2995_v55  ;;  %v6692_v18 = vpop.permute.xlu0 %2484  ;;  %v7743_v16 = vld [vmem:[#allocation124_spill] sm:$0xff] }
 0x36f   : > { %4553 = vset.pattern.permute.xlu1 %v7732_v8 }
 0x370   : > { %2062 = vperm.xlu1 %4553, %v6128_v36  }
 0x371   : > { %4347 = vmatmul.mubr.msk.bf16.gmra.mxu1 %vm3052_vm0, %v3285_v35  ;;  %v2343_v35 = vadd.f32 %v2311_v30, %v7743_v16 }
 0x373   : > { %v6618_v48 = vpop.permute.xlu1 %1849  ;;  %4311 = vmatmul.mubr.msk.bf16.gmra.mxu0 %vm3052_vm0, %v3020_v14 }
 0x374   : > { %4554 = vset.pattern.permute.xlu1 %v7733_v54 }
 0x375   : > { %2834 = vperm.xlu1 %4554, %v5782_v11   ;;  %v1516_v11 = vmul.f32 %v6632_v20, %v7734_v0 }
 0x377   : > { %v1554_v42 = vadd.f32 %v6649_v39, %v1516_v11 }
 0x378   : > { %v2622_v50 = vpop.permute.xlu1 %2621 }
 0x379   : > { %2838 = vperm.xlu1 %4554, %v7636_v6   ;;  %v6640_v6 = vld [vmem:[%s7331_s5 + $0x1] ss:$0 sm:$0xff]  ;;  %v2704_v37 = vmul.f32 %v6699_v21, %v2622_v50  ;;  %v1557_v50 = vadd.f32 %v6649_v39, %v1519_v19  ;;  %v2313_v19 = vmul.f32 %v6673_v33, %v6491_v28 }
 0x37a   : > { %v1719_v44 = vmul.f32 %v6640_v6, %v7735_v22  ;;  %v1722_v43 = vmul.f32 %v6640_v6, %v7742_v27  ;;  %v7744_v22 = vld [vmem:[#allocation44_spill] sm:$0xff] }
 0x37c   : > { %v2626_v58 = vpop.permute.xlu1 %2625  ;;  %v1751_v29 = vadd.f32 %v1719_v44, %v1554_v42  ;;  %v7745_v44 = vld [vmem:[#allocation10_spill] sm:$0xff] }
 0x37d   : > { %4555 = vset.pattern.permute.xlu1 %v7732_v8  ;;  %v2705_v0 = vmul.f32 %v6699_v21, %v2626_v58  ;;  %v2116_v58 = vmul.f32 %v6666_v40, %v7746_v61 }
 0x37e   : > { %2074 = vperm.xlu1 %4555, %v6158_v49  }
 0x381   : > { %v6626_v34 = vpop.permute.xlu1 %1861 }
 0x382   : > { %4557 = vset.pattern.permute.xlu1 %v7733_v54 }
 0x383   : > { %2846 = vperm.xlu1 %4557, %v5819_v5   ;;  %v6655_v5 = vld [vmem:[%s7331_s5 + $0x2] ss:$0 sm:$0xff] }
 0x384   : > { %v1916_v2 = vmul.f32 %v6655_v5, %v7736_v3  ;;  %v1919_v42 = vmul.f32 %v6655_v5, %v7745_v44  ;;  %v2540_v3 = vadd.f32 %v2508_v23, %v2343_v35  ;;  %v7747_v23 = vld [vmem:[#allocation26_spill] sm:$0xff]  ;;  %v2510_v35 = vmul.f32 %v6685_v52, %v6613_v12 }
 0x386   : > { %v6644_v47 = vpop.permute.xlu1 %2633  ;;  %v1948_v1 = vadd.f32 %v1916_v2, %v1751_v29  ;;  %v1754_v29 = vadd.f32 %v1722_v43, %v1557_v50 }
 0x387   : > { %4558 = vset.pattern.permute.xlu1 %v7737_v56 }
 0x388   : > { %1478 = vperm.xlu1 %4558, %v7738_v10   ;;  %v2145_v51 = vadd.f32 %v2113_v4, %v1948_v1  ;;  %v2509_v4 = vmul.f32 %v6685_v52, %v6538_v63  ;;  %v2630_v1 = vpop.permute.xlu0 %2629  ;;  %v1951_v9 = vadd.f32 %v1919_v42, %v1754_v29  ;;  %v2966_v63 = vld [vmem:[%s7565_s26 + $0x88] sm:$0xff]  ;;  %v2707_v42 = vmul.f32 %v6699_v21, %v6644_v47  ;;  %v2967_v47 = vld [vmem:[%s7565_s26 + $0x90] sm:$0xff] }
 0x38a   : > { %v2342_v53 = vadd.f32 %v2310_v57, %v2145_v51  ;;  %v2737_v51 = vadd.f32 %v2705_v0, %v2540_v3  ;;  %v2148_v43 = vadd.f32 %v2116_v58, %v1951_v9 }
 0x38b   : > { %v6677_v62 = vpop.permute.xlu1 %2046 }
 0x38c   : > { %4559 = vset.pattern.permute.xlu1 %v7740_v15  ;;  %v2539_v14 = vadd.f32 %v2507_v25, %v2342_v53  ;;  %v2965_v53 = vld [vmem:[%s7565_s26 + $0x80] sm:$0xff]  ;;  %v2345_v50 = vadd.f32 %v2313_v19, %v2148_v43 }
 0x38d   : > { %2259 = vperm.xlu1 %4559, %v6128_v36  }
 0x38e   : > { %v2736_v2 = vadd.f32 %v2704_v37, %v2539_v14  ;;  %v2706_v37 = vmul.f32 %v6699_v21, %v2630_v1  ;;  %v2542_v29 = vadd.f32 %v2510_v35, %v2345_v50 }
 0x390   : > { %v2819_v55 = vpop.permute.xlu1 %2818 }
 0x391   : > { %v2901_v11 = vmul.f32 %v6709_v24, %v2819_v55  ;;  %2263 = vperm.xlu1 %4559, %v7744_v22   ;;  %v7748_v55 = vld [vmem:[#allocation28_spill] sm:$0xff] }
 0x392   : > { %v2541_v16 = vadd.f32 %v2509_v4, %v7748_v55  ;;  %v2739_v4 = vadd.f32 %v2707_v42, %v2542_v29 }
 0x393   : > { %v2933_v30 = vadd.f32 %v2901_v11, %v2736_v2  ;;  %v7749_v2 = vld [vmem:[#allocation39_spill] sm:$0xff] }
 0x394   : > { %v2823_v57 = vpop.permute.xlu1 %2822  ;;  %v2738_v44 = vadd.f32 %v2706_v37, %v2541_v16  ;;  %v2903_v12 = vmul.f32 %v6709_v24, %v7749_v2 }
 0x395   : > { %v2902_v25 = vmul.f32 %v6709_v24, %v2823_v57  ;;  %4561 = vset.pattern.permute.xlu1 %v7737_v56  ;;  %v2997_v28 = vadd.f32 %v2965_v53, %v2933_v30  ;;  %v2968_v57 = vld [vmem:[%s7565_s26 + $0x98] sm:$0xff] }
 0x396   : > { %1493 = vperm.xlu1 %4561, %v7747_v23   ;;  %v2935_v58 = vadd.f32 %v2903_v12, %v2738_v44 }
 0x397   : > { %v2934_v27 = vadd.f32 %v2902_v25, %v2737_v51 }
 0x399   : > { %v2998_v14 = vadd.f32 %v2966_v63, %v2934_v27  ;;  %v3286_v0 = vpack.c.bf16 %v2934_v27, %v2933_v30  ;;  %v6735_v11 = vpop.permute.xlu1 %2058  ;;  %v2999_v30 = vadd.f32 %v2967_v47, %v2935_v58 }
 0x39a   : > { %4562 = vset.pattern.permute.xlu1 %v7740_v15 }
 0x39b   : > { %2271 = vperm.xlu1 %4562, %v6158_v49   ;;  %4350 = vmatprep.mubr.msk.bf16.mxu1 %vm3052_vm0, %v3286_v0  ;;  %v3021_v3 = vpack.c.bf16 %v2998_v14, %v2997_v28 }
 0x39d   : > { %4314 = vmatprep.mubr.msk.bf16.mxu0 %vm3052_vm0, %v3021_v3 }
 0x39e   : > { %v2831_v61 = vpop.permute.xlu1 %2830 }
 0x39f   : > { %v2904_v1 = vmul.f32 %v6709_v24, %v2831_v61  ;;  %4563 = vset.pattern.permute.xlu1 %v7418_v45 }
 0x3a0   : > { %1684 = vperm.xlu1 %4563, %v7738_v10  }
 0x3a1   : > { %v2936_v51 = vadd.f32 %v2904_v1, %v2739_v4 }
 0x3a3   : > { %v3000_v25 = vadd.f32 %v2968_v57, %v2936_v51  ;;  %v3287_v9 = vpack.c.bf16 %v2936_v51, %v2935_v58  ;;  %v1459_v19 = vpop.permute.xlu1 %1458  ;;  %v1520_v57 = vmul.f32 %v6632_v20, %v6372_v7  ;;  %v1723_v51 = vmul.f32 %v6640_v6, %v6518_v26 }
 0x3a4   : > { %4564 = vset.pattern.permute.xlu1 %v7454_v46  ;;  %v1524_v44 = vmul.f32 %v6632_v20, %v1459_v19  ;;  %v2117_v7 = vmul.f32 %v6666_v40, %v6677_v62 }
 0x3a5   : > { %2456 = vperm.xlu1 %4564, %v6128_v36   ;;  %4351 = vmatmul.mubr.msk.bf16.gmra.mxu1 %vm3052_vm0, %v3287_v9  ;;  %v3022_v53 = vpack.c.bf16 %v3000_v25, %v2999_v30  ;;  %v1558_v30 = vadd.f32 %v6649_v39, %v1520_v57 }
 0x3a6   : > { %v1562_v3 = vadd.f32 %v6649_v39, %v1524_v44 }
 0x3a7   : > { %4315 = vmatmul.mubr.msk.bf16.gmra.mxu0 %vm3052_vm0, %v3022_v53  ;;  %v1755_v25 = vadd.f32 %v1723_v51, %v1558_v30  ;;  %v7750_v53 = vld [vmem:[#allocation47_spill] sm:$0xff] }
 0x3a8   : > { %v2244_v63 = vpop.permute.xlu1 %2243  ;;  %v2970_v51 = vld [vmem:[%s7565_s26 + $0xa8] sm:$0xff] }
 0x3a9   : > { %2460 = vperm.xlu1 %4564, %v7744_v22  }
 0x3ac   : > { %v2248_v37 = vpop.permute.xlu1 %2247 }
 0x3ad   : > { %4566 = vset.pattern.permute.xlu1 %v7418_v45 }
 0x3ae   : > { %1696 = vperm.xlu1 %4566, %v7747_v23  }
 0x3b1   : > { %v1474_v27 = vpop.permute.xlu1 %1473 }
 0x3b2   : > { %4567 = vset.pattern.permute.xlu1 %v7454_v46  ;;  %v1527_v35 = vmul.f32 %v6632_v20, %v1474_v27 }
 0x3b3   : > { %2468 = vperm.xlu1 %4567, %v6158_v49  }
 0x3b4   : > { %v1565_v14 = vadd.f32 %v6649_v39, %v1527_v35 }
 0x3b6   : > { %v6763_v43 = vpop.permute.xlu1 %2255 }
 0x3b7   : > { %4568 = vset.pattern.permute.xlu1 %v7706_v32 }
 0x3b8   : > { %1881 = vperm.xlu1 %4568, %v7738_v10  }
 0x3bb   : > { %v1669_v55 = vpop.permute.xlu1 %1668 }
 0x3bc   : > { %4569 = vset.pattern.permute.xlu1 %v7716_v60 }
 0x3bd   : > { %2653 = vperm.xlu1 %4569, %v6128_v36  }
 0x3c0   : > { %v2441_v16 = vpop.permute.xlu1 %2440 }
 0x3c1   : > { %2657 = vperm.xlu1 %4569, %v7744_v22  }
 0x3c4   : > { %v2445_v45 = vpop.permute.xlu1 %2444 }
 0x3c5   : > { %4571 = vset.pattern.permute.xlu1 %v7706_v32  ;;  %v1727_v32 = vmul.f32 %v6640_v6, %v1669_v55  ;;  %v2315_v55 = vmul.f32 %v6673_v33, %v2248_v37  ;;  %v2512_v62 = vmul.f32 %v6685_v52, %v2445_v45  ;;  %v1923_v45 = vmul.f32 %v6655_v5, %v6626_v34  ;;  %v2969_v34 = vld [vmem:[%s7565_s26 + $0xa0] sm:$0xff] }
 0x3c6   : > { %1893 = vperm.xlu1 %4571, %v7747_v23  }
 0x3c7   : > { %v1759_v12 = vadd.f32 %v1727_v32, %v1562_v3 }
 0x3c9   : > { %v1681_v28 = vpop.permute.xlu1 %1680 }
 0x3ca   : > { %v1730_v0 = vmul.f32 %v6640_v6, %v1681_v28  ;;  %4572 = vset.pattern.permute.xlu1 %v7716_v60 }
 0x3cb   : > { %2665 = vperm.xlu1 %4572, %v6158_v49  }
 0x3cc   : > { %v1762_v50 = vadd.f32 %v1730_v0, %v1565_v14  ;;  %v1726_v14 = vmul.f32 %v6640_v6, %v6599_v17  ;;  %v2120_v17 = vmul.f32 %v6666_v40, %v6735_v11 }
 0x3ce   : > { %v6778_v42 = vpop.permute.xlu1 %2452 }
 0x3cf   : > { %4573 = vset.pattern.permute.xlu1 %v7732_v8 }
 0x3d0   : > { %2078 = vperm.xlu1 %4573, %v7738_v10  }
 0x3d3   : > { %v1866_v2 = vpop.permute.xlu1 %1865 }
 0x3d4   : > { %v1924_v29 = vmul.f32 %v6655_v5, %v1866_v2  ;;  %4574 = vset.pattern.permute.xlu1 %v7733_v54 }
 0x3d5   : > { %2850 = vperm.xlu1 %4574, %v6128_v36  }
 0x3d6   : > { %v1956_v61 = vadd.f32 %v1924_v29, %v1759_v12  ;;  %v2646_v29 = vpop.permute.xlu0 %2645 }
 0x3d7   : > { %v2710_v11 = vmul.f32 %v6699_v21, %v2646_v29 }
 0x3d8   : > { %v2638_v58 = vpop.permute.xlu1 %2637 }
 0x3d9   : > { %2854 = vperm.xlu1 %4574, %v7744_v22  }
 0x3dc   : > { %v2642_v4 = vpop.permute.xlu1 %2641 }
 0x3dd   : > { %4576 = vset.pattern.permute.xlu1 %v7732_v8  ;;  %v1920_v8 = vmul.f32 %v6655_v5, %v6618_v48  ;;  %v2511_v48 = vmul.f32 %v6685_v52, %v2441_v16  ;;  %v2709_v16 = vmul.f32 %v6699_v21, %v2642_v4 }
 0x3de   : > { %2090 = vperm.xlu1 %4576, %v7747_v23  }
 0x3df   : > { %v1952_v9 = vadd.f32 %v1920_v8, %v1755_v25  ;;  %v2514_v25 = vmul.f32 %v6685_v52, %v6778_v42 }
 0x3e1   : > { %v1878_v1 = vpop.permute.xlu1 %1877  ;;  %v2149_v27 = vadd.f32 %v2117_v7, %v1952_v9 }
 0x3e2   : > { %v1927_v47 = vmul.f32 %v6655_v5, %v1878_v1  ;;  %4577 = vset.pattern.permute.xlu1 %v7733_v54 }
 0x3e3   : > { %2862 = vperm.xlu1 %4577, %v6158_v49   ;;  %v2314_v49 = vmul.f32 %v6673_v33, %v2244_v63  ;;  %v2708_v63 = vmul.f32 %v6699_v21, %v2638_v58 }
 0x3e4   : > { %v1959_v36 = vadd.f32 %v1927_v47, %v1762_v50  ;;  %v7751_v50 = vld [vmem:[#allocation126_spill] sm:$0xff]  ;;  %v7752_v47 = vld [vmem:[#allocation45_spill] sm:$0xff] }
 0x3e5   : > { %v2346_v28 = vadd.f32 %v2314_v49, %v2149_v27  ;;  %v2347_v37 = vadd.f32 %v2315_v55, %v7751_v50  ;;  %v2742_v27 = vadd.f32 %v2710_v11, %v6582_v41 }
 0x3e6   : > { %v2650_v22 = vpop.permute.xlu1 %2649 }
 0x3e7   : > { %4578 = vset.pattern.permute.xlu1 %v7740_v15  ;;  %v1523_v15 = vmul.f32 %v6632_v20, %v6458_v59  ;;  %v2543_v44 = vadd.f32 %v2511_v48, %v2346_v28  ;;  %v2544_v3 = vadd.f32 %v2512_v62, %v2347_v37  ;;  %v2711_v48 = vmul.f32 %v6699_v21, %v2650_v22  ;;  %v7753_v28 = vld [vmem:[#allocation41_spill] sm:$0xff] }
 0x3e8   : > { %2275 = vperm.xlu1 %4578, %v7738_v10   ;;  %v2907_v42 = vmul.f32 %v6709_v24, %v7753_v28 }
 0x3e9   : > { %v1561_v32 = vadd.f32 %v6649_v39, %v1523_v15  ;;  %v2740_v2 = vadd.f32 %v2708_v63, %v2543_v44  ;;  %v2741_v58 = vadd.f32 %v2709_v16, %v2544_v3 }
 0x3ea   : > { %v2939_v41 = vadd.f32 %v2907_v42, %v2742_v27 }
 0x3eb   : > { %v2063_v19 = vpop.permute.xlu1 %2062  ;;  %v1758_v12 = vadd.f32 %v1726_v14, %v1561_v32 }
 0x3ec   : > { %v2121_v26 = vmul.f32 %v6666_v40, %v2063_v19  ;;  %2283 = vperm.xlu1 %4578, %v7750_v53  }
 0x3ed   : > { %v1955_v57 = vadd.f32 %v1923_v45, %v1758_v12 }
 0x3ee   : > { %v6811_v35 = vadd.f32 %v2121_v26, %v1956_v61 }
 0x3ef   : > { %v2152_v8 = vadd.f32 %v2120_v17, %v1955_v57 }
 0x3f0   : > { %v2835_v0 = vpop.permute.xlu1 %2834  ;;  %2287 = vperm.xlu1 %4578, %v7747_v23  }
 0x3f1   : > { %v2905_v59 = vmul.f32 %v6709_v24, %v2835_v0  ;;  %v2972_v0 = vld [vmem:[%s7565_s26 + $0xb8] sm:$0xff] }
 0x3f3   : > { %v2937_v1 = vadd.f32 %v2905_v59, %v2740_v2 }
 0x3f4   : > { %v2839_v61 = vpop.permute.xlu1 %2838  ;;  %4580 = vset.pattern.permute.xlu1 %v7454_v46  ;;  %v2317_v46 = vmul.f32 %v6673_v33, %v6763_v43 }
 0x3f5   : > { %v2906_v4 = vmul.f32 %v6709_v24, %v2839_v61  ;;  %2476 = vperm.xlu1 %4580, %v7752_v47   ;;  %v3001_v7 = vadd.f32 %v2969_v34, %v2937_v1 }
 0x3f6   : > { %v2349_v55 = vadd.f32 %v2317_v46, %v2152_v8 }
 0x3f7   : > { %v2938_v30 = vadd.f32 %v2906_v4, %v2741_v58 }
 0x3f8   : > { %v2546_v62 = vadd.f32 %v2514_v25, %v2349_v55 }
 0x3f9   : > { %v3002_v9 = vadd.f32 %v2970_v51, %v2938_v30  ;;  %v3288_v49 = vpack.c.bf16 %v2938_v30, %v2937_v1  ;;  %v2075_v19 = vpop.permute.xlu1 %2074  ;;  %2480 = vperm.xlu1 %4580, %v7750_v53  }
 0x3fa   : > { %v2124_v26 = vmul.f32 %v6666_v40, %v2075_v19  ;;  %v2743_v14 = vadd.f32 %v2711_v48, %v2546_v62 }
 0x3fb   : > { %v3023_v15 = vpack.c.bf16 %v3002_v9, %v3001_v7  ;;  %4354 = vmatprep.mubr.msk.bf16.mxu1 %vm3052_vm0, %v3288_v49 }
 0x3fc   : > { %v6845_v43 = vadd.f32 %v2124_v26, %v1959_v36  ;;  %v2971_v36 = vld [vmem:[%s7565_s26 + $0xb0] sm:$0xff] }
 0x3fd   : > { %4582 = vset.pattern.permute.xlu1 %v7716_v60  ;;  %4318 = vmatprep.mubr.msk.bf16.mxu0 %vm3052_vm0, %v3023_v15  ;;  %v3003_v60 = vadd.f32 %v2971_v36, %v2939_v41 }
 0x3fe   : > { %v2847_v63 = vpop.permute.xlu1 %2846  ;;  %2669 = vperm.xlu1 %4582, %v7738_v10  }
 0x3ff   : > { %v2908_v22 = vmul.f32 %v6709_v24, %v2847_v63 }
 0x401   : > { %v2940_v50 = vadd.f32 %v2908_v22, %v2743_v14 }
 0x402   : > { %2677 = vperm.xlu1 %4582, %v7750_v53  }
 0x403   : > { %v3004_v37 = vadd.f32 %v2972_v0, %v2940_v50  ;;  %v3289_v44 = vpack.c.bf16 %v2940_v50, %v2939_v41  ;;  %v1479_v16 = vpop.permute.xlu1 %1478 }
 0x404   : > { %v1528_v2 = vmul.f32 %v6632_v20, %v1479_v16 }
 0x405   : > { %v3024_v10 = vpack.c.bf16 %v3004_v37, %v3003_v60  ;;  %4355 = vmatmul.mubr.msk.bf16.gmra.mxu1 %vm3052_vm0, %v3289_v44 }
 0x406   : > { %2681 = vperm.xlu1 %4582, %v7747_v23   ;;  %v1566_v17 = vadd.f32 %v6649_v39, %v1528_v2 }
 0x407   : > { %4319 = vmatmul.mubr.msk.bf16.gmra.mxu0 %vm3052_vm0, %v3024_v10 }
 0x408   : > { %v6863_v59 = vpop.permute.xlu1 %2259 }
 0x40a   : > { %4584 = vset.pattern.permute.xlu1 %v7733_v54  ;;  %v6877_v54 = vld [vmem:[%s7336_s10] ss:$0 sm:$0xff] }
 0x40b   : > { %2870 = vperm.xlu1 %4584, %v7752_v47  }
 0x40c   : > { %v6867_v32 = vpop.permute.xlu1 %2263 }
 0x40f   : > { %2874 = vperm.xlu1 %4584, %v7750_v53   ;;  %v6883_v53 = vld [vmem:[%s7334_s8] ss:$0 sm:$0xff] }
 0x411   : > { %v1494_v45 = vpop.permute.xlu1 %1493 }
 0x412   : > { %v1531_v63 = vmul.f32 %v6632_v20, %v1494_v45 }
 0x414   : > { %v1569_v44 = vadd.f32 %v6649_v39, %v1531_v63  ;;  %v2318_v63 = vmul.f32 %v6673_v33, %v6863_v59 }
 0x416   : > { %v6870_v3 = vpop.permute.xlu1 %2271 }
 0x419   : > { %v4336_v12 = vpop.f32.mrf.mxu1 }
 0x41a   : > { %v6886_v57 = vadd.f32 %v4336_v12, %v6877_v54 }
 0x41b   : > { %v1685_v29 = vpop.permute.xlu1 %1684  ;;  %v4300_v23 = vpop.f32.mrf.mxu0 }
 0x41c   : > { %v1731_v61 = vmul.f32 %v6640_v6, %v1685_v29  ;;  %v3399_v58 = vpop.f32.mrf.mxu1  ;;  %v6892_v11 = vadd.f32 %v4300_v23, %v6883_v53 }
 0x41d   : > { %v3135_v1 = vpop.f32.mrf.mxu0  ;;  %v6898_v25 = vadd.f32 %v6877_v54, %v3399_v58 }
 0x41e   : > { %v1763_v4 = vadd.f32 %v1731_v61, %v1566_v17  ;;  %v4337_v47 = vpop.f32.mrf.mxu1  ;;  %7754 = vst [vmem:[#allocation27_spill] sm:$0xff] %v6892_v11  ;;  %v6906_v19 = vadd.f32 %v6883_v53, %v3135_v1 }
 0x41f   : > { %v6889_v34 = vadd.f32 %v4337_v47, %v6877_v54  ;;  %v4301_v51 = vpop.f32.mrf.mxu0 }
 0x420   : > { %v6895_v46 = vadd.f32 %v4301_v51, %v6883_v53  ;;  %v3402_v30 = vpop.f32.mrf.mxu1  ;;  %v2457_v8 = vpop.permute.xlu1 %2456  ;;  %7756 = vst [vmem:[#allocation43_spill] sm:$0xff] %v6906_v19 }
 0x421   : > { %v6903_v9 = vadd.f32 %v6877_v54, %v3402_v30  ;;  %v3138_v49 = vpop.f32.mrf.mxu0 }
 0x422   : > { %7755 = vst [vmem:[#allocation40_spill] sm:$0xff] %v6895_v46  ;;  %v6911_v27 = vadd.f32 %v6883_v53, %v3138_v49  ;;  %v4340_v55 = vpop.f32.mrf.mxu1 }
 0x423   : > { %v4304_v15 = vpop.f32.mrf.mxu0  ;;  %v6919_v22 = vadd.f32 %v4340_v55, %v6877_v54 }
 0x424   : > { %7757 = vst [vmem:[#allocation31_spill] sm:$0xff] %v6911_v27  ;;  %v3415_v42 = vpop.f32.mrf.mxu1  ;;  %v2461_v62 = vpop.permute.xlu1 %2460  ;;  %v6925_v50 = vadd.f32 %v4304_v15, %v6883_v53 }
 0x425   : > { %v3151_v41 = vpop.f32.mrf.mxu0  ;;  %v6932_v20 = vadd.f32 %v6877_v54, %v3415_v42 }
 0x426   : > { %v4341_v14 = vpop.f32.mrf.mxu1  ;;  %7758 = vst [vmem:[#allocation33_spill] sm:$0xff] %v6925_v50  ;;  %v6940_v12 = vadd.f32 %v6883_v53, %v3151_v41 }
 0x427   : > { %v6922_v36 = vadd.f32 %v4341_v14, %v6877_v54  ;;  %v4305_v0 = vpop.f32.mrf.mxu0  ;;  %v2662_v14 = vpop.permute.xlu0 %2661 }
 0x428   : > { %v6928_v60 = vadd.f32 %v4305_v0, %v6883_v53  ;;  %v3418_v37 = vpop.f32.mrf.mxu1  ;;  %7760 = vst [vmem:[#allocation46_spill] sm:$0xff] %v6940_v12  ;;  %v2319_v0 = vmul.f32 %v6673_v33, %v6867_v32 }
 0x429   : > { %v6937_v10 = vadd.f32 %v6877_v54, %v3418_v37  ;;  %v1697_v45 = vpop.permute.xlu1 %1696  ;;  %v3154_v2 = vpop.f32.mrf.mxu0  ;;  %v2515_v37 = vmul.f32 %v6685_v52, %v2457_v8 }
 0x42a   : > { %7759 = vst [vmem:[#allocation55_spill] sm:$0xff] %v6928_v60  ;;  %v1734_v23 = vmul.f32 %v6640_v6, %v1697_v45  ;;  %v6946_v39 = vadd.f32 %v6883_v53, %v3154_v2  ;;  %v2516_v45 = vmul.f32 %v6685_v52, %v2461_v62 }
 0x42b   : > { %v6959_v42 = vpop.f32.mrf.mxu0  ;;  %v6976_v58 = vpop.permute.xlu0 %2673 }
 0x42c   : > { %7761 = vst [vmem:[#allocation49_spill] sm:$0xff] %v6946_v39  ;;  %v6950_v61 = vadd.f32 %v1734_v23, %v1569_v44 }
 0x42d   : > { %v6966_v44 = vpop.f32.mrf.mxu0 }
 0x42e   : > { %v2469_v1 = vpop.permute.xlu1 %2468 }
 0x42f   : > { %v6972_v59 = vpop.f32.mrf.mxu0 }
 0x433   : > { %v1882_v47 = vpop.permute.xlu1 %1881 }
 0x434   : > { %v1928_v51 = vmul.f32 %v6655_v5, %v1882_v47  ;;  %v7762_v47 = vld [vmem:[#allocation73_spill] sm:$0xff] }
 0x436   : > { %v6955_v30 = vadd.f32 %v1928_v51, %v1763_v4  ;;  %v2350_v4 = vadd.f32 %v2318_v63, %v6811_v35  ;;  %v2351_v51 = vadd.f32 %v2319_v0, %v7762_v47  ;;  %v6978_v35 = vpop.f32.mrf.mxu0  ;;  %v2973_v0 = vld [vmem:[%s7565_s26 + $0xc0] sm:$0xff] }
 0x438   : > { %v2654_v49 = vpop.permute.xlu1 %2653  ;;  %v2547_v28 = vadd.f32 %v2515_v37, %v2350_v4  ;;  %v2548_v8 = vadd.f32 %v2516_v45, %v2351_v51  ;;  %v2321_v37 = vmul.f32 %v6673_v33, %v6870_v3  ;;  %v2859_v45 = vpop.permute.xlu0 %2858 }
 0x439   : > { %v2712_v2 = vmul.f32 %v6699_v21, %v2654_v49  ;;  %v2911_v51 = vmul.f32 %v6709_v24, %v2859_v45 }
 0x43b   : > { %v2744_v29 = vadd.f32 %v2712_v2, %v2547_v28  ;;  %v2714_v28 = vmul.f32 %v6699_v21, %v2662_v14 }
 0x43c   : > { %v2658_v55 = vpop.permute.xlu1 %2657 }
 0x43d   : > { %v2713_v26 = vmul.f32 %v6699_v21, %v2658_v55  ;;  %v2974_v55 = vld [vmem:[%s7565_s26 + $0xc8] sm:$0xff]  ;;  %v2746_v3 = vadd.f32 %v2714_v28, %v6597_v13  ;;  %v2976_v13 = vld [vmem:[%s7565_s26 + $0xd8] sm:$0xff] }
 0x43f   : > { %v2745_v62 = vadd.f32 %v2713_v26, %v2548_v8  ;;  %v2518_v26 = vmul.f32 %v6685_v52, %v2469_v1 }
 0x441   : > { %v6957_v6 = vpop.permute.xlu1 %1893 }
 0x446   : > { %v2666_v15 = vpop.permute.xlu1 %2665 }
 0x447   : > { %v2715_v8 = vmul.f32 %v6699_v21, %v2666_v15 }
 0x44b   : > { %v2079_v41 = vpop.permute.xlu1 %2078 }
 0x44c   : > { %v2125_v15 = vmul.f32 %v6666_v40, %v2079_v41  ;;  %v2519_v41 = vmul.f32 %v6685_v52, %v6660_v38 }
 0x450   : > { %v2851_v23 = vpop.permute.xlu1 %2850 }
 0x451   : > { %v2909_v32 = vmul.f32 %v6709_v24, %v2851_v23 }
 0x453   : > { %v2941_v63 = vadd.f32 %v2909_v32, %v2744_v29  ;;  %v6991_v29 = vpop.f32.mrf.mxu0  ;;  %v2353_v32 = vadd.f32 %v2321_v37, %v6845_v43  ;;  %v2975_v43 = vld [vmem:[%s7565_s26 + $0xd0] sm:$0xff] }
 0x454   : > { %v2855_v48 = vpop.permute.xlu1 %2854  ;;  %v3192_v56 = vadd.f32 %v6991_v29, %v6883_v53 }
 0x455   : > { %v2910_v49 = vmul.f32 %v6709_v24, %v2855_v48  ;;  %v3005_v48 = vadd.f32 %v2973_v0, %v2941_v63  ;;  %v2550_v14 = vadd.f32 %v2518_v26, %v2353_v32  ;;  %v2157_v26 = vadd.f32 %v2125_v15, %v6955_v30 }
 0x456   : > { %v2522_v15 = vmul.f32 %v6685_v52, %v6692_v18 }
 0x457   : > { %v2942_v4 = vadd.f32 %v2910_v49, %v2745_v62  ;;  %v6998_v62 = vpop.f32.mrf.mxu0  ;;  %v2943_v49 = vadd.f32 %v2911_v51, %v2746_v3  ;;  %v1931_v51 = vmul.f32 %v6655_v5, %v6957_v6 }
 0x459   : > { %v3006_v2 = vadd.f32 %v2974_v55, %v2942_v4  ;;  %v3290_v23 = vpack.c.bf16 %v2942_v4, %v2941_v63  ;;  %v2091_v47 = vpop.permute.xlu1 %2090  ;;  %v2747_v63 = vadd.f32 %v2715_v8, %v2550_v14  ;;  %v7009_v55 = vpop.f32.mrf.mxu0  ;;  %v3007_v4 = vadd.f32 %v2975_v43, %v2943_v49 }
 0x45a   : > { %v2128_v30 = vmul.f32 %v6666_v40, %v2091_v47  ;;  %v3195_v47 = vadd.f32 %v7009_v55, %v6883_v53 }
 0x45b   : > { %v3025_v7 = vpack.c.bf16 %v3006_v2, %v3005_v48  ;;  %4358 = vmatprep.mubr.msk.bf16.mxu1 %vm3052_vm0, %v3290_v23  ;;  %v7013_v2 = vpop.f32.mrf.mxu0 }
 0x45d   : > { %4322 = vmatprep.mubr.msk.bf16.mxu0 %vm3052_vm0, %v3025_v7 }
 0x45e   : > { %v2863_v1 = vpop.permute.xlu1 %2862 }
 0x45f   : > { %v2912_v0 = vmul.f32 %v6709_v24, %v2863_v1 }
 0x461   : > { %v2944_v37 = vadd.f32 %v2912_v0, %v2747_v63 }
 0x463   : > { %v3008_v7 = vadd.f32 %v2976_v13, %v2944_v37  ;;  %v3291_v28 = vpack.c.bf16 %v2944_v37, %v2943_v49  ;;  %v2276_v45 = vpop.permute.xlu1 %2275  ;;  %v1963_v49 = vadd.f32 %v1931_v51, %v6950_v61 }
 0x464   : > { %v2322_v48 = vmul.f32 %v6673_v33, %v2276_v45 }
 0x465   : > { %v3026_v23 = vpack.c.bf16 %v3008_v7, %v3007_v4  ;;  %4359 = vmatmul.mubr.msk.bf16.gmra.mxu1 %vm3052_vm0, %v3291_v28  ;;  %v2160_v43 = vadd.f32 %v2128_v30, %v1963_v49  ;;  %v2717_v30 = vmul.f32 %v6699_v21, %v6976_v58 }
 0x466   : > { %v2354_v32 = vadd.f32 %v2322_v48, %v2157_v26  ;;  %v2867_v26 = vpop.permute.xlu0 %2866 }
 0x467   : > { %v2284_v8 = vpop.permute.xlu1 %2283  ;;  %v4316_v3 = vpop.f32.mrf.mxu0  ;;  %4323 = vmatmul.mubr.msk.bf16.gmra.mxu0 %vm3052_vm0, %v3026_v23 }
 0x468   : > { %v2551_v14 = vadd.f32 %v2519_v41, %v2354_v32  ;;  %v7026_v38 = vadd.f32 %v4316_v3, %v6883_v53  ;;  %v2324_v23 = vmul.f32 %v6673_v33, %v2284_v8  ;;  %v2913_v32 = vmul.f32 %v6709_v24, %v2867_v26 }
 0x469   : > { %v7022_v1 = vpop.f32.mrf.mxu0 }
 0x46a   : > { %7763 = vst [vmem:[#allocation32_spill] sm:$0xff] %v7022_v1  ;;  %7764 = vst [vmem:[#allocation35_spill] sm:$0xff] %v7026_v38  ;;  %v2879_v49 = vpop.permute.xlu0 %2878 }
 0x46b   : > { %v2288_v63 = vpop.permute.xlu1 %2287  ;;  %v4317_v0 = vpop.f32.mrf.mxu0  ;;  %v2916_v58 = vmul.f32 %v6709_v24, %v2879_v49 }
 0x46c   : > { %v2325_v5 = vmul.f32 %v6673_v33, %v2288_v63  ;;  %v7030_v6 = vadd.f32 %v4317_v0, %v6883_v53  ;;  %v7766_v63 = vld [vmem:[#allocation101_spill] sm:$0xff] }
 0x46d   : > { %v2356_v0 = vadd.f32 %v2324_v23, %v7766_v63 }
 0x46e   : > { %7765 = vst [vmem:[#allocation30_spill] sm:$0xff] %v7030_v6  ;;  %v2357_v40 = vadd.f32 %v2325_v5, %v2160_v43 }
 0x470   : > { %v2477_v13 = vpop.permute.xlu1 %2476  ;;  %v2554_v61 = vadd.f32 %v2522_v15, %v2357_v40 }
 0x471   : > { %v2520_v45 = vmul.f32 %v6685_v52, %v2477_v13 }
 0x473   : > { %v2552_v18 = vadd.f32 %v2520_v45, %v6430_v31  ;;  %v2977_v31 = vld [vmem:[%s7565_s26 + $0xe0] sm:$0xff] }
 0x474   : > { %v2481_v37 = vpop.permute.xlu1 %2480 }
 0x475   : > { %v2521_v3 = vmul.f32 %v6685_v52, %v2481_v37  ;;  %v2749_v8 = vadd.f32 %v2717_v30, %v2552_v18  ;;  %v2978_v52 = vld [vmem:[%s7565_s26 + $0xe8] sm:$0xff] }
 0x477   : > { %v2553_v40 = vadd.f32 %v2521_v3, %v2356_v0  ;;  %v3542_v0 = vld [vmem:[%s7767_s24] sm:$0xff] }
 0x479   : > { %v2670_v4 = vpop.permute.xlu1 %2669 }
 0x47a   : > { %v2716_v28 = vmul.f32 %v6699_v21, %v2670_v4 }
 0x47c   : > { %v2748_v41 = vadd.f32 %v2716_v28, %v2551_v14 }
 0x47d   : > { %v2678_v7 = vpop.permute.xlu1 %2677 }
 0x47e   : > { %v2945_v43 = vadd.f32 %v2913_v32, %v2748_v41  ;;  %v2718_v5 = vmul.f32 %v6699_v21, %v2678_v7 }
 0x480   : > { %v3009_v37 = vadd.f32 %v2977_v31, %v2945_v43  ;;  %v2750_v4 = vadd.f32 %v2718_v5, %v2553_v40 }
 0x481   : > { %v2682_v48 = vpop.permute.xlu1 %2681 }
 0x482   : > { %v2719_v51 = vmul.f32 %v6699_v21, %v2682_v48  ;;  %v2979_v48 = vld [vmem:[%s7565_s26 + $0xf0] sm:$0xff] }
 0x484   : > { %v2751_v33 = vadd.f32 %v2719_v51, %v2554_v61  ;;  %v2980_v61 = vld [vmem:[%s7565_s26 + $0xf8] sm:$0xff] }
 0x486   : > { %v2871_v15 = vpop.permute.xlu1 %2870  ;;  %v2948_v7 = vadd.f32 %v2916_v58, %v2751_v33  ;;  %v7089_v58 = vpop.f32.mrf.mxu0 }
 0x487   : > { %v2914_v14 = vmul.f32 %v6709_v24, %v2871_v15  ;;  %7769 = vst [vmem:[#allocation42_spill] sm:$0xff] %v7089_v58  ;;  %v3269_v58 = vpack.c.bf16 %v3195_v47, %v3192_v56 }
 0x488   : > { %v3012_v18 = vadd.f32 %v2980_v61, %v2948_v7 }
 0x489   : > { %v2946_v13 = vadd.f32 %v2914_v14, %v2749_v8 }
 0x48a   : > { %v2875_v21 = vpop.permute.xlu1 %2874 }
 0x48b   : > { %v3010_v28 = vadd.f32 %v2978_v52, %v2946_v13  ;;  %v3292_v45 = vpack.c.bf16 %v2946_v13, %v2945_v43  ;;  %v2915_v26 = vmul.f32 %v6709_v24, %v2875_v21  ;;  %v7066_v24 = vpop.f32.mrf.mxu1  ;;  %v7077_v43 = vpack.c.bf16 %v3542_v0, %v3542_v0 }
 0x48d   : > { %v3027_v23 = vpack.c.bf16 %v3010_v28, %v3009_v37  ;;  %v2947_v41 = vadd.f32 %v2915_v26, %v2750_v4  ;;  %4362 = vmatprep.mubr.msk.bf16.mxu1 %vm3052_vm0, %v3292_v45  ;;  %v7068_v30 = vpop.f32.mrf.mxu1  ;;  %7768 = vst [vmem:[#allocation52_spill] sm:$0xff] %v7077_v43 }
 0x48f   : > { %v3011_v51 = vadd.f32 %v2979_v48, %v2947_v41  ;;  %v3293_v32 = vpack.c.bf16 %v2948_v7, %v2947_v41  ;;  %4326 = vmatprep.mubr.msk.bf16.mxu0 %vm3052_vm0, %v3027_v23  ;;  %v7070_v49 = vpop.f32.mrf.mxu1 }
 0x491   : > { %v3028_v3 = vpack.c.bf16 %v3012_v18, %v3011_v51  ;;  %4363 = vmatmul.mubr.msk.bf16.gmra.mxu1 %vm3052_vm0, %v3293_v32  ;;  %v7072_v63 = vpop.f32.mrf.mxu1 }
 0x493   : > { %4327 = vmatmul.mubr.msk.bf16.gmra.mxu0 %vm3052_vm0, %v3028_v3  ;;  %v4348_v5 = vpop.f32.mrf.mxu1 }
 0x494   : > { %4255 = vmatprep.mubr.msk.bf16.mxu0 %vm3052_vm0, %v7077_v43  ;;  %v3456_v1 = vadd.f32 %v4348_v5, %v6877_v54 }
 0x495   : > { %v3447_v15 = vpop.f32.mrf.mxu1 }
 0x497   : > { %v4349_v31 = vpop.f32.mrf.mxu1 }
 0x498   : > { %v3459_v43 = vadd.f32 %v4349_v31, %v6877_v54 }
 0x499   : > { %v3450_v33 = vpop.f32.mrf.mxu1 }
 0x49a   : > { %v3533_v50 = vpack.c.bf16 %v3459_v43, %v3456_v1  ;;  %v3451_v60 = vadd.f32 %v6877_v54, %v3450_v33 }
 0x49b   : > { %v7081_v8 = vpop.f32.mrf.mxu1 }
 0x49d   : > { %v7083_v14 = vpop.f32.mrf.mxu1 }
 0x49f   : > { %v7085_v40 = vpop.f32.mrf.mxu1 }
 0x4a1   : > { %v7087_v52 = vpop.f32.mrf.mxu1 }
 0x4c5   : > { %v7091_v13 = vpop.f32.mrf.mxu1 }
 0x4c7   : > { %v7093_v37 = vpop.f32.mrf.mxu0  ;;  %v7095_v4 = vpop.f32.mrf.mxu1 }
 0x4c9   : > { %v7097_v21 = vpop.f32.mrf.mxu0  ;;  %v7099_v7 = vpop.f32.mrf.mxu1 }
 0x4cb   : > { %v7101_v28 = vpop.f32.mrf.mxu0  ;;  %v7103_v45 = vpop.f32.mrf.mxu1 }
 0x4cd   : > { %v7105_v26 = vpop.f32.mrf.mxu0 }
 0x525   : > { %v4360_v61 = vpop.f32.mrf.mxu1 }
 0x527   : > { %v4324_v48 = vpop.f32.mrf.mxu0  ;;  %v3495_v23 = vpop.f32.mrf.mxu1 }
 0x529   : > { %v7107_v41 = vpop.f32.mrf.mxu0  ;;  %v4361_v18 = vpop.f32.mrf.mxu1 }
 0x52b   : > { %v4325_v51 = vpop.f32.mrf.mxu0  ;;  %v3498_v32 = vpop.f32.mrf.mxu1 }
 0x52c   : > { %v3243_v33 = vadd.f32 %v4325_v51, %v6883_v53 }
 0x52d   : > { %v7109_v3 = vpop.f32.mrf.mxu0 }
 0x551   : > { %v4364_v0 = vpop.f32.mrf.mxu1 }
 0x552   : > { %v3520_v11 = vadd.f32 %v4364_v0, %v6877_v54  ;;  %v3507_v0 = vadd.f32 %v4361_v18, %v6877_v54  ;;  %v3488_v18 = vadd.f32 %v7091_v13, %v6877_v54  ;;  %v3480_v13 = vadd.f32 %v6877_v54, %v7095_v4 }
 0x553   : > { %v4328_v17 = vpop.f32.mrf.mxu0  ;;  %v3511_v16 = vpop.f32.mrf.mxu1  ;;  %v3472_v4 = vadd.f32 %v7081_v8, %v6877_v54  ;;  %v3227_v8 = vadd.f32 %v7101_v28, %v6883_v53 }
 0x554   : > { %v3256_v38 = vadd.f32 %v4328_v17, %v6883_v53  ;;  %v3512_v12 = vadd.f32 %v6877_v54, %v3511_v16  ;;  %v3448_v16 = vadd.f32 %v6877_v54, %v3447_v15  ;;  %v3496_v15 = vadd.f32 %v6877_v54, %v3495_v23 }
 0x555   : > { %v3247_v19 = vpop.f32.mrf.mxu0  ;;  %v4365_v27 = vpop.f32.mrf.mxu1  ;;  %v3179_v23 = vadd.f32 %v6972_v59, %v6883_v53 }
 0x556   : > { %v3523_v46 = vadd.f32 %v4365_v27, %v6877_v54  ;;  %v3248_v5 = vadd.f32 %v6883_v53, %v3247_v19  ;;  %v3443_v19 = vadd.f32 %v7070_v49, %v6877_v54  ;;  %v3435_v49 = vadd.f32 %v6877_v54, %v7072_v63 }
 0x557   : > { %v4329_v6 = vpop.f32.mrf.mxu0  ;;  %v3514_v55 = vpop.f32.mrf.mxu1 }
 0x558   : > { %v3541_v39 = vpack.c.bf16 %v3523_v46, %v3520_v11  ;;  %v3259_v29 = vadd.f32 %v4329_v6, %v6883_v53  ;;  %v3515_v31 = vadd.f32 %v6877_v54, %v3514_v55  ;;  %v3187_v11 = vadd.f32 %v6883_v53, %v7013_v2 }
 0x559   : > { %v3250_v27 = vpop.f32.mrf.mxu0  ;;  %v3504_v46 = vadd.f32 %v4360_v61, %v6877_v54  ;;  %v3569_v6 = vsel %vm3052_vm0, %v3269_v58, 0  ;;  %v3440_v2 = vadd.f32 %v7066_v24, %v6877_v54  ;;  %v3240_v58 = vadd.f32 %v4324_v48, %v6883_v53 }
 0x55a   : > { %v3277_v56 = vpack.c.bf16 %v3259_v29, %v3256_v38  ;;  %v3540_v47 = vpack.c.bf16 %v3515_v31, %v3512_v12  ;;  %v3251_v17 = vadd.f32 %v6883_v53, %v3250_v27  ;;  %4257 = vmatprep.subr.bf16.mxu1 %v3541_v39  ;;  %v3532_v12 = vpack.c.bf16 %v3451_v60, %v3448_v16  ;;  %v7777_v16 = vld [vmem:[#allocation49_spill] sm:$0xff] }
 0x55b   : > { %4258 = vmatpush3.bf16.msra.mxu1 %v3533_v50  ;;  %v3184_v39 = vadd.f32 %v6883_v53, %v6998_v62  ;;  %v3539_v50 = vpack.c.bf16 %v3507_v0, %v3504_v46  ;;  %v3499_v38 = vadd.f32 %v6877_v54, %v3498_v32  ;;  %v3531_v60 = vpack.c.bf16 %v3443_v19, %v3440_v2  ;;  %v7784_v19 = vld [vmem:[#allocation32_spill] sm:$0xff] }
 0x55c   : > { %v3276_v1 = vpack.c.bf16 %v3251_v17, %v3248_v5  ;;  %4402 = vmatprep.subr.msk.bf16.mxu0 %vm3052_vm0, %v3277_v56  ;;  %4259 = vmatprep.subr.bf16.mxu1 %v3540_v47  ;;  %v3491_v62 = vadd.f32 %v7099_v7, %v6877_v54  ;;  %v3432_v24 = vadd.f32 %v6877_v54, %v7068_v30 }
 0x55d   : > { %4240 = vmatpush3.bf16.xpose.msra.mxu0 %v3569_v6  ;;  %v3268_v43 = vpack.c.bf16 %v3187_v11, %v3184_v39  ;;  %v3538_v61 = vpack.c.bf16 %v3499_v38, %v3496_v15  ;;  %v3275_v51 = vpack.c.bf16 %v3243_v33, %v3240_v58  ;;  %v3176_v7 = vadd.f32 %v6959_v42, %v6883_v53  ;;  %v7778_v11 = vld [vmem:[#allocation46_spill] sm:$0xff]  ;;  %v7786_v38 = vld [vmem:[#allocation27_spill] sm:$0xff] }
 0x55e   : > { %4403 = vmatprep.subr.msk.bf16.mxu0 %vm3052_vm0, %v3276_v1  ;;  %v3530_v32 = vpack.c.bf16 %v3435_v49, %v3432_v24  ;;  %v3537_v48 = vpack.c.bf16 %v3491_v62, %v3488_v18  ;;  %v3483_v30 = vadd.f32 %v6877_v54, %v7103_v45  ;;  %v3235_v55 = vadd.f32 %v6883_v53, %v7109_v3  ;;  %v7788_v15 = vld [vmem:[#allocation31_spill] sm:$0xff]  ;;  %v7791_v62 = vld [vmem:[#allocation52_spill] sm:$0xff] }
 0x55f   : > { %4260 = vmatpush3.bf16.msra.mxu1 %v3532_v12  ;;  %v3566_v63 = vsel %vm3052_vm0, %v3268_v43, 0  ;;  %v3267_v59 = vpack.c.bf16 %v3179_v23, %v3176_v7  ;;  %v3475_v29 = vadd.f32 %v7085_v40, %v6877_v54  ;;  %v3232_v42 = vadd.f32 %v6883_v53, %v7107_v41  ;;  %v7789_v33 = vld [vmem:[#allocation43_spill] sm:$0xff] }
 0x560   : > { %4261 = vmatprep.subr.bf16.mxu1 %v3539_v50  ;;  %v3536_v31 = vpack.c.bf16 %v3483_v30, %v3480_v13  ;;  %v7770_v45 = vpack.c.bf16 %v6922_v36, %v6919_v22  ;;  %v3171_v0 = vadd.f32 %v6883_v53, %v6978_v35  ;;  %v3168_v40 = vadd.f32 %v6883_v53, %v6966_v44  ;;  %v7785_v50 = vld [vmem:[#allocation40_spill] sm:$0xff] }
 0x561   : > { %v3274_v27 = vpack.c.bf16 %v3235_v55, %v3232_v42  ;;  %v3563_v3 = vsel %vm3052_vm0, %v3267_v59, 0  ;;  %v3535_v5 = vpack.c.bf16 %v3475_v29, %v3472_v4  ;;  %v3467_v41 = vadd.f32 %v6877_v54, %v7087_v52 }
 0x562   : > { %v7771_v22 = vpack.c.bf16 %v6937_v10, %v6932_v20  ;;  %v3266_v36 = vpack.c.bf16 %v3171_v0, %v3168_v40  ;;  %v3464_v35 = vadd.f32 %v6877_v54, %v7083_v14  ;;  %v3224_v44 = vadd.f32 %v7093_v37, %v6883_v53  ;;  %v4590_v40 = vld [vmem:[%s7337_s11] sm:$0xff]  }
 0x563   : > { %4262 = vmatpush3.bf16.msra.mxu1 %v3531_v60  ;;  %v7772_v52 = vpack.c.bf16 %v6889_v34, %v6886_v57  ;;  %v7773_v54 = vpack.c.bf16 %v6903_v9, %v6898_v25  ;;  %v3219_v10 = vadd.f32 %v6883_v53, %v7105_v26  ;;  %v3216_v14 = vadd.f32 %v6883_v53, %v7097_v21  ;;  %v7774_v57 = vld [vmem:[#allocation55_spill] sm:$0xff]  ;;  %v7775_v34 = vld [vmem:[#allocation33_spill] sm:$0xff]  ;;  %v7780_v9 = vld [vmem:[#allocation30_spill] sm:$0xff] }
 0x564   : > { %4263 = vmatprep.subr.bf16.mxu1 %v3538_v61  ;;  %v3534_v56 = vpack.c.bf16 %v3467_v41, %v3464_v35  ;;  %v3273_v47 = vpack.c.bf16 %v3227_v8, %v3224_v44  ;;  %v3560_v20 = vsel %vm3052_vm0, %v3266_v36, 0  ;;  %v7776_v28 = vpack.c.bf16 %v7774_v57, %v7775_v34  ;;  %v7781_v26 = vld [vmem:[#allocation35_spill] sm:$0xff]  ;;  %v7783_v21 = vld [vmem:[#allocation42_spill] sm:$0xff]  ;;  %v4591_v8 = vld [vmem:[%s7339_s13 + $0x10] ss:$8 sps:$4 sm:$0xff]  }
 0x565   : > { %4242 = vmatpush3.bf16.xpose.msra.mxu0 %v3566_v63  ;;  %v3272_v37 = vpack.c.bf16 %v3219_v10, %v3216_v14  ;;  %v7779_v46 = vpack.c.bf16 %v7777_v16, %v7778_v11  ;;  %v7782_v1 = vpack.c.bf16 %v7780_v9, %v7781_v26  ;;  %v3203_v6 = vadd.f32 %v6883_v53, %v7783_v21  ;;  %v4598_v10 = vld [vmem:[%s7341_s15 + $0x30] sm:$0xff]   ;;  %v4599_v14 = vld [vmem:[%s7341_s15 + $0x28] sm:$0xff]   ;;  %v4601_v57 = vld [vmem:[%s7341_s15 + $0x18] sm:$0xff]  }
 0x566   : > { %4404 = vmatprep.subr.msk.bf16.mxu0 %vm3052_vm0, %v3275_v51  ;;  %v3557_v17 = vsel %vm3052_vm0, %v7776_v28, 0  ;;  %v3200_v12 = vadd.f32 %v6883_v53, %v7784_v19  ;;  %v7787_v2 = vpack.c.bf16 %v7785_v50, %v7786_v38  ;;  %v7790_v60 = vpack.c.bf16 %v7788_v15, %v7789_v33  ;;  %v4602_v34 = vld [vmem:[%s7341_s15 + $0x10] sm:$0xff]   ;;  %v4177_v28 = vld [vmem:[%s7338_s12] ss:$0 sm:$0xff]  ;;  %v4603_v26 = vld [vmem:[%s7341_s15 + $0x8] sm:$0xff]  }
 0x567   : > { %4264 = vmatpush3.bf16.msra.mxu1 %v3530_v32  ;;  %v3554_v25 = vsel %vm3052_vm0, %v7779_v46, 0  ;;  %v4646_v29 = vmov 0.0   ;;  %v3769_v21 = vlaneseq }
 0x568   : > { %4265 = vmatprep.subr.bf16.mxu1 %v3537_v48  ;;  %v3270_v39 = vpack.c.bf16 %v3203_v6, %v3200_v12  ;;  %v3551_v43 = vsel %vm3052_vm0, %v7787_v2, 0  ;;  %v3548_v49 = vsel %vm3052_vm0, %v7790_v60, 0  ;;  %v3767_v12 = vld [vmem:[%s7340_s14] sm:$0x3] }
 0x569   : > { %v3770_v6 = vshrl.u32 %v3769_v21, 7 }
 0x56b   : > { %4266 = vmatpush3.bf16.msra.mxu1 %v7770_v45  ;;  %v3771_v19 = vsub.s32 0, %v3770_v6 }
 0x56c   : > { %4267 = vmatprep.subr.bf16.mxu1 %v3536_v31 }
 0x56d   : > { %4244 = vmatpush3.bf16.xpose.msra.mxu0 %v3563_v3  ;;  %v4589_v3 = vld [vmem:[%s7337_s11 + $0x8] sm:$0xff]   ;;  %v3772_v50 = vrot.slane %v3767_v12, %v3771_v19 }
 0x56e   : > { %4405 = vmatprep.subr.msk.bf16.mxu0 %vm3052_vm0, %v3274_v27 }
 0x56f   : > { %4268 = vmatpush3.bf16.msra.mxu1 %v7771_v22 }
 0x570   : > { %4269 = vmatprep.subr.bf16.mxu1 %v3535_v5  ;;  %v4593_v5 = vld [vmem:[%s7339_s13 + $0x14] ss:$8 sps:$4 sm:$0xff]  }
 0x573   : > { %4270 = vmatpush3.bf16.msra.mxu1 %v7772_v52  ;;  %v7792_v52 = vmov 0  }
 0x574   : > { %4271 = vmatprep.subr.bf16.mxu1 %v3534_v56 }
 0x575   : > { %4246 = vmatpush3.bf16.xpose.msra.mxu0 %v3560_v20  ;;  %v4594_v20 = vld [vmem:[%s7339_s13] ss:$8 sps:$4 sm:$0xff]  }
 0x576   : > { %4406 = vmatprep.subr.msk.bf16.mxu0 %vm3052_vm0, %v3273_v47  ;;  %v4596_v47 = vld [vmem:[%s7339_s13 + $0x4] ss:$8 sps:$4 sm:$0xff]  }
 0x577   : > { %4272 = vmatpush3.bf16.msra.mxu1 %v7773_v54  ;;  %v4597_v54 = vld [vmem:[%s7341_s15 + $0x38] sm:$0xff]  }
 0x578   : > { %4366 = vmatprep.subr.bf16.mxu1 %v4646_v29 }
 0x57d   : > { %4248 = vmatpush3.bf16.xpose.msra.mxu0 %v3557_v17 }
 0x57e   : > { %4407 = vmatprep.subr.msk.bf16.mxu0 %vm3052_vm0, %v3272_v37  ;;  %v4600_v37 = vld [vmem:[%s7341_s15 + $0x20] sm:$0xff]  }
 0x585   : > { %4250 = vmatpush3.bf16.xpose.msra.mxu0 %v3554_v25 }
 0x586   : > { %4408 = vmatprep.subr.msk.bf16.mxu0 %vm3052_vm0, %v7782_v1  ;;  %v4604_v1 = vld [vmem:[%s7341_s15] sm:$0xff]  }
 0x58d   : > { %4252 = vmatpush3.bf16.xpose.msra.mxu0 %v3551_v43 }
 0x58e   : > { %4409 = vmatprep.subr.msk.bf16.mxu0 %vm3052_vm0, %v3270_v39  ;;  %v3775_v39 = vsub.s32 1, %v3770_v6 }
 0x590   : > { %v3776_v38 = vrot.slane %v3767_v12, %v3775_v39 }
 0x595   : > { %4254 = vmatpush3.bf16.xpose.msra.mxu0 %v3548_v49 }
 0x596   : > { %4374 = vmatprep.subr.bf16.mxu0 %v4646_v29 }
 0x59c   : > { %4256 = vmatmul.mubr.msk.bf16.vlgmr.msra.gmra.mxu0 %vm3052_vm0, %v7791_v62 }
 0x59d   : > { %4390 = vmatprep.mubr.msk.bf16.mxu0 %vm4647_vm1, %v4646_v29  ;;  %4375 = vmatpush3.bf16.msra.mxu0 %v4597_v54 }
 0x59e   : > { %4376 = vmatprep.subr.bf16.mxu0 %v4646_v29 }
 0x5a1   : > { %4377 = vmatpush3.bf16.msra.mxu0 %v4598_v10 }
 0x5a2   : > { %4378 = vmatprep.subr.bf16.mxu0 %v4646_v29 }
 0x5a5   : > { %4379 = vmatpush3.bf16.msra.mxu0 %v4599_v14 }
 0x5a6   : > { %4380 = vmatprep.subr.bf16.mxu0 %v4646_v29 }
 0x5a9   : > { %4381 = vmatpush3.bf16.msra.mxu0 %v4600_v37 }
 0x5aa   : > { %4382 = vmatprep.subr.bf16.mxu0 %v4646_v29 }
 0x5ad   : > { %4383 = vmatpush3.bf16.msra.mxu0 %v4601_v57 }
 0x5ae   : > { %4384 = vmatprep.subr.bf16.mxu0 %v4646_v29 }
 0x5b1   : > { %4385 = vmatpush3.bf16.msra.mxu0 %v4602_v34 }
 0x5b2   : > { %4386 = vmatprep.subr.bf16.mxu0 %v4646_v29 }
 0x5b5   : > { %4387 = vmatpush3.bf16.msra.mxu0 %v4603_v26 }
 0x5b6   : > { %4388 = vmatprep.subr.bf16.mxu0 %v4646_v29 }
 0x5b9   : > { %4389 = vmatpush3.bf16.msra.mxu0 %v4604_v1 }
 0x65c   : > { %v3629_v58 = vpop.f32.mrf.mxu0 }
 0x65d   : > { %v3636_v61 = vmul.f32 0.17677669, %v3629_v58 }
 0x65e   : > { %v3631_v53 = vpop.f32.mrf.mxu0 }
 0x65f   : > { %v3637_v24 = vmul.f32 0.17677669, %v3631_v53  ;;  %v4605_v53 = vld [vmem:[%s7343_s17 + $0x8] sm:$0xff]  }
 0x660   : > { %v3633_v23 = vpop.f32.mrf.mxu0 }
 0x661   : > { %v3638_v18 = vmax.f32 %v3636_v61, %v3637_v24 }
 0x662   : > { %v3634_v51 = vpop.f32.mrf.mxu0 }
 0x663   : > { %3639 = vmax.xlane.f32.xlu1 %v3638_v18 }
 0x6ec   : > { %v3640_v63 = vpop.xlane.xlu1 %3639 }
 0x6ed   : > { %v3641_v32 = vsub.f32 %v3636_v61, %v3640_v63  ;;  %v3642_v7 = vsub.f32 %v3637_v24, %v3640_v63  ;;  %v4606_v61 = vld [vmem:[%s7343_s17] sm:$0xff]  }
 0x6ee   : > { %v4186_v24 = vld [vmem:[%s7342_s16] ss:$0 sm:$0xff] }
 0x6ef   : > { %v3643_v48 = vmul.f32 1.442695, %v3641_v32  ;;  %v3645_v30 = vmul.f32 1.442695, %v3642_v7 }
 0x6f1   : > { %4607 = vpow2.f32 %v3643_v48 }
 0x6f2   : > { %4609 = vpow2.f32 %v3645_v30  ;;  %v4195_v30 = vld [vmem:[%s7344_s18] ss:$0 sm:$0xff] }
 0x6fe   : > { %v4608_v59 = vpop.eup %4607 }
 0x6ff   : > { %v4610_v13 = vpop.eup %4609 }
 0x700   : > { %v3647_v55 = vadd.f32 %v4610_v13, %v4608_v59 }
 0x702   : > { %3648 = vadd.xlane.f32.xlu0 %v3647_v55 }
 0x78b   : > { %v3649_v31 = vpop.xlane.xlu0 %3648 }
 0x78c   : > { %4611 = vrcp.f32 %v3649_v31 }
 0x799   : > { %v4612_v42 = vpop.eup %4611 }
 0x79a   : > { %v3652_v45 = vmul.f32 %v4612_v42, %v4610_v13  ;;  %v3651_v0 = vmul.f32 %v4612_v42, %v4608_v59 }
 0x79c   : > { %v3654_v4 = vpack.c.bf16 %v3652_v45, %v3652_v45  ;;  %v3653_v27 = vpack.c.bf16 %v3651_v0, %v3651_v0 }
 0x79e   : > { %3687 = vmatprep.mubr.bf16.mxu1 %v3654_v4 }
 0x79f   : > { %3688 = vmatmul.mubr.bf16.vlgmr.msra.gmra.mxu1 %v3653_v27 }
 0x7a0   : > { %4367 = vmatpush3.bf16.msra.mxu1 %v4589_v3  ;;  %4370 = vmatprep.mubr.msk.bf16.mxu1 %vm4647_vm1, %v4646_v29 }
 0x7a1   : > { %4368 = vmatprep.subr.bf16.mxu1 %v4646_v29 }
 0x7a4   : > { %4369 = vmatpush3.bf16.msra.mxu1 %v4590_v40 }
 0x7a5   : > { %3814 = vmatprep.subr.bf16.mxu1 %v4593_v5 }
 0x85f   : > { %v4273_v41 = vpop.f32.mrf.mxu1 }
 0x861   : > { %v4274_v22 = vpop.f32.mrf.mxu1 }
 0x862   : > { %v4275_v36 = vadd.f32 %v4274_v22, %v4273_v41 }
 0x863   : > { %v4276_v35 = vpop.f32.mrf.mxu1 }
 0x864   : > { %v3695_v56 = vpack.c.bf16 %v4275_v36, %v4275_v36 }
 0x865   : > { %v4277_v44 = vpop.f32.mrf.mxu1 }
 0x866   : > { %4371 = vmatmul.mubr.msk.bf16.vlgmr.msra.gmra.mxu1 %vm3052_vm0, %v3695_v56 }
 0x867   : > { %3815 = vmatpush1.bf16.msra.mxu1 %v4591_v8  ;;  %3834 = vmatprep.mubr.bf16.mxu1 %v7792_v52 }
 0x868   : > { %3816 = vmatprep.subr.bf16.mxu1 %v4596_v47 }
 0x86b   : > { %3817 = vmatpush1.bf16.msra.mxu1 %v4594_v20 }
 0x86c   : > { %4394 = vmatprep.subr.bf16.mxu1 %v4646_v29 }
 0x926   : > { %v3756_v17 = vpop.f32.mrf.mxu1 }
 0x927   : > { %v3757_v16 = vadd.f32 %v4177_v28, %v3756_v17 }
 0x928   : > { %v4372_v11 = vpop.f32.mrf.mxu1 }
 0x929   : > { %v3762_v46 = vpack.c.bf16 %v3757_v16, %v3757_v16 }
 0x92a   : > { %v3759_v25 = vpop.f32.mrf.mxu1 }
 0x92b   : > { %4185 = vmatmul.mubr.msk.bf16.vlgmr.msra.gmra.mxu1 %vm3052_vm0, %v3762_v46 }
 0x92c   : > { %v4373_v9 = vpop.f32.mrf.mxu1  ;;  %4398 = vmatprep.mubr.msk.bf16.mxu1 %vm4647_vm1, %v4646_v29  ;;  %4395 = vmatpush3.bf16.msra.mxu1 %v4605_v53 }
 0x92d   : > { %4396 = vmatprep.subr.bf16.mxu1 %v4646_v29 }
 0x930   : > { %4397 = vmatpush3.bf16.msra.mxu1 %v4606_v61 }
 0x9eb   : > { %v3836_v2 = vpop.f32.mrf.mxu1 }
 0x9ec   : > { %v3837_v43 = vadd.f32 %v3836_v2, %v3772_v50 }
 0x9ed   : > { %v3838_v15 = vpop.f32.mrf.mxu1 }
 0x9ee   : > { %4030 = vst [vmem:[%s634_s29] sm:$0xff] %v3837_v43  ;;  %v3839_v33 = vadd.f32 %v3838_v15, %v3776_v38 }
 0x9ef   : > { %v3840_v60 = vpop.f32.mrf.mxu1 }
 0x9f0   : > { %v3843_v49 = vmax.f32 %v3839_v33, 0.0 }
 0x9f1   : > { %v3841_v62 = vpop.f32.mrf.mxu1 }
 0x9f2   : > { %v3844_v58 = vpack.c.bf16 %v3843_v49, %v3843_v49 }
 0x9f4   : > { %4391 = vmatmul.mubr.bf16.vlgmr.msra.gmra.mxu0 %v3844_v58 }
 0xab4   : > { %v3950_v23 = vpop.f32.mrf.mxu0 }
 0xab5   : > { %v3951_v18 = vadd.f32 %v4186_v24, %v3950_v23 }
 0xab6   : > { %v4392_v51 = vpop.f32.mrf.mxu0 }
 0xab7   : > { %v3956_v63 = vmax.f32 %v3951_v18, 0.0 }
 0xab8   : > { %v3953_v32 = vpop.f32.mrf.mxu0 }
 0xab9   : > { %v3957_v7 = vpack.c.bf16 %v3956_v63, %v3956_v63 }
 0xaba   : > { %v4393_v48 = vpop.f32.mrf.mxu0 }
 0xabb   : > { %4399 = vmatmul.mubr.msk.bf16.vlgmr.msra.gmra.mxu1 %vm3052_vm0, %v3957_v7 }
 0xb7b   : > { %v4018_v59 = vpop.f32.mrf.mxu1 }
 0xb7c   : > { %v4019_v13 = vadd.f32 %v4195_v30, %v4018_v59 }
 0xb7d   : > { %v4400_v55 = vpop.f32.mrf.mxu1 }
 0xb7e   : > { %v4199_v29 = vmul.f32 -1.442695, %v4019_v13 }
 0xb7f   : > { %v4021_v31 = vpop.f32.mrf.mxu1 }
 0xb80   : > { %4613 = vpow2.f32 %v4199_v29 }
 0xb81   : > { %v4401_v42 = vpop.f32.mrf.mxu1 }
 0xb8d   : > { %v4614_v45 = vpop.eup %4613 }
 0xb8e   : > { %v4027_v0 = vadd.f32 1.0, %v4614_v45 }
 0xb90   : > { %4615 = vrcp.f32 %v4027_v0 }
 0xb9d   : > { %v4616_v4 = vpop.eup %4615 }
 0xb9e   : > { %4031 = vst [vmem:[%s638_s21] sm:$0xff] %v4616_v4 }
 0xb9f PF: > { %s31_s1 = sadd.s32 1, %s4636_s1  }
 0xba0   : > { %p28_p4 = scmp.ge.s32.totalorder %s31_s1, 4  }
 0xba2   :  { %30 = sbr.rel (!%p28_p4) target bundleno = 6 (0x6), region = 138 }

</bundles_post_ra>
